<compile_context>
chip_gen: v7x
topology: tpu7x:2x2x1
jax: 0.10.0
libtpu: 0.0.40
codegen_flags: <defaults>
</compile_context>

<pallas_src>
import jax
import jax.numpy as jnp
from jax.experimental import pallas as pl
from jax.experimental.pallas import tpu as pltpu

_EPS = 1e-5
_BF16 = jnp.bfloat16


def _ds(start, size, stride=1):
    return pl.ds(start, size) if stride == 1 else pl.ds(start, size, stride)


# --------------------------- kernel A: conv1 (+ optional 1x1 projection) ----
def _make_conv1_kernel(H, W, Cin, Cm, stride, projection):
    H1 = (H - 1) // stride + 1
    W1 = (W - 1) // stride + 1
    R = H1 * W1

    def kernel(*refs):
        if projection:
            (x_ref, w1_ref, ws_ref,
             y1_ref, s1_ref, ys_ref, ss_ref,
             xpad_ref, col_ref) = refs
        else:
            (x_ref, w1_ref,
             y1_ref, s1_ref,
             xpad_ref, col_ref) = refs

        # Zero only the 1-pixel halo strips of the padded image scratch, then
        # copy the interior (no full-buffer zero fill followed by a rewrite).
        zrow = jnp.zeros((1, W + 2, Cin), jnp.float32)
        xpad_ref[0:1, :, :] = zrow
        xpad_ref[H + 1:H + 2, :, :] = zrow
        zcol = jnp.zeros((H, 1, Cin), jnp.float32)
        xpad_ref[1:H + 1, 0:1, :] = zcol
        xpad_ref[1:H + 1, W + 1:W + 2, :] = zcol
        xpad_ref[1:H + 1, 1:W + 1, :] = x_ref[0]

        # im2col -> single matmul with K = 9*Cin (accumulation stays inside the
        # MXU), default precision (single bf16 pass, f32 accumulate).
        for kh in range(3):
            for kw in range(3):
                t = kh * 3 + kw
                tap = xpad_ref[_ds(kh, H1, stride), _ds(kw, W1, stride), :]
                col_ref[:, t * Cin:(t + 1) * Cin] = tap.reshape(R, Cin)

        y = jnp.dot(col_ref[...], w1_ref[...],
                    preferred_element_type=jnp.float32,
                    precision=jax.lax.Precision.DEFAULT)          # (R, Cm) f32

        # Per-image BN partials (sum, sum of squares) in one traversal.
        s1_ref[...] = jnp.concatenate(
            [jnp.sum(y, axis=0, keepdims=True),
             jnp.sum(y * y, axis=0, keepdims=True)], axis=0).reshape(1, 2, Cm)
        y1_ref[...] = y.reshape(1, H1, W1, Cm).astype(_BF16)

        if projection:
            sp = x_ref[:, _ds(0, H1, stride), _ds(0, W1, stride), :]
            ys = jnp.dot(sp.reshape(R, Cin), ws_ref[...],
                         preferred_element_type=jnp.float32,
                         precision=jax.lax.Precision.DEFAULT)     # (R, Cm) f32
            ss_ref[...] = jnp.concatenate(
                [jnp.sum(ys, axis=0, keepdims=True),
                 jnp.sum(ys * ys, axis=0, keepdims=True)],
                axis=0).reshape(1, 2, Cm)
            ys_ref[...] = ys.reshape(1, H1, W1, Cm).astype(_BF16)

    return kernel, H1, W1


# --------------------------- kernel B: bn1 affine + relu + conv2 ------------
def _make_conv2_kernel(H1, W1, Cm):
    R = H1 * W1

    def kernel(y1_ref, a1_ref, b1_ref, w2_ref, y2_ref, s2_ref,
               apad_ref, col_ref):
        # Folded BN1 affine + ReLU (f32 VPU math).
        a = jnp.maximum(
            y1_ref[0].astype(jnp.float32) * a1_ref[...] + b1_ref[...], 0.0)

        # Halo-only zeroing of the padded activation scratch + interior write.
        zrow = jnp.zeros((1, W1 + 2, Cm), jnp.float32)
        apad_ref[0:1, :, :] = zrow
        apad_ref[H1 + 1:H1 + 2, :, :] = zrow
        zcol = jnp.zeros((H1, 1, Cm), jnp.float32)
        apad_ref[1:H1 + 1, 0:1, :] = zcol
        apad_ref[1:H1 + 1, W1 + 1:W1 + 2, :] = zcol
        apad_ref[1:H1 + 1, 1:W1 + 1, :] = a

        # im2col -> single matmul with K = 9*Cm.
        for kh in range(3):
            for kw in range(3):
                t = kh * 3 + kw
                tap = apad_ref[kh:kh + H1, kw:kw + W1, :]
                col_ref[:, t * Cm:(t + 1) * Cm] = tap.reshape(R, Cm)

        y = jnp.dot(col_ref[...], w2_ref[...],
                    preferred_element_type=jnp.float32,
                    precision=jax.lax.Precision.DEFAULT)          # (R, Cm) f32

        s2_ref[...] = jnp.concatenate(
            [jnp.sum(y, axis=0, keepdims=True),
             jnp.sum(y * y, axis=0, keepdims=True)], axis=0).reshape(1, 2, Cm)
        y2_ref[...] = y.reshape(1, H1, W1, Cm).astype(_BF16)

    return kernel


# --------------------------- kernel C: bn2 affine + shortcut + relu ---------
def _residual_kernel(y2_ref, sc_ref, a2_ref, b2_ref, as_ref, bs_ref, o_ref):
    main = y2_ref[...].astype(jnp.float32) * a2_ref[...] + b2_ref[...]
    sc = sc_ref[...].astype(jnp.float32) * as_ref[...] + bs_ref[...]
    o_ref[...] = jnp.maximum(main + sc, 0.0)


# --------------------------- wrapper ----------------------------------------
def basic_block_forward(x_nchw, params, stride):
    """Pallas BasicBlock forward. x_nchw: (N, Cin, H, W) f32. Returns NCHW."""
    N, Cin, H, W = x_nchw.shape
    Cm = params["w1"].shape[0]
    projection = (stride != 1) or (Cin != Cm)

    # Layout plumbing: NCHW -> NHWC once at the boundary (channels on lanes).
    x = jnp.transpose(x_nchw, (0, 2, 3, 1)).astype(jnp.float32)

    # Conv weights -> im2col matrices (OIHW -> (9*Cin, Cout)).
    w1m = jnp.transpose(params["w1"], (2, 3, 1, 0)).reshape(9 * Cin, Cm)
    w2m = jnp.transpose(params["w2"], (2, 3, 1, 0)).reshape(9 * Cm, Cm)

    conv1_kernel, H1, W1 = _make_conv1_kernel(H, W, Cin, Cm, stride, projection)
    para = pltpu.CompilerParams(dimension_semantics=("parallel",))

    y1_shape = jax.ShapeDtypeStruct((N, H1, W1, Cm), _BF16)
    st_shape = jax.ShapeDtypeStruct((N, 2, Cm), jnp.float32)
    y_spec = pl.BlockSpec((1, H1, W1, Cm), lambda i: (i, 0, 0, 0))
    st_spec = pl.BlockSpec((1, 2, Cm), lambda i: (i, 0, 0))

    in_specs = [pl.BlockSpec((1, H, W, Cin), lambda i: (i, 0, 0, 0)),
                pl.BlockSpec((9 * Cin, Cm), lambda i: (0, 0))]
    inputs = [x, w1m]
    out_shapes = [y1_shape, st_shape]
    out_specs = [y_spec, st_spec]
    if projection:
        wsm = jnp.transpose(params["ws"], (2, 3, 1, 0)).reshape(Cin, Cm)
        in_specs.append(pl.BlockSpec((Cin, Cm), lambda i: (0, 0)))
        inputs.append(wsm)
        out_shapes += [y1_shape, st_shape]
        out_specs += [y_spec, st_spec]

    res_a = pl.pallas_call(
        conv1_kernel,
        grid=(N,),
        in_specs=in_specs,
        out_specs=tuple(out_specs),
        out_shape=tuple(out_shapes),
        scratch_shapes=[pltpu.VMEM((H + 2, W + 2, Cin), jnp.float32),
                        pltpu.VMEM((H1 * W1, 9 * Cin), jnp.float32)],
        compiler_params=para,
    )(*inputs)
    if projection:
        y1, st1, ys, sts = res_a
    else:
        y1, st1 = res_a

    # Fold BN batch statistics into a single per-channel affine (tiny JAX op).
    count = float(N * H1 * W1)

    def _fold(stats, gamma, beta):
        s = jnp.sum(stats[:, 0, :], axis=0)
        ss = jnp.sum(stats[:, 1, :], axis=0)
        mean = s / count
        var = jnp.maximum(ss / count - mean * mean, 0.0)
        scale = gamma * jax.lax.rsqrt(var + _EPS)
        bias = beta - mean * scale
        return scale.reshape(1, Cm).astype(jnp.float32), \
               bias.reshape(1, Cm).astype(jnp.float32)

    scale1, bias1 = _fold(st1, params["g1"], params["b1"])

    conv2_kernel = _make_conv2_kernel(H1, W1, Cm)
    y2, st2 = pl.pallas_call(
        conv2_kernel,
        grid=(N,),
        in_specs=[y_spec,
                  pl.BlockSpec((1, Cm), lambda i: (0, 0)),
                  pl.BlockSpec((1, Cm), lambda i: (0, 0)),
                  pl.BlockSpec((9 * Cm, Cm), lambda i: (0, 0))],
        out_specs=(y_spec, st_spec),
        out_shape=(y1_shape, st_shape),
        scratch_shapes=[pltpu.VMEM((H1 + 2, W1 + 2, Cm), jnp.float32),
                        pltpu.VMEM((H1 * W1, 9 * Cm), jnp.float32)],
        compiler_params=para,
    )(y1, scale1, bias1, w2m)

    scale2, bias2 = _fold(st2, params["g2"], params["b2"])
    if projection:
        scale_s, bias_s = _fold(sts, params["gs"], params["bs"])
        sc_src = ys                       # (N, H1, W1, Cm) bf16
    else:
        scale_s = jnp.ones((1, Cm), jnp.float32)
        bias_s = jnp.zeros((1, Cm), jnp.float32)
        sc_src = x                        # identity: (N, H, W, Cin) f32

    # Final affine + residual + ReLU on a lane-dense (N*H1, W1*Cm) view.
    L = W1 * Cm
    y2f = y2.reshape(N * H1, L)
    scf = sc_src.reshape(N * H1, L)
    a2t = jnp.tile(scale2, (1, W1))
    b2t = jnp.tile(bias2, (1, W1))
    ast = jnp.tile(scale_s, (1, W1))
    bst = jnp.tile(bias_s, (1, W1))

    if H1 % 8 == 0:
        c_grid, rb = (N,), H1
    else:
        c_grid, rb = (1,), N * H1

    out2d = pl.pallas_call(
        _residual_kernel,
        grid=c_grid,
        in_specs=[pl.BlockSpec((rb, L), lambda i: (i, 0)),
                  pl.BlockSpec((rb, L), lambda i: (i, 0)),
                  pl.BlockSpec((1, L), lambda i: (0, 0)),
                  pl.BlockSpec((1, L), lambda i: (0, 0)),
                  pl.BlockSpec((1, L), lambda i: (0, 0)),
                  pl.BlockSpec((1, L), lambda i: (0, 0))],
        out_specs=pl.BlockSpec((rb, L), lambda i: (i, 0)),
        out_shape=jax.ShapeDtypeStruct((N * H1, L), jnp.float32),
        compiler_params=para,
    )(y2f, scf, a2t, b2t, ast, bst)

    out_nhwc = out2d.reshape(N, H1, W1, Cm)
    return jnp.transpose(out_nhwc, (0, 3, 1, 2)).astype(x_nchw.dtype)


# ---------------- pure-JAX reference (for correctness check) ----------------
def basic_block_reference(x, params, stride):
    def conv(x, w, s, pad):
        return jax.lax.conv_general_dilated(
            x, w, (s, s), ((pad, pad), (pad, pad)),
            dimension_numbers=("NCHW", "OIHW", "NCHW"))

    def bn(x, g, b):
        mean = jnp.mean(x, axis=(0, 2, 3), keepdims=True)
        var = jnp.mean((x - mean) ** 2, axis=(0, 2, 3), keepdims=True)
        return ((x - mean) * jax.lax.rsqrt(var + _EPS)
                * g.reshape(1, -1, 1, 1) + b.reshape(1, -1, 1, 1))

    Cm = params["w1"].shape[0]
    Cin = x.shape[1]
    out = jax.nn.relu(bn(conv(x, params["w1"], stride, 1), params["g1"], params["b1"]))
    out = bn(conv(out, params["w2"], 1, 1), params["g2"], params["b2"])
    if stride != 1 or Cin != Cm:
        sc = bn(conv(x, params["ws"], stride, 0), params["gs"], params["bs"])
    else:
        sc = x
    return jax.nn.relu(out + sc)


def init_params(key, in_planes, planes, stride):
    ks = jax.random.split(key, 8)
    params = {
        "w1": 0.1 * jax.random.normal(ks[0], (planes, in_planes, 3, 3), jnp.float32),
        "g1": 1.0 + 0.1 * jax.random.normal(ks[1], (planes,), jnp.float32),
        "b1": 0.1 * jax.random.normal(ks[2], (planes,), jnp.float32),
        "w2": 0.1 * jax.random.normal(ks[3], (planes, planes, 3, 3), jnp.float32),
        "g2": 1.0 + 0.1 * jax.random.normal(ks[4], (planes,), jnp.float32),
        "b2": 0.1 * jax.random.normal(ks[5], (planes,), jnp.float32),
    }
    if stride != 1 or in_planes != planes:
        params["ws"] = 0.1 * jax.random.normal(ks[6], (planes, in_planes, 1, 1), jnp.float32)
        params["gs"] = 1.0 + 0.05 * jax.random.normal(ks[7], (planes,), jnp.float32)
        params["bs"] = 0.05 * jax.random.normal(ks[7], (planes,), jnp.float32)
    return params


if __name__ == "__main__":
    key = jax.random.PRNGKey(0)
    kx1, kx2, kp1, kp2 = jax.random.split(key, 4)

    fwd = jax.jit(basic_block_forward, static_argnums=(2,))

    # The kernel uses the native bf16 MXU path (Precision.DEFAULT) and bf16
    # HBM staging of intermediates, while the reference runs plain f32 ops,
    # so a bf16-level tolerance is appropriate.
    RTOL = ATOL = 2e-2

    # Case 1: identity shortcut (stride=1, in_planes == planes)
    x1 = jax.random.normal(kx1, (2, 8, 16, 16), jnp.float32)     # NCHW
    p1 = init_params(kp1, 8, 8, 1)
    y1 = jax.block_until_ready(fwd(x1, p1, 1))
    r1 = basic_block_reference(x1, p1, 1)
    assert y1.shape == r1.shape
    assert jnp.allclose(y1, r1, rtol=RTOL, atol=ATOL), float(jnp.max(jnp.abs(y1 - r1)))

    # Case 2: projection shortcut (in_planes != planes -> 1x1 conv + bn)
    x2 = jax.random.normal(kx2, (2, 4, 16, 16), jnp.float32)     # NCHW
    p2 = init_params(kp2, 4, 8, 1)
    y2 = jax.block_until_ready(fwd(x2, p2, 1))
    r2 = basic_block_reference(x2, p2, 1)
    assert y2.shape == r2.shape
    assert jnp.allclose(y2, r2, rtol=RTOL, atol=ATOL), float(jnp.max(jnp.abs(y2 - r2)))

    print("KERNEL_OK")
</pallas_src>

<mosaic_0001>
module attributes {stable_mosaic.version = 11 : i64} {
  func.func @kernel(%arg0: i32, %arg1: memref<1x16x16x8xf32, #tpu.memory_space<vmem>>, %arg2: memref<72x8xf32, #tpu.memory_space<vmem>>, %arg3: memref<1x16x16x8xbf16, #tpu.memory_space<vmem>>, %arg4: memref<1x2x8xf32, #tpu.memory_space<vmem>>, %arg5: memref<18x18x8xf32, #tpu.memory_space<vmem>>, %arg6: memref<256x72xf32, #tpu.memory_space<vmem>>) attributes {dimension_semantics = [#tpu.dimension_semantics<parallel>], iteration_bounds = array<i64: 2>, scalar_prefetch = 0 : i64, scratch_operands = 2 : i64, tpu.core_type = #tpu.core_type<tc>, window_params = [{transform_indices = @transform_0, window_bounds = array<i64: 1, 16, 16, 8>}, {pipeline_mode = #tpu.pipeline_mode<synchronous>, transform_indices = @transform_1, window_bounds = array<i64: 72, 8>}, {transform_indices = @transform_2, window_bounds = array<i64: 1, 16, 16, 8>}, {transform_indices = @transform_3, window_bounds = array<i64: 1, 2, 8>}]} {
    %cst = arith.constant 0.000000e+00 : f32
    %0 = vector.broadcast %cst : f32 to vector<1x18x8xf32>
    %c0 = arith.constant 0 : index
    %c0_0 = arith.constant 0 : index
    %c0_1 = arith.constant 0 : index
    %1 = vector.load %arg5[%c0, %c0_0, %c0_1] : memref<18x18x8xf32, #tpu.memory_space<vmem>>, vector<1x18x8xf32>
    tpu.vector_store %arg5[%c0, %c0_0, %c0_1], %0 {strides = array<i32>} : memref<18x18x8xf32, #tpu.memory_space<vmem>>, vector<1x18x8xf32>,
    %c17 = arith.constant 17 : index
    %c0_2 = arith.constant 0 : index
    %c0_3 = arith.constant 0 : index
    %2 = vector.load %arg5[%c17, %c0_2, %c0_3] : memref<18x18x8xf32, #tpu.memory_space<vmem>>, vector<1x18x8xf32>
    tpu.vector_store %arg5[%c17, %c0_2, %c0_3], %0 {strides = array<i32>} : memref<18x18x8xf32, #tpu.memory_space<vmem>>, vector<1x18x8xf32>,
    %cst_4 = arith.constant 0.000000e+00 : f32
    %3 = vector.broadcast %cst_4 : f32 to vector<16x1x8xf32>
    %c1 = arith.constant 1 : index
    %c0_5 = arith.constant 0 : index
    %c0_6 = arith.constant 0 : index
    %4 = vector.load %arg5[%c1, %c0_5, %c0_6] : memref<18x18x8xf32, #tpu.memory_space<vmem>>, vector<16x1x8xf32>
    tpu.vector_store %arg5[%c1, %c0_5, %c0_6], %3 {strides = array<i32>} : memref<18x18x8xf32, #tpu.memory_space<vmem>>, vector<16x1x8xf32>,
    %c1_7 = arith.constant 1 : index
    %c17_8 = arith.constant 17 : index
    %c0_9 = arith.constant 0 : index
    %5 = vector.load %arg5[%c1_7, %c17_8, %c0_9] : memref<18x18x8xf32, #tpu.memory_space<vmem>>, vector<16x1x8xf32>
    tpu.vector_store %arg5[%c1_7, %c17_8, %c0_9], %3 {strides = array<i32>} : memref<18x18x8xf32, #tpu.memory_space<vmem>>, vector<16x1x8xf32>,
    %c0_10 = arith.constant 0 : index
    %c0_11 = arith.constant 0 : index
    %c0_12 = arith.constant 0 : index
    %c0_13 = arith.constant 0 : index
    %6 = vector.load %arg1[%c0_10, %c0_11, %c0_12, %c0_13] : memref<1x16x16x8xf32, #tpu.memory_space<vmem>>, vector<1x16x16x8xf32>
    %7 = vector.shape_cast %6 : vector<1x16x16x8xf32> to vector<16x16x8xf32>
    %c1_14 = arith.constant 1 : index
    %c1_15 = arith.constant 1 : index
    %c0_16 = arith.constant 0 : index
    %8 = vector.load %arg5[%c1_14, %c1_15, %c0_16] : memref<18x18x8xf32, #tpu.memory_space<vmem>>, vector<16x16x8xf32>
    tpu.vector_store %arg5[%c1_14, %c1_15, %c0_16], %7 {strides = array<i32>} : memref<18x18x8xf32, #tpu.memory_space<vmem>>, vector<16x16x8xf32>,
    %c0_17 = arith.constant 0 : index
    %c0_18 = arith.constant 0 : index
    %c0_19 = arith.constant 0 : index
    %9 = vector.load %arg5[%c0_17, %c0_18, %c0_19] : memref<18x18x8xf32, #tpu.memory_space<vmem>>, vector<16x16x8xf32>
    %10 = vector.shape_cast %9 : vector<16x16x8xf32> to vector<256x8xf32>
    %c0_20 = arith.constant 0 : index
    %c0_21 = arith.constant 0 : index
    %11 = vector.load %arg6[%c0_20, %c0_21] : memref<256x72xf32, #tpu.memory_space<vmem>>, vector<256x8xf32>
    tpu.vector_store %arg6[%c0_20, %c0_21], %10 {strides = array<i32>} : memref<256x72xf32, #tpu.memory_space<vmem>>, vector<256x8xf32>,
    %c0_22 = arith.constant 0 : index
    %c1_23 = arith.constant 1 : index
    %c0_24 = arith.constant 0 : index
    %12 = vector.load %arg5[%c0_22, %c1_23, %c0_24] : memref<18x18x8xf32, #tpu.memory_space<vmem>>, vector<16x16x8xf32>
    %13 = vector.shape_cast %12 : vector<16x16x8xf32> to vector<256x8xf32>
    %c0_25 = arith.constant 0 : index
    %c8 = arith.constant 8 : index
    %14 = vector.load %arg6[%c0_25, %c8] : memref<256x72xf32, #tpu.memory_space<vmem>>, vector<256x8xf32>
    tpu.vector_store %arg6[%c0_25, %c8], %13 {strides = array<i32>} : memref<256x72xf32, #tpu.memory_space<vmem>>, vector<256x8xf32>,
    %c0_26 = arith.constant 0 : index
    %c2 = arith.constant 2 : index
    %c0_27 = arith.constant 0 : index
    %15 = vector.load %arg5[%c0_26, %c2, %c0_27] : memref<18x18x8xf32, #tpu.memory_space<vmem>>, vector<16x16x8xf32>
    %16 = vector.shape_cast %15 : vector<16x16x8xf32> to vector<256x8xf32>
    %c0_28 = arith.constant 0 : index
    %c16 = arith.constant 16 : index
    %17 = vector.load %arg6[%c0_28, %c16] : memref<256x72xf32, #tpu.memory_space<vmem>>, vector<256x8xf32>
    tpu.vector_store %arg6[%c0_28, %c16], %16 {strides = array<i32>} : memref<256x72xf32, #tpu.memory_space<vmem>>, vector<256x8xf32>,
    %c1_29 = arith.constant 1 : index
    %c0_30 = arith.constant 0 : index
    %c0_31 = arith.constant 0 : index
    %18 = vector.load %arg5[%c1_29, %c0_30, %c0_31] : memref<18x18x8xf32, #tpu.memory_space<vmem>>, vector<16x16x8xf32>
    %19 = vector.shape_cast %18 : vector<16x16x8xf32> to vector<256x8xf32>
    %c0_32 = arith.constant 0 : index
    %c24 = arith.constant 24 : index
    %20 = vector.load %arg6[%c0_32, %c24] : memref<256x72xf32, #tpu.memory_space<vmem>>, vector<256x8xf32>
    tpu.vector_store %arg6[%c0_32, %c24], %19 {strides = array<i32>} : memref<256x72xf32, #tpu.memory_space<vmem>>, vector<256x8xf32>,
    %c1_33 = arith.constant 1 : index
    %c1_34 = arith.constant 1 : index
    %c0_35 = arith.constant 0 : index
    %21 = vector.load %arg5[%c1_33, %c1_34, %c0_35] : memref<18x18x8xf32, #tpu.memory_space<vmem>>, vector<16x16x8xf32>
    %22 = vector.shape_cast %21 : vector<16x16x8xf32> to vector<256x8xf32>
    %c0_36 = arith.constant 0 : index
    %c32 = arith.constant 32 : index
    %23 = vector.load %arg6[%c0_36, %c32] : memref<256x72xf32, #tpu.memory_space<vmem>>, vector<256x8xf32>
    tpu.vector_store %arg6[%c0_36, %c32], %22 {strides = array<i32>} : memref<256x72xf32, #tpu.memory_space<vmem>>, vector<256x8xf32>,
    %c1_37 = arith.constant 1 : index
    %c2_38 = arith.constant 2 : index
    %c0_39 = arith.constant 0 : index
    %24 = vector.load %arg5[%c1_37, %c2_38, %c0_39] : memref<18x18x8xf32, #tpu.memory_space<vmem>>, vector<16x16x8xf32>
    %25 = vector.shape_cast %24 : vector<16x16x8xf32> to vector<256x8xf32>
    %c0_40 = arith.constant 0 : index
    %c40 = arith.constant 40 : index
    %26 = vector.load %arg6[%c0_40, %c40] : memref<256x72xf32, #tpu.memory_space<vmem>>, vector<256x8xf32>
    tpu.vector_store %arg6[%c0_40, %c40], %25 {strides = array<i32>} : memref<256x72xf32, #tpu.memory_space<vmem>>, vector<256x8xf32>,
    %c2_41 = arith.constant 2 : index
    %c0_42 = arith.constant 0 : index
    %c0_43 = arith.constant 0 : index
    %27 = vector.load %arg5[%c2_41, %c0_42, %c0_43] : memref<18x18x8xf32, #tpu.memory_space<vmem>>, vector<16x16x8xf32>
    %28 = vector.shape_cast %27 : vector<16x16x8xf32> to vector<256x8xf32>
    %c0_44 = arith.constant 0 : index
    %c48 = arith.constant 48 : index
    %29 = vector.load %arg6[%c0_44, %c48] : memref<256x72xf32, #tpu.memory_space<vmem>>, vector<256x8xf32>
    tpu.vector_store %arg6[%c0_44, %c48], %28 {strides = array<i32>} : memref<256x72xf32, #tpu.memory_space<vmem>>, vector<256x8xf32>,
    %c2_45 = arith.constant 2 : index
    %c1_46 = arith.constant 1 : index
    %c0_47 = arith.constant 0 : index
    %30 = vector.load %arg5[%c2_45, %c1_46, %c0_47] : memref<18x18x8xf32, #tpu.memory_space<vmem>>, vector<16x16x8xf32>
    %31 = vector.shape_cast %30 : vector<16x16x8xf32> to vector<256x8xf32>
    %c0_48 = arith.constant 0 : index
    %c56 = arith.constant 56 : index
    %32 = vector.load %arg6[%c0_48, %c56] : memref<256x72xf32, #tpu.memory_space<vmem>>, vector<256x8xf32>
    tpu.vector_store %arg6[%c0_48, %c56], %31 {strides = array<i32>} : memref<256x72xf32, #tpu.memory_space<vmem>>, vector<256x8xf32>,
    %c2_49 = arith.constant 2 : index
    %c2_50 = arith.constant 2 : index
    %c0_51 = arith.constant 0 : index
    %33 = vector.load %arg5[%c2_49, %c2_50, %c0_51] : memref<18x18x8xf32, #tpu.memory_space<vmem>>, vector<16x16x8xf32>
    %34 = vector.shape_cast %33 : vector<16x16x8xf32> to vector<256x8xf32>
    %c0_52 = arith.constant 0 : index
    %c64 = arith.constant 64 : index
    %35 = vector.load %arg6[%c0_52, %c64] : memref<256x72xf32, #tpu.memory_space<vmem>>, vector<256x8xf32>
    tpu.vector_store %arg6[%c0_52, %c64], %34 {strides = array<i32>} : memref<256x72xf32, #tpu.memory_space<vmem>>, vector<256x8xf32>,
    %c0_53 = arith.constant 0 : index
    %c0_54 = arith.constant 0 : index
    %36 = vector.load %arg6[%c0_53, %c0_54] : memref<256x72xf32, #tpu.memory_space<vmem>>, vector<256x72xf32>
    %c0_55 = arith.constant 0 : index
    %c0_56 = arith.constant 0 : index
    %37 = vector.load %arg2[%c0_55, %c0_56] : memref<72x8xf32, #tpu.memory_space<vmem>>, vector<72x8xf32>
    %cst_57 = arith.constant dense<0.000000e+00> : vector<256x8xf32>
    %38 = tpu.matmul %36, %37, %cst_57 {dimension_numbers = #tpu.dot_dimension_numbers<[1], [0], [0], [1], [0, 0, 1, 1], [], []>} : vector<256x72xf32>, vector<72x8xf32>, vector<256x8xf32> -> vector<256x8xf32>
    %cst_58 = arith.constant dense<0.000000e+00> : vector<8xf32>
    %39 = vector.multi_reduction <add>, %38, %cst_58 [0] : vector<256x8xf32> to vector<8xf32>
    %40 = vector.shape_cast %39 : vector<8xf32> to vector<1x8xf32>
    %41 = arith.mulf %38, %38 : vector<256x8xf32>
    %cst_59 = arith.constant dense<0.000000e+00> : vector<8xf32>
    %42 = vector.multi_reduction <add>, %41, %cst_59 [0] : vector<256x8xf32> to vector<8xf32>
    %43 = vector.shape_cast %42 : vector<8xf32> to vector<1x8xf32>
    %44 = tpu.concatenate %40, %43 in 0 : vector<1x8xf32>, vector<1x8xf32> -> vector<2x8xf32>
    %45 = vector.shape_cast %44 : vector<2x8xf32> to vector<1x2x8xf32>
    %c0_60 = arith.constant 0 : index
    %c0_61 = arith.constant 0 : index
    %c0_62 = arith.constant 0 : index
    %46 = vector.load %arg4[%c0_60, %c0_61, %c0_62] : memref<1x2x8xf32, #tpu.memory_space<vmem>>, vector<1x2x8xf32>
    tpu.vector_store %arg4[%c0_60, %c0_61, %c0_62], %45 {strides = array<i32>} : memref<1x2x8xf32, #tpu.memory_space<vmem>>, vector<1x2x8xf32>,
    %47 = vector.shape_cast %38 : vector<256x8xf32> to vector<1x16x16x8xf32>
    %48 = arith.truncf %47 : vector<1x16x16x8xf32> to vector<1x16x16x8xbf16>
    %c0_63 = arith.constant 0 : index
    %c0_64 = arith.constant 0 : index
    %c0_65 = arith.constant 0 : index
    %c0_66 = arith.constant 0 : index
    %49 = vector.load %arg3[%c0_63, %c0_64, %c0_65, %c0_66] : memref<1x16x16x8xbf16, #tpu.memory_space<vmem>>, vector<1x16x16x8xbf16>
    tpu.vector_store %arg3[%c0_63, %c0_64, %c0_65, %c0_66], %48 {strides = array<i32>} : memref<1x16x16x8xbf16, #tpu.memory_space<vmem>>, vector<1x16x16x8xbf16>,
    return
  }
  func.func @transform_0(%arg0: i32) -> (i32, i32, i32, i32) {
    %c0_i32 = arith.constant 0 : i32
    %c0_i32_0 = arith.constant 0 : i32
    %c0_i32_1 = arith.constant 0 : i32
    %c0_i32_2 = arith.constant 0 : i32
    return %arg0, %c0_i32, %c0_i32_0, %c0_i32_1 : i32, i32, i32, i32
  }
  func.func @transform_1(%arg0: i32) -> (i32, i32) {
    %c0_i32 = arith.constant 0 : i32
    %c0_i32_0 = arith.constant 0 : i32
    %c0_i32_1 = arith.constant 0 : i32
    return %c0_i32, %c0_i32_0 : i32, i32
  }
  func.func @transform_2(%arg0: i32) -> (i32, i32, i32, i32) {
    %c0_i32 = arith.constant 0 : i32
    %c0_i32_0 = arith.constant 0 : i32
    %c0_i32_1 = arith.constant 0 : i32
    %c0_i32_2 = arith.constant 0 : i32
    return %arg0, %c0_i32, %c0_i32_0, %c0_i32_1 : i32, i32, i32, i32
  }
  func.func @transform_3(%arg0: i32) -> (i32, i32, i32) {
    %c0_i32 = arith.constant 0 : i32
    %c0_i32_0 = arith.constant 0 : i32
    %c0_i32_1 = arith.constant 0 : i32
    return %arg0, %c0_i32, %c0_i32_0 : i32, i32, i32
  }
}

module attributes {stable_mosaic.version = 11 : i64} {
  func.func @kernel(%arg0: i32, %arg1: memref<1x16x16x8xbf16, #tpu.memory_space<vmem>>, %arg2: memref<1x8xf32, #tpu.memory_space<vmem>>, %arg3: memref<1x8xf32, #tpu.memory_space<vmem>>, %arg4: memref<72x8xf32, #tpu.memory_space<vmem>>, %arg5: memref<1x16x16x8xbf16, #tpu.memory_space<vmem>>, %arg6: memref<1x2x8xf32, #tpu.memory_space<vmem>>, %arg7: memref<18x18x8xf32, #tpu.memory_space<vmem>>, %arg8: memref<256x72xf32, #tpu.memory_space<vmem>>) attributes {dimension_semantics = [#tpu.dimension_semantics<parallel>], iteration_bounds = array<i64: 2>, scalar_prefetch = 0 : i64, scratch_operands = 2 : i64, tpu.core_type = #tpu.core_type<tc>, window_params = [{transform_indices = @transform_0, window_bounds = array<i64: 1, 16, 16, 8>}, {pipeline_mode = #tpu.pipeline_mode<synchronous>, transform_indices = @transform_1, window_bounds = array<i64: 1, 8>}, {pipeline_mode = #tpu.pipeline_mode<synchronous>, transform_indices = @transform_2, window_bounds = array<i64: 1, 8>}, {pipeline_mode = #tpu.pipeline_mode<synchronous>, transform_indices = @transform_3, window_bounds = array<i64: 72, 8>}, {transform_indices = @transform_4, window_bounds = array<i64: 1, 16, 16, 8>}, {transform_indices = @transform_5, window_bounds = array<i64: 1, 2, 8>}]} {
    %c0 = arith.constant 0 : index
    %c0_0 = arith.constant 0 : index
    %c0_1 = arith.constant 0 : index
    %c0_2 = arith.constant 0 : index
    %0 = vector.load %arg1[%c0, %c0_0, %c0_1, %c0_2] : memref<1x16x16x8xbf16, #tpu.memory_space<vmem>>, vector<1x16x16x8xbf16>
    %1 = vector.shape_cast %0 : vector<1x16x16x8xbf16> to vector<16x16x8xbf16>
    %2 = arith.extf %1 : vector<16x16x8xbf16> to vector<16x16x8xf32>
    %c0_3 = arith.constant 0 : index
    %c0_4 = arith.constant 0 : index
    %3 = vector.load %arg2[%c0_3, %c0_4] : memref<1x8xf32, #tpu.memory_space<vmem>>, vector<1x8xf32>
    %4 = vector.shape_cast %3 : vector<1x8xf32> to vector<1x1x8xf32>
    %5 = vector.broadcast %4 : vector<1x1x8xf32> to vector<16x16x8xf32>
    %6 = arith.mulf %2, %5 : vector<16x16x8xf32>
    %c0_5 = arith.constant 0 : index
    %c0_6 = arith.constant 0 : index
    %7 = vector.load %arg3[%c0_5, %c0_6] : memref<1x8xf32, #tpu.memory_space<vmem>>, vector<1x8xf32>
    %8 = vector.shape_cast %7 : vector<1x8xf32> to vector<1x1x8xf32>
    %9 = vector.broadcast %8 : vector<1x1x8xf32> to vector<16x16x8xf32>
    %10 = arith.addf %6, %9 : vector<16x16x8xf32>
    %cst = arith.constant 0.000000e+00 : f32
    %11 = vector.broadcast %cst : f32 to vector<16x16x8xf32>
    %12 = arith.maximumf %10, %11 : vector<16x16x8xf32>
    %cst_7 = arith.constant 0.000000e+00 : f32
    %13 = vector.broadcast %cst_7 : f32 to vector<1x18x8xf32>
    %c0_8 = arith.constant 0 : index
    %c0_9 = arith.constant 0 : index
    %c0_10 = arith.constant 0 : index
    %14 = vector.load %arg7[%c0_8, %c0_9, %c0_10] : memref<18x18x8xf32, #tpu.memory_space<vmem>>, vector<1x18x8xf32>
    tpu.vector_store %arg7[%c0_8, %c0_9, %c0_10], %13 {strides = array<i32>} : memref<18x18x8xf32, #tpu.memory_space<vmem>>, vector<1x18x8xf32>,
    %c17 = arith.constant 17 : index
    %c0_11 = arith.constant 0 : index
    %c0_12 = arith.constant 0 : index
    %15 = vector.load %arg7[%c17, %c0_11, %c0_12] : memref<18x18x8xf32, #tpu.memory_space<vmem>>, vector<1x18x8xf32>
    tpu.vector_store %arg7[%c17, %c0_11, %c0_12], %13 {strides = array<i32>} : memref<18x18x8xf32, #tpu.memory_space<vmem>>, vector<1x18x8xf32>,
    %cst_13 = arith.constant 0.000000e+00 : f32
    %16 = vector.broadcast %cst_13 : f32 to vector<16x1x8xf32>
    %c1 = arith.constant 1 : index
    %c0_14 = arith.constant 0 : index
    %c0_15 = arith.constant 0 : index
    %17 = vector.load %arg7[%c1, %c0_14, %c0_15] : memref<18x18x8xf32, #tpu.memory_space<vmem>>, vector<16x1x8xf32>
    tpu.vector_store %arg7[%c1, %c0_14, %c0_15], %16 {strides = array<i32>} : memref<18x18x8xf32, #tpu.memory_space<vmem>>, vector<16x1x8xf32>,
    %c1_16 = arith.constant 1 : index
    %c17_17 = arith.constant 17 : index
    %c0_18 = arith.constant 0 : index
    %18 = vector.load %arg7[%c1_16, %c17_17, %c0_18] : memref<18x18x8xf32, #tpu.memory_space<vmem>>, vector<16x1x8xf32>
    tpu.vector_store %arg7[%c1_16, %c17_17, %c0_18], %16 {strides = array<i32>} : memref<18x18x8xf32, #tpu.memory_space<vmem>>, vector<16x1x8xf32>,
    %c1_19 = arith.constant 1 : index
    %c1_20 = arith.constant 1 : index
    %c0_21 = arith.constant 0 : index
    %19 = vector.load %arg7[%c1_19, %c1_20, %c0_21] : memref<18x18x8xf32, #tpu.memory_space<vmem>>, vector<16x16x8xf32>
    tpu.vector_store %arg7[%c1_19, %c1_20, %c0_21], %12 {strides = array<i32>} : memref<18x18x8xf32, #tpu.memory_space<vmem>>, vector<16x16x8xf32>,
    %c0_22 = arith.constant 0 : index
    %c0_23 = arith.constant 0 : index
    %c0_24 = arith.constant 0 : index
    %20 = vector.load %arg7[%c0_22, %c0_23, %c0_24] : memref<18x18x8xf32, #tpu.memory_space<vmem>>, vector<16x16x8xf32>
    %21 = vector.shape_cast %20 : vector<16x16x8xf32> to vector<256x8xf32>
    %c0_25 = arith.constant 0 : index
    %c0_26 = arith.constant 0 : index
    %22 = vector.load %arg8[%c0_25, %c0_26] : memref<256x72xf32, #tpu.memory_space<vmem>>, vector<256x8xf32>
    tpu.vector_store %arg8[%c0_25, %c0_26], %21 {strides = array<i32>} : memref<256x72xf32, #tpu.memory_space<vmem>>, vector<256x8xf32>,
    %c0_27 = arith.constant 0 : index
    %c1_28 = arith.constant 1 : index
    %c0_29 = arith.constant 0 : index
    %23 = vector.load %arg7[%c0_27, %c1_28, %c0_29] : memref<18x18x8xf32, #tpu.memory_space<vmem>>, vector<16x16x8xf32>
    %24 = vector.shape_cast %23 : vector<16x16x8xf32> to vector<256x8xf32>
    %c0_30 = arith.constant 0 : index
    %c8 = arith.constant 8 : index
    %25 = vector.load %arg8[%c0_30, %c8] : memref<256x72xf32, #tpu.memory_space<vmem>>, vector<256x8xf32>
    tpu.vector_store %arg8[%c0_30, %c8], %24 {strides = array<i32>} : memref<256x72xf32, #tpu.memory_space<vmem>>, vector<256x8xf32>,
    %c0_31 = arith.constant 0 : index
    %c2 = arith.constant 2 : index
    %c0_32 = arith.constant 0 : index
    %26 = vector.load %arg7[%c0_31, %c2, %c0_32] : memref<18x18x8xf32, #tpu.memory_space<vmem>>, vector<16x16x8xf32>
    %27 = vector.shape_cast %26 : vector<16x16x8xf32> to vector<256x8xf32>
    %c0_33 = arith.constant 0 : index
    %c16 = arith.constant 16 : index
    %28 = vector.load %arg8[%c0_33, %c16] : memref<256x72xf32, #tpu.memory_space<vmem>>, vector<256x8xf32>
    tpu.vector_store %arg8[%c0_33, %c16], %27 {strides = array<i32>} : memref<256x72xf32, #tpu.memory_space<vmem>>, vector<256x8xf32>,
    %c1_34 = arith.constant 1 : index
    %c0_35 = arith.constant 0 : index
    %c0_36 = arith.constant 0 : index
    %29 = vector.load %arg7[%c1_34, %c0_35, %c0_36] : memref<18x18x8xf32, #tpu.memory_space<vmem>>, vector<16x16x8xf32>
    %30 = vector.shape_cast %29 : vector<16x16x8xf32> to vector<256x8xf32>
    %c0_37 = arith.constant 0 : index
    %c24 = arith.constant 24 : index
    %31 = vector.load %arg8[%c0_37, %c24] : memref<256x72xf32, #tpu.memory_space<vmem>>, vector<256x8xf32>
    tpu.vector_store %arg8[%c0_37, %c24], %30 {strides = array<i32>} : memref<256x72xf32, #tpu.memory_space<vmem>>, vector<256x8xf32>,
    %c1_38 = arith.constant 1 : index
    %c1_39 = arith.constant 1 : index
    %c0_40 = arith.constant 0 : index
    %32 = vector.load %arg7[%c1_38, %c1_39, %c0_40] : memref<18x18x8xf32, #tpu.memory_space<vmem>>, vector<16x16x8xf32>
    %33 = vector.shape_cast %32 : vector<16x16x8xf32> to vector<256x8xf32>
    %c0_41 = arith.constant 0 : index
    %c32 = arith.constant 32 : index
    %34 = vector.load %arg8[%c0_41, %c32] : memref<256x72xf32, #tpu.memory_space<vmem>>, vector<256x8xf32>
    tpu.vector_store %arg8[%c0_41, %c32], %33 {strides = array<i32>} : memref<256x72xf32, #tpu.memory_space<vmem>>, vector<256x8xf32>,
    %c1_42 = arith.constant 1 : index
    %c2_43 = arith.constant 2 : index
    %c0_44 = arith.constant 0 : index
    %35 = vector.load %arg7[%c1_42, %c2_43, %c0_44] : memref<18x18x8xf32, #tpu.memory_space<vmem>>, vector<16x16x8xf32>
    %36 = vector.shape_cast %35 : vector<16x16x8xf32> to vector<256x8xf32>
    %c0_45 = arith.constant 0 : index
    %c40 = arith.constant 40 : index
    %37 = vector.load %arg8[%c0_45, %c40] : memref<256x72xf32, #tpu.memory_space<vmem>>, vector<256x8xf32>
    tpu.vector_store %arg8[%c0_45, %c40], %36 {strides = array<i32>} : memref<256x72xf32, #tpu.memory_space<vmem>>, vector<256x8xf32>,
    %c2_46 = arith.constant 2 : index
    %c0_47 = arith.constant 0 : index
    %c0_48 = arith.constant 0 : index
    %38 = vector.load %arg7[%c2_46, %c0_47, %c0_48] : memref<18x18x8xf32, #tpu.memory_space<vmem>>, vector<16x16x8xf32>
    %39 = vector.shape_cast %38 : vector<16x16x8xf32> to vector<256x8xf32>
    %c0_49 = arith.constant 0 : index
    %c48 = arith.constant 48 : index
    %40 = vector.load %arg8[%c0_49, %c48] : memref<256x72xf32, #tpu.memory_space<vmem>>, vector<256x8xf32>
    tpu.vector_store %arg8[%c0_49, %c48], %39 {strides = array<i32>} : memref<256x72xf32, #tpu.memory_space<vmem>>, vector<256x8xf32>,
    %c2_50 = arith.constant 2 : index
    %c1_51 = arith.constant 1 : index
    %c0_52 = arith.constant 0 : index
    %41 = vector.load %arg7[%c2_50, %c1_51, %c0_52] : memref<18x18x8xf32, #tpu.memory_space<vmem>>, vector<16x16x8xf32>
    %42 = vector.shape_cast %41 : vector<16x16x8xf32> to vector<256x8xf32>
    %c0_53 = arith.constant 0 : index
    %c56 = arith.constant 56 : index
    %43 = vector.load %arg8[%c0_53, %c56] : memref<256x72xf32, #tpu.memory_space<vmem>>, vector<256x8xf32>
    tpu.vector_store %arg8[%c0_53, %c56], %42 {strides = array<i32>} : memref<256x72xf32, #tpu.memory_space<vmem>>, vector<256x8xf32>,
    %c2_54 = arith.constant 2 : index
    %c2_55 = arith.constant 2 : index
    %c0_56 = arith.constant 0 : index
    %44 = vector.load %arg7[%c2_54, %c2_55, %c0_56] : memref<18x18x8xf32, #tpu.memory_space<vmem>>, vector<16x16x8xf32>
    %45 = vector.shape_cast %44 : vector<16x16x8xf32> to vector<256x8xf32>
    %c0_57 = arith.constant 0 : index
    %c64 = arith.constant 64 : index
    %46 = vector.load %arg8[%c0_57, %c64] : memref<256x72xf32, #tpu.memory_space<vmem>>, vector<256x8xf32>
    tpu.vector_store %arg8[%c0_57, %c64], %45 {strides = array<i32>} : memref<256x72xf32, #tpu.memory_space<vmem>>, vector<256x8xf32>,
    %c0_58 = arith.constant 0 : index
    %c0_59 = arith.constant 0 : index
    %47 = vector.load %arg8[%c0_58, %c0_59] : memref<256x72xf32, #tpu.memory_space<vmem>>, vector<256x72xf32>
    %c0_60 = arith.constant 0 : index
    %c0_61 = arith.constant 0 : index
    %48 = vector.load %arg4[%c0_60, %c0_61] : memref<72x8xf32, #tpu.memory_space<vmem>>, vector<72x8xf32>
    %cst_62 = arith.constant dense<0.000000e+00> : vector<256x8xf32>
    %49 = tpu.matmul %47, %48, %cst_62 {dimension_numbers = #tpu.dot_dimension_numbers<[1], [0], [0], [1], [0, 0, 1, 1], [], []>} : vector<256x72xf32>, vector<72x8xf32>, vector<256x8xf32> -> vector<256x8xf32>
    %cst_63 = arith.constant dense<0.000000e+00> : vector<8xf32>
    %50 = vector.multi_reduction <add>, %49, %cst_63 [0] : vector<256x8xf32> to vector<8xf32>
    %51 = vector.shape_cast %50 : vector<8xf32> to vector<1x8xf32>
    %52 = arith.mulf %49, %49 : vector<256x8xf32>
    %cst_64 = arith.constant dense<0.000000e+00> : vector<8xf32>
    %53 = vector.multi_reduction <add>, %52, %cst_64 [0] : vector<256x8xf32> to vector<8xf32>
    %54 = vector.shape_cast %53 : vector<8xf32> to vector<1x8xf32>
    %55 = tpu.concatenate %51, %54 in 0 : vector<1x8xf32>, vector<1x8xf32> -> vector<2x8xf32>
    %56 = vector.shape_cast %55 : vector<2x8xf32> to vector<1x2x8xf32>
    %c0_65 = arith.constant 0 : index
    %c0_66 = arith.constant 0 : index
    %c0_67 = arith.constant 0 : index
    %57 = vector.load %arg6[%c0_65, %c0_66, %c0_67] : memref<1x2x8xf32, #tpu.memory_space<vmem>>, vector<1x2x8xf32>
    tpu.vector_store %arg6[%c0_65, %c0_66, %c0_67], %56 {strides = array<i32>} : memref<1x2x8xf32, #tpu.memory_space<vmem>>, vector<1x2x8xf32>,
    %58 = vector.shape_cast %49 : vector<256x8xf32> to vector<1x16x16x8xf32>
    %59 = arith.truncf %58 : vector<1x16x16x8xf32> to vector<1x16x16x8xbf16>
    %c0_68 = arith.constant 0 : index
    %c0_69 = arith.constant 0 : index
    %c0_70 = arith.constant 0 : index
    %c0_71 = arith.constant 0 : index
    %60 = vector.load %arg5[%c0_68, %c0_69, %c0_70, %c0_71] : memref<1x16x16x8xbf16, #tpu.memory_space<vmem>>, vector<1x16x16x8xbf16>
    tpu.vector_store %arg5[%c0_68, %c0_69, %c0_70, %c0_71], %59 {strides = array<i32>} : memref<1x16x16x8xbf16, #tpu.memory_space<vmem>>, vector<1x16x16x8xbf16>,
    return
  }
  func.func @transform_0(%arg0: i32) -> (i32, i32, i32, i32) {
    %c0_i32 = arith.constant 0 : i32
    %c0_i32_0 = arith.constant 0 : i32
    %c0_i32_1 = arith.constant 0 : i32
    %c0_i32_2 = arith.constant 0 : i32
    return %arg0, %c0_i32, %c0_i32_0, %c0_i32_1 : i32, i32, i32, i32
  }
  func.func @transform_1(%arg0: i32) -> (i32, i32) {
    %c0_i32 = arith.constant 0 : i32
    %c0_i32_0 = arith.constant 0 : i32
    %c0_i32_1 = arith.constant 0 : i32
    return %c0_i32, %c0_i32_0 : i32, i32
  }
  func.func @transform_2(%arg0: i32) -> (i32, i32) {
    %c0_i32 = arith.constant 0 : i32
    %c0_i32_0 = arith.constant 0 : i32
    %c0_i32_1 = arith.constant 0 : i32
    return %c0_i32, %c0_i32_0 : i32, i32
  }
  func.func @transform_3(%arg0: i32) -> (i32, i32) {
    %c0_i32 = arith.constant 0 : i32
    %c0_i32_0 = arith.constant 0 : i32
    %c0_i32_1 = arith.constant 0 : i32
    return %c0_i32, %c0_i32_0 : i32, i32
  }
  func.func @transform_4(%arg0: i32) -> (i32, i32, i32, i32) {
    %c0_i32 = arith.constant 0 : i32
    %c0_i32_0 = arith.constant 0 : i32
    %c0_i32_1 = arith.constant 0 : i32
    %c0_i32_2 = arith.constant 0 : i32
    return %arg0, %c0_i32, %c0_i32_0, %c0_i32_1 : i32, i32, i32, i32
  }
  func.func @transform_5(%arg0: i32) -> (i32, i32, i32) {
    %c0_i32 = arith.constant 0 : i32
    %c0_i32_0 = arith.constant 0 : i32
    %c0_i32_1 = arith.constant 0 : i32
    return %arg0, %c0_i32, %c0_i32_0 : i32, i32, i32
  }
}

module attributes {stable_mosaic.version = 11 : i64} {
  func.func @_residual_kernel(%arg0: i32, %arg1: memref<16x128xbf16, #tpu.memory_space<vmem>>, %arg2: memref<16x128xf32, #tpu.memory_space<vmem>>, %arg3: memref<1x128xf32, #tpu.memory_space<vmem>>, %arg4: memref<1x128xf32, #tpu.memory_space<vmem>>, %arg5: memref<1x128xf32, #tpu.memory_space<vmem>>, %arg6: memref<1x128xf32, #tpu.memory_space<vmem>>, %arg7: memref<16x128xf32, #tpu.memory_space<vmem>>) attributes {dimension_semantics = [#tpu.dimension_semantics<parallel>], iteration_bounds = array<i64: 2>, scalar_prefetch = 0 : i64, scratch_operands = 0 : i64, tpu.core_type = #tpu.core_type<tc>, window_params = [{transform_indices = @transform_0, window_bounds = array<i64: 16, 128>}, {transform_indices = @transform_1, window_bounds = array<i64: 16, 128>}, {pipeline_mode = #tpu.pipeline_mode<synchronous>, transform_indices = @transform_2, window_bounds = array<i64: 1, 128>}, {pipeline_mode = #tpu.pipeline_mode<synchronous>, transform_indices = @transform_3, window_bounds = array<i64: 1, 128>}, {pipeline_mode = #tpu.pipeline_mode<synchronous>, transform_indices = @transform_4, window_bounds = array<i64: 1, 128>}, {pipeline_mode = #tpu.pipeline_mode<synchronous>, transform_indices = @transform_5, window_bounds = array<i64: 1, 128>}, {transform_indices = @transform_6, window_bounds = array<i64: 16, 128>}]} {
    %c0 = arith.constant 0 : index
    %c0_0 = arith.constant 0 : index
    %0 = vector.load %arg1[%c0, %c0_0] : memref<16x128xbf16, #tpu.memory_space<vmem>>, vector<16x128xbf16>
    %1 = arith.extf %0 : vector<16x128xbf16> to vector<16x128xf32>
    %c0_1 = arith.constant 0 : index
    %c0_2 = arith.constant 0 : index
    %2 = vector.load %arg3[%c0_1, %c0_2] : memref<1x128xf32, #tpu.memory_space<vmem>>, vector<1x128xf32>
    %3 = vector.broadcast %2 : vector<1x128xf32> to vector<16x128xf32>
    %4 = arith.mulf %1, %3 : vector<16x128xf32>
    %c0_3 = arith.constant 0 : index
    %c0_4 = arith.constant 0 : index
    %5 = vector.load %arg4[%c0_3, %c0_4] : memref<1x128xf32, #tpu.memory_space<vmem>>, vector<1x128xf32>
    %6 = vector.broadcast %5 : vector<1x128xf32> to vector<16x128xf32>
    %7 = arith.addf %4, %6 : vector<16x128xf32>
    %c0_5 = arith.constant 0 : index
    %c0_6 = arith.constant 0 : index
    %8 = vector.load %arg2[%c0_5, %c0_6] : memref<16x128xf32, #tpu.memory_space<vmem>>, vector<16x128xf32>
    %c0_7 = arith.constant 0 : index
    %c0_8 = arith.constant 0 : index
    %9 = vector.load %arg5[%c0_7, %c0_8] : memref<1x128xf32, #tpu.memory_space<vmem>>, vector<1x128xf32>
    %10 = vector.broadcast %9 : vector<1x128xf32> to vector<16x128xf32>
    %11 = arith.mulf %8, %10 : vector<16x128xf32>
    %c0_9 = arith.constant 0 : index
    %c0_10 = arith.constant 0 : index
    %12 = vector.load %arg6[%c0_9, %c0_10] : memref<1x128xf32, #tpu.memory_space<vmem>>, vector<1x128xf32>
    %13 = vector.broadcast %12 : vector<1x128xf32> to vector<16x128xf32>
    %14 = arith.addf %11, %13 : vector<16x128xf32>
    %15 = arith.addf %7, %14 : vector<16x128xf32>
    %cst = arith.constant 0.000000e+00 : f32
    %16 = vector.broadcast %cst : f32 to vector<16x128xf32>
    %17 = arith.maximumf %15, %16 : vector<16x128xf32>
    %c0_11 = arith.constant 0 : index
    %c0_12 = arith.constant 0 : index
    %18 = vector.load %arg7[%c0_11, %c0_12] : memref<16x128xf32, #tpu.memory_space<vmem>>, vector<16x128xf32>
    tpu.vector_store %arg7[%c0_11, %c0_12], %17 {strides = array<i32>} : memref<16x128xf32, #tpu.memory_space<vmem>>, vector<16x128xf32>,
    return
  }
  func.func @transform_0(%arg0: i32) -> (i32, i32) {
    %c0_i32 = arith.constant 0 : i32
    %c0_i32_0 = arith.constant 0 : i32
    return %arg0, %c0_i32 : i32, i32
  }
  func.func @transform_1(%arg0: i32) -> (i32, i32) {
    %c0_i32 = arith.constant 0 : i32
    %c0_i32_0 = arith.constant 0 : i32
    return %arg0, %c0_i32 : i32, i32
  }
  func.func @transform_2(%arg0: i32) -> (i32, i32) {
    %c0_i32 = arith.constant 0 : i32
    %c0_i32_0 = arith.constant 0 : i32
    %c0_i32_1 = arith.constant 0 : i32
    return %c0_i32, %c0_i32_0 : i32, i32
  }
  func.func @transform_3(%arg0: i32) -> (i32, i32) {
    %c0_i32 = arith.constant 0 : i32
    %c0_i32_0 = arith.constant 0 : i32
    %c0_i32_1 = arith.constant 0 : i32
    return %c0_i32, %c0_i32_0 : i32, i32
  }
  func.func @transform_4(%arg0: i32) -> (i32, i32) {
    %c0_i32 = arith.constant 0 : i32
    %c0_i32_0 = arith.constant 0 : i32
    %c0_i32_1 = arith.constant 0 : i32
    return %c0_i32, %c0_i32_0 : i32, i32
  }
  func.func @transform_5(%arg0: i32) -> (i32, i32) {
    %c0_i32 = arith.constant 0 : i32
    %c0_i32_0 = arith.constant 0 : i32
    %c0_i32_1 = arith.constant 0 : i32
    return %c0_i32, %c0_i32_0 : i32, i32
  }
  func.func @transform_6(%arg0: i32) -> (i32, i32) {
    %c0_i32 = arith.constant 0 : i32
    %c0_i32_0 = arith.constant 0 : i32
    return %arg0, %c0_i32 : i32, i32
  }
}

</mosaic_0001>

<bundles_post_ra>
// kernel: tile.10
= control target key start
LH: loop header
LB: loop body
LE: loop exit
PB: predicated region body
PF: predicated region fallthrough
CT: control target
= control target key end

     0   :  { %s20_s0 = inlined_call_operand.<no memory space> [shape: f32[], index: 0, kind: input, shape index: {}]   ;;  %s21_s1 = inlined_call_operand.vmem [shape: f32[1,128], index: 1, kind: output, shape index: {}]  }
   0x1   :  { %v2_v0 = vstv %s20_s0 }
   0x2   :  { %3 = vst [vmem:[%s21_s1] sm:$0x1] %v2_v0 }

// kernel: basic_block_forward.3
= control target key start
LH: loop header
LB: loop body
LE: loop exit
PB: predicated region body
PF: predicated region fallthrough
CT: control target
= control target key end

     0   :  { %s2978_s12 = smov 0   ;;  %s4104_s0 = inlined_call_operand.vmem [shape: f32[2,16,16,8], index: 0, kind: input, shape index: {}]   ;;  %s4105_s1 = inlined_call_operand.vmem [shape: f32[72,8], index: 1, kind: input, shape index: {}]   ;;  %s4106_s2 = inlined_call_operand.vmem [shape: bf16[2,16,16,8], index: 2, kind: output, shape index: {0}]   ;;  %s4107_s3 = inlined_call_operand.vmem [shape: f32[2,2,8], index: 3, kind: output, shape index: {1}]  }
   0x1 LB: > { %s2681_s13 = sadd.s32 4294967295, %s2947_s12   ;;  %p2685_p0 = scmp.ge.s32.totalorder %s2947_s12, 1  ;;  %s2947_s12 = sphi %s2978_s12, %s14_s12  }
   0x2   : > { %p140_p1 = scmp.lt.s32.totalorder %s2947_s12, 3 }
   0x4   : > { %p141_p2 = pnand %p2685_p0, %p140_p1 }
   0x5   : > { %vm182_vm0 = vcmask (!%p141_p2), 64512   ;;  %vm185_vm1 = vcmask (!%p141_p2), 58368   ;;  %p2988_p3 = scmp.lt.s32.totalorder (!%p141_p2), %s2681_s13, 1  ;;  %vm192_vm2 = vcmask (!%p141_p2), 57344   ;;  %v2949_v0 = vmov (!%p141_p2), 0.0   ;;  %s2950_s19 = smov (!%p141_p2), 8  }
   0x6   : > { %144 = sbr.rel (%p141_p2) target bundleno = 898 (0x382), region = 28  ;;  %183 = vst.msk [vmem:[#allocation2] sm:$0xff] (!%p141_p2), %vm182_vm0, %v2949_v0  ;;  %184 = vst.msk [vmem:[#allocation2 + $0x8] sm:$0xff] (!%p141_p2), %vm182_vm0, %v2949_v0  ;;  %s2951_s20 = smov (!%p141_p2), 16   ;;  %vm513_vm3 = vcmask (!%p141_p2), 130112   ;;  %vm706_vm4 = vcmask (!%p141_p2), 195712  }
   0x7   : > { %188 = vst.msk [vmem:[#allocation2 + $0x198] sm:$0xff] (!%p141_p2), %vm182_vm0, %v2949_v0  ;;  %189 = vst.msk [vmem:[#allocation2 + $0x1a0] sm:$0xff] (!%p141_p2), %vm182_vm0, %v2949_v0  ;;  %s2952_s21 = smov (!%p141_p2), 24   ;;  %s2953_s22 = smov (!%p141_p2), 32   ;;  %vm899_vm5 = vcmask (!%p141_p2), 261312   ;;  %vm1092_vm6 = vcmask (!%p141_p2), 326912  }
   0x8   : > { %186 = vst.msk [vmem:[#allocation2 + $0x10] sm:$0x3] (!%p141_p2), %vm185_vm1, %v2949_v0  ;;  %190 = vst.msk [vmem:[#allocation2 + $0x1a8] sm:$0x3] (!%p141_p2), %vm185_vm1, %v2949_v0  ;;  %s2954_s27 = smov (!%p141_p2), 40   ;;  %s2955_s5 = smov (!%p141_p2), 48  }
   0x9   : > { %209 = vst.msk [vmem:[#allocation2 + $0x29] sm:$0x1] (!%p141_p2), %vm192_vm2, %v2949_v0  ;;  %193 = vst.msk [vmem:[#allocation2 + $0x18] sm:$0x1] (!%p141_p2), %vm192_vm2, %v2949_v0  ;;  %s2956_s10 = smov (!%p141_p2), 56   ;;  %vm1285_vm7 = vcmask (!%p141_p2), 392512  }
   0xa   : > { %194 = vst.msk [vmem:[#allocation2 + $0x30] sm:$0x1] (!%p141_p2), %vm192_vm2, %v2949_v0  ;;  %195 = vst.msk [vmem:[#allocation2 + $0x48] sm:$0x1] (!%p141_p2), %vm192_vm2, %v2949_v0  ;;  %vm1479_vm8 = vcmask (!%p141_p2), 458112   ;;  %vm1672_vm9 = vcmask (!%p141_p2), 523712  }
   0xb   : > { %196 = vst.msk [vmem:[#allocation2 + $0x60] sm:$0x1] (!%p141_p2), %vm192_vm2, %v2949_v0  ;;  %197 = vst.msk [vmem:[#allocation2 + $0x78] sm:$0x1] (!%p141_p2), %vm192_vm2, %v2949_v0  ;;  %vm1865_vm10 = vcmask (!%p141_p2), 589312   ;;  %vm1939_vm11 = vcmask (!%p141_p2), 588800  }
   0xc   : > { %198 = vst.msk [vmem:[#allocation2 + $0x90] sm:$0x1] (!%p141_p2), %vm192_vm2, %v2949_v0  ;;  %199 = vst.msk [vmem:[#allocation2 + $0xa8] sm:$0x1] (!%p141_p2), %vm192_vm2, %v2949_v0  ;;  %vm2562_vm12 = vcmask (!%p141_p2), 60416   ;;  %vm2431_vm13 = vcmask (!%p141_p2), 1040384  }
   0xd   : > { %200 = vst.msk [vmem:[#allocation2 + $0xc0] sm:$0x1] %vm192_vm2, %v2949_v0  ;;  %201 = vst.msk [vmem:[#allocation2 + $0xd8] sm:$0x1] %vm192_vm2, %v2949_v0  ;;  %s4110_s13 = smov (!%p2988_p3, %s2681_s13), 1  ;;  %v353_v7 = vld [vmem:[#allocation2 + $0x1] sm:$0xff] }
   0xe   : > { %202 = vst.msk [vmem:[#allocation2 + $0xf0] sm:$0x1] %vm192_vm2, %v2949_v0  ;;  %203 = vst.msk [vmem:[#allocation2 + $0x108] sm:$0x1] %vm192_vm2, %v2949_v0  ;;  %s2757_s15 = sshll.u32 %s4110_s13, 8  ;;  %417 = vrot.lane.b32.xlu0 %v353_v7, %s2950_s19  ;;  %v289_v45 = vld [vmem:[#allocation2] sm:$0xff] }
   0xf   : > { %204 = vst.msk [vmem:[#allocation2 + $0x120] sm:$0x1] %vm192_vm2, %v2949_v0  ;;  %205 = vst.msk [vmem:[#allocation2 + $0x138] sm:$0x1] %vm192_vm2, %v2949_v0  ;;  %s3040_s18 = scalar_lea.vmem %s4104_s0, %s2757_s15  ;;  %v354_v8 = vld [vmem:[#allocation2 + $0x9] sm:$0xff]  ;;  %s2690_s24 = sshll.u32 %s4110_s13, 1 }
  0x10   : > { %206 = vst.msk [vmem:[#allocation2 + $0x150] sm:$0x1] %vm192_vm2, %v2949_v0  ;;  %207 = vst.msk [vmem:[#allocation2 + $0x168] sm:$0x1] %vm192_vm2, %v2949_v0  ;;  %v225_v1 = vld [vmem:[%s3040_s18] sm:$0xff]  ;;  %v227_v2 = vld [vmem:[%s3040_s18 + $0x10] sm:$0xff] }
  0x11   : > { %208 = vst.msk [vmem:[#allocation2 + $0x180] sm:$0x1] %vm192_vm2, %v2949_v0  ;;  %210 = vst.msk [vmem:[#allocation2 + $0x41] sm:$0x1] %vm192_vm2, %v2949_v0  ;;  %v226_v3 = vld [vmem:[%s3040_s18 + $0x8] sm:$0xff]  ;;  %v229_v4 = vld [vmem:[%s3040_s18 + $0x20] sm:$0xff] }
  0x12   : > { %211 = vst.msk [vmem:[#allocation2 + $0x59] sm:$0x1] %vm192_vm2, %v2949_v0  ;;  %212 = vst.msk [vmem:[#allocation2 + $0x71] sm:$0x1] %vm192_vm2, %v2949_v0  ;;  %v228_v5 = vld [vmem:[%s3040_s18 + $0x18] sm:$0xff]  ;;  %v231_v6 = vld [vmem:[%s3040_s18 + $0x30] sm:$0xff]  ;;  %419 = vrot.lane.b32.xlu0 %v354_v8, %s2950_s19 }
  0x13   : > { %213 = vst.msk [vmem:[#allocation2 + $0x89] sm:$0x1] %vm192_vm2, %v2949_v0  ;;  %214 = vst.msk [vmem:[#allocation2 + $0xa1] sm:$0x1] %vm192_vm2, %v2949_v0  ;;  %v230_v9 = vld [vmem:[%s3040_s18 + $0x28] sm:$0xff]  ;;  %v233_v10 = vld [vmem:[%s3040_s18 + $0x40] sm:$0xff] }
  0x14   : > { %215 = vst.msk [vmem:[#allocation2 + $0xb9] sm:$0x1] %vm192_vm2, %v2949_v0  ;;  %216 = vst.msk [vmem:[#allocation2 + $0xd1] sm:$0x1] %vm192_vm2, %v2949_v0  ;;  %v232_v11 = vld [vmem:[%s3040_s18 + $0x38] sm:$0xff]  ;;  %v235_v12 = vld [vmem:[%s3040_s18 + $0x50] sm:$0xff] }
  0x15   : > { %217 = vst.msk [vmem:[#allocation2 + $0xe9] sm:$0x1] %vm192_vm2, %v2949_v0  ;;  %218 = vst.msk [vmem:[#allocation2 + $0x101] sm:$0x1] %vm192_vm2, %v2949_v0  ;;  %v234_v13 = vld [vmem:[%s3040_s18 + $0x48] sm:$0xff]  ;;  %v237_v14 = vld [vmem:[%s3040_s18 + $0x60] sm:$0xff] }
  0x16   : > { %219 = vst.msk [vmem:[#allocation2 + $0x119] sm:$0x1] %vm192_vm2, %v2949_v0  ;;  %220 = vst.msk [vmem:[#allocation2 + $0x131] sm:$0x1] %vm192_vm2, %v2949_v0  ;;  %v236_v15 = vld [vmem:[%s3040_s18 + $0x58] sm:$0xff]  ;;  %v239_v16 = vld [vmem:[%s3040_s18 + $0x70] sm:$0xff] }
  0x17   : > { %221 = vst.msk [vmem:[#allocation2 + $0x149] sm:$0x1] %vm192_vm2, %v2949_v0  ;;  %222 = vst.msk [vmem:[#allocation2 + $0x161] sm:$0x1] %vm192_vm2, %v2949_v0  ;;  %v238_v17 = vld [vmem:[%s3040_s18 + $0x68] sm:$0xff]  ;;  %v241_v18 = vld [vmem:[%s3040_s18 + $0x80] sm:$0xff] }
  0x18   : > { %223 = vst.msk [vmem:[#allocation2 + $0x179] sm:$0x1] %vm192_vm2, %v2949_v0  ;;  %224 = vst.msk [vmem:[#allocation2 + $0x191] sm:$0x1] %vm192_vm2, %v2949_v0  ;;  %v240_v19 = vld [vmem:[%s3040_s18 + $0x78] sm:$0xff]  ;;  %v243_v20 = vld [vmem:[%s3040_s18 + $0x90] sm:$0xff] }
  0x19   : > { %257 = vst.msk [vmem:[#allocation2 + $0x19] sm:$0xff] %vm182_vm0, %v225_v1  ;;  %259 = vst.msk [vmem:[#allocation2 + $0x31] sm:$0xff] %vm182_vm0, %v227_v2  ;;  %v242_v21 = vld [vmem:[%s3040_s18 + $0x88] sm:$0xff]  ;;  %v245_v22 = vld [vmem:[%s3040_s18 + $0xa0] sm:$0xff] }
  0x1a   : > { %258 = vst.msk [vmem:[#allocation2 + $0x21] sm:$0xff] %vm182_vm0, %v226_v3  ;;  %261 = vst.msk [vmem:[#allocation2 + $0x49] sm:$0xff] %vm182_vm0, %v229_v4  ;;  %v244_v23 = vld [vmem:[%s3040_s18 + $0x98] sm:$0xff]  ;;  %v247_v24 = vld [vmem:[%s3040_s18 + $0xb0] sm:$0xff] }
  0x1b   : > { %260 = vst.msk [vmem:[#allocation2 + $0x39] sm:$0xff] %vm182_vm0, %v228_v5  ;;  %263 = vst.msk [vmem:[#allocation2 + $0x61] sm:$0xff] %vm182_vm0, %v231_v6  ;;  %v246_v28 = vld [vmem:[%s3040_s18 + $0xa8] sm:$0xff]  ;;  %v249_v29 = vld [vmem:[%s3040_s18 + $0xc0] sm:$0xff] }
  0x1c   : > { %262 = vst.msk [vmem:[#allocation2 + $0x51] sm:$0xff] %vm182_vm0, %v230_v9  ;;  %265 = vst.msk [vmem:[#allocation2 + $0x79] sm:$0xff] %vm182_vm0, %v233_v10  ;;  %v248_v33 = vld [vmem:[%s3040_s18 + $0xb8] sm:$0xff]  ;;  %v251_v34 = vld [vmem:[%s3040_s18 + $0xd0] sm:$0xff] }
  0x1d   : > { %264 = vst.msk [vmem:[#allocation2 + $0x69] sm:$0xff] %vm182_vm0, %v232_v11  ;;  %267 = vst.msk [vmem:[#allocation2 + $0x91] sm:$0xff] %vm182_vm0, %v235_v12  ;;  %v250_v35 = vld [vmem:[%s3040_s18 + $0xc8] sm:$0xff]  ;;  %v253_v36 = vld [vmem:[%s3040_s18 + $0xe0] sm:$0xff] }
  0x1e   : > { %266 = vst.msk [vmem:[#allocation2 + $0x81] sm:$0xff] %vm182_vm0, %v234_v13  ;;  %269 = vst.msk [vmem:[#allocation2 + $0xa9] sm:$0xff] %vm182_vm0, %v237_v14  ;;  %v252_v37 = vld [vmem:[%s3040_s18 + $0xd8] sm:$0xff]  ;;  %v254_v39 = vld [vmem:[%s3040_s18 + $0xe8] sm:$0xff] }
  0x1f   : > { %268 = vst.msk [vmem:[#allocation2 + $0x99] sm:$0xff] %vm182_vm0, %v236_v15  ;;  %271 = vst.msk [vmem:[#allocation2 + $0xc1] sm:$0xff] %vm182_vm0, %v239_v16  ;;  %v290_v46 = vld [vmem:[#allocation2 + $0x8] sm:$0xff] }
  0x20   : > { %270 = vst.msk [vmem:[#allocation2 + $0xb1] sm:$0xff] %vm182_vm0, %v238_v17  ;;  %273 = vst.msk [vmem:[#allocation2 + $0xd9] sm:$0xff] %vm182_vm0, %v241_v18  ;;  %v3085_v25 = vld [vmem:[#allocation2 + $0x19] sm:$0xff]  ;;  %v3087_v26 = vld [vmem:[#allocation2 + $0x31] sm:$0xff] }
  0x21   : > { %272 = vst.msk [vmem:[#allocation2 + $0xc9] sm:$0xff] %vm182_vm0, %v240_v19  ;;  %275 = vst.msk [vmem:[#allocation2 + $0xf1] sm:$0xff] %vm182_vm0, %v243_v20  ;;  %421 = vrot.lane.b32.xlu1 %v3085_v25, %s2950_s19  ;;  %v3094_v27 = vld [vmem:[#allocation2 + $0x21] sm:$0xff]  ;;  %425 = vrot.lane.b32.xlu0 %v3087_v26, %s2950_s19  ;;  %v3102_v30 = vld [vmem:[#allocation2 + $0x49] sm:$0xff] }
  0x22   : > { %274 = vst.msk [vmem:[#allocation2 + $0xe1] sm:$0xff] %vm182_vm0, %v242_v21  ;;  %277 = vst.msk [vmem:[#allocation2 + $0x109] sm:$0xff] %vm182_vm0, %v245_v22  ;;  %v3106_v31 = vld [vmem:[#allocation2 + $0x39] sm:$0xff]  ;;  %v3110_v32 = vld [vmem:[#allocation2 + $0x61] sm:$0xff] }
  0x23   : > { %276 = vst.msk [vmem:[#allocation2 + $0xf9] sm:$0xff] %vm182_vm0, %v244_v23  ;;  %279 = vst.msk [vmem:[#allocation2 + $0x121] sm:$0xff] %vm182_vm0, %v247_v24  ;;  %v3122_v38 = vld [vmem:[#allocation2 + $0x51] sm:$0xff]  ;;  %v3130_v40 = vld [vmem:[#allocation2 + $0x79] sm:$0xff] }
  0x24   : > { %278 = vst.msk [vmem:[#allocation2 + $0x111] sm:$0xff] %vm182_vm0, %v246_v28  ;;  %281 = vst.msk [vmem:[#allocation2 + $0x139] sm:$0xff] %vm182_vm0, %v249_v29  ;;  %v3134_v41 = vld [vmem:[#allocation2 + $0x69] sm:$0xff]  ;;  %v3138_v42 = vld [vmem:[#allocation2 + $0x91] sm:$0xff] }
  0x25   : > { %423 = vrot.lane.b32.xlu1 %v3094_v27, %s2950_s19  ;;  %429 = vrot.lane.b32.xlu0 %v3102_v30, %s2950_s19  ;;  %280 = vst.msk [vmem:[#allocation2 + $0x129] sm:$0xff] %vm182_vm0, %v248_v33  ;;  %283 = vst.msk [vmem:[#allocation2 + $0x151] sm:$0xff] %vm182_vm0, %v251_v34  ;;  %v3142_v43 = vld [vmem:[#allocation2 + $0x81] sm:$0xff]  ;;  %v367_v44 = vld [vmem:[#allocation2 + $0xa9] sm:$0xff] }
  0x26   : > { %282 = vst.msk [vmem:[#allocation2 + $0x141] sm:$0xff] %vm182_vm0, %v250_v35  ;;  %285 = vst.msk [vmem:[#allocation2 + $0x169] sm:$0xff] %vm182_vm0, %v253_v36  ;;  %v3149_v47 = vld [vmem:[#allocation2 + $0x99] sm:$0xff]  ;;  %v3157_v49 = vld [vmem:[#allocation2 + $0x30] sm:$0xff] }
  0x27   : > { %284 = vst.msk [vmem:[#allocation2 + $0x159] sm:$0xff] %vm182_vm0, %v252_v37  ;;  %286 = vst.msk [vmem:[#allocation2 + $0x171] sm:$0xff] %vm182_vm0, %v254_v39  ;;  %v3152_v48 = vld [vmem:[#allocation2 + $0x18] sm:$0xff]  ;;  %v369_v50 = vld [vmem:[#allocation2 + $0xc1] sm:$0xff] }
  0x28   : > { %321 = vst.msk [vmem:[#allocation3] sm:$0xff] %vm182_vm0, %v289_v45  ;;  %322 = vst.msk [vmem:[#allocation3 + $0x8] sm:$0xff] %vm182_vm0, %v290_v46  ;;  %v3161_v51 = vld [vmem:[#allocation2 + $0x20] sm:$0xff]  ;;  %v3163_v52 = vld [vmem:[#allocation2 + $0x48] sm:$0xff] }
  0x29   : > { %427 = vrot.lane.b32.xlu1 %v3106_v31, %s2950_s19  ;;  %433 = vrot.lane.b32.xlu0 %v3110_v32, %s2950_s19  ;;  %323 = vst.msk [vmem:[#allocation3 + $0x10] sm:$0xff] %vm182_vm0, %v3152_v48  ;;  %325 = vst.msk [vmem:[#allocation3 + $0x20] sm:$0xff] %vm182_vm0, %v3157_v49  ;;  %v368_v53 = vld [vmem:[#allocation2 + $0xb1] sm:$0xff]  ;;  %v3173_v55 = vld [vmem:[#allocation2 + $0x60] sm:$0xff] }
  0x2a   : > { %324 = vst.msk [vmem:[#allocation3 + $0x18] sm:$0xff] %vm182_vm0, %v3161_v51  ;;  %327 = vst.msk [vmem:[#allocation3 + $0x30] sm:$0xff] %vm182_vm0, %v3163_v52  ;;  %v3171_v54 = vld [vmem:[#allocation2 + $0x38] sm:$0xff]  ;;  %v3179_v57 = vld [vmem:[#allocation2 + $0x50] sm:$0xff] }
  0x2b   : > { %v371_v56 = vld [vmem:[#allocation2 + $0xd9] sm:$0xff]  ;;  %326 = vst.msk [vmem:[#allocation3 + $0x28] sm:$0xff] %vm182_vm0, %v3171_v54  ;;  %329 = vst.msk [vmem:[#allocation3 + $0x40] sm:$0xff] %vm182_vm0, %v3173_v55  ;;  %v3183_v59 = vld [vmem:[#allocation2 + $0x68] sm:$0xff] }
  0x2c   : > { %v3181_v58 = vld [vmem:[#allocation2 + $0x78] sm:$0xff]  ;;  %328 = vst.msk [vmem:[#allocation3 + $0x38] sm:$0xff] %vm182_vm0, %v3179_v57  ;;  %330 = vst.msk [vmem:[#allocation3 + $0x48] sm:$0xff] %vm182_vm0, %v3183_v59  ;;  %v3192_v60 = vld [vmem:[#allocation2 + $0x90] sm:$0xff] }
  0x2d   : > { %431 = vrot.lane.b32.xlu1 %v3122_v38, %s2950_s19  ;;  %437 = vrot.lane.b32.xlu0 %v3130_v40, %s2950_s19  ;;  %331 = vst.msk [vmem:[#allocation3 + $0x50] sm:$0xff] %vm182_vm0, %v3181_v58  ;;  %v3194_v61 = vld [vmem:[#allocation2 + $0x80] sm:$0xff]  ;;  %v3196_v62 = vld [vmem:[#allocation2 + $0xa8] sm:$0xff]  ;;  %333 = vst.msk [vmem:[#allocation3 + $0x60] sm:$0xff] %vm182_vm0, %v3192_v60 }
  0x2e   : > { %v370_v63 = vld [vmem:[#allocation2 + $0xc9] sm:$0xff]  ;;  %332 = vst.msk [vmem:[#allocation3 + $0x58] sm:$0xff] %vm182_vm0, %v3194_v61  ;;  %335 = vst.msk [vmem:[#allocation3 + $0x70] sm:$0xff] %vm182_vm0, %v3196_v62  ;;  %v3204_v0 = vld [vmem:[#allocation2 + $0x98] sm:$0xff] }
  0x2f   : > { %v3206_v1 = vld [vmem:[#allocation2 + $0xc0] sm:$0xff]  ;;  %v3208_v2 = vld [vmem:[#allocation2 + $0xb0] sm:$0xff]  ;;  %334 = vst.msk [vmem:[#allocation3 + $0x68] sm:$0xff] %vm182_vm0, %v3204_v0  ;;  %v3217_v3 = vld [vmem:[#allocation2 + $0xd8] sm:$0xff] }
  0x30   : > { %337 = vst.msk [vmem:[#allocation3 + $0x80] sm:$0xff] %vm182_vm0, %v3206_v1  ;;  %336 = vst.msk [vmem:[#allocation3 + $0x78] sm:$0xff] %vm182_vm0, %v3208_v2  ;;  %v3219_v4 = vld [vmem:[#allocation2 + $0xc8] sm:$0xff]  ;;  %v3221_v5 = vld [vmem:[#allocation2 + $0xf0] sm:$0xff] }
  0x31   : > { %435 = vrot.lane.b32.xlu1 %v3134_v41, %s2950_s19  ;;  %441 = vrot.lane.b32.xlu0 %v3138_v42, %s2950_s19  ;;  %339 = vst.msk [vmem:[#allocation3 + $0x90] sm:$0xff] %vm182_vm0, %v3217_v3  ;;  %338 = vst.msk [vmem:[#allocation3 + $0x88] sm:$0xff] %vm182_vm0, %v3219_v4  ;;  %v3229_v6 = vld [vmem:[#allocation2 + $0xe0] sm:$0xff]  ;;  %v3231_v7 = vld [vmem:[#allocation2 + $0x108] sm:$0xff] }
  0x32   : > { %341 = vst.msk [vmem:[#allocation3 + $0xa0] sm:$0xff] %vm182_vm0, %v3221_v5  ;;  %v3233_v8 = vld [vmem:[#allocation2 + $0xf8] sm:$0xff]  ;;  %340 = vst.msk [vmem:[#allocation3 + $0x98] sm:$0xff] %vm182_vm0, %v3229_v6  ;;  %v3242_v9 = vld [vmem:[#allocation2 + $0x120] sm:$0xff] }
  0x33   : > { %343 = vst.msk [vmem:[#allocation3 + $0xb0] sm:$0xff] %vm182_vm0, %v3231_v7  ;;  %342 = vst.msk [vmem:[#allocation3 + $0xa8] sm:$0xff] %vm182_vm0, %v3233_v8  ;;  %v3244_v10 = vld [vmem:[#allocation2 + $0x110] sm:$0xff]  ;;  %v315_v12 = vld [vmem:[#allocation2 + $0x138] sm:$0xff] }
  0x34   : > { %v373_v11 = vld [vmem:[#allocation2 + $0xf1] sm:$0xff]  ;;  %345 = vst.msk [vmem:[#allocation3 + $0xc0] sm:$0xff] %vm182_vm0, %v3242_v9  ;;  %344 = vst.msk [vmem:[#allocation3 + $0xb8] sm:$0xff] %vm182_vm0, %v3244_v10  ;;  %v372_v13 = vld [vmem:[#allocation2 + $0xe1] sm:$0xff] }
  0x35   : > { %439 = vrot.lane.b32.xlu1 %v3142_v43, %s2950_s19  ;;  %445 = vrot.lane.b32.xlu0 %v367_v44, %s2950_s19  ;;  %347 = vst.msk [vmem:[#allocation3 + $0xd0] sm:$0xff] %vm182_vm0, %v315_v12  ;;  %v3252_v14 = vld [vmem:[#allocation2 + $0x128] sm:$0xff]  ;;  %v317_v16 = vld [vmem:[#allocation2 + $0x150] sm:$0xff]  ;;  %v374_v17 = vld [vmem:[#allocation2 + $0xf9] sm:$0xff] }
  0x36   : > { %346 = vst.msk [vmem:[#allocation3 + $0xc8] sm:$0xff] %vm182_vm0, %v3252_v14  ;;  %v375_v15 = vld [vmem:[#allocation2 + $0x109] sm:$0xff]  ;;  %349 = vst.msk [vmem:[#allocation3 + $0xe0] sm:$0xff] %vm182_vm0, %v317_v16  ;;  %v316_v18 = vld [vmem:[#allocation2 + $0x140] sm:$0xff] }
  0x37   : > { %348 = vst.msk [vmem:[#allocation3 + $0xd8] sm:$0xff] %vm182_vm0, %v316_v18  ;;  %v377_v19 = vld [vmem:[#allocation2 + $0x121] sm:$0xff]  ;;  %v376_v21 = vld [vmem:[#allocation2 + $0x111] sm:$0xff]  ;;  %v379_v23 = vld [vmem:[#allocation2 + $0x139] sm:$0xff] }
  0x38   : > { %v319_v20 = vld [vmem:[#allocation2 + $0x168] sm:$0xff]  ;;  %v318_v22 = vld [vmem:[#allocation2 + $0x158] sm:$0xff]  ;;  %v320_v28 = vld [vmem:[#allocation2 + $0x170] sm:$0xff] }
  0x39   : > { %443 = vrot.lane.b32.xlu1 %v3149_v47, %s2950_s19  ;;  %449 = vrot.lane.b32.xlu0 %v369_v50, %s2950_s19  ;;  %351 = vst.msk [vmem:[#allocation3 + $0xf0] sm:$0xff] %vm182_vm0, %v319_v20  ;;  %350 = vst.msk [vmem:[#allocation3 + $0xe8] sm:$0xff] %vm182_vm0, %v318_v22  ;;  %v378_v24 = vld [vmem:[#allocation2 + $0x129] sm:$0xff]  ;;  %v381_v29 = vld [vmem:[#allocation2 + $0x151] sm:$0xff] }
  0x3a   : > { %352 = vst.msk [vmem:[#allocation3 + $0xf8] sm:$0xff] %vm182_vm0, %v320_v28  ;;  %v380_v33 = vld [vmem:[#allocation2 + $0x141] sm:$0xff]  ;;  %v383_v34 = vld [vmem:[#allocation2 + $0x169] sm:$0xff]  ;;  %v382_v35 = vld [vmem:[#allocation2 + $0x159] sm:$0xff] }
  0x3b   : > { %v546_v36 = vld [vmem:[#allocation2 + $0x2] sm:$0xff]  ;;  %v384_v37 = vld [vmem:[#allocation2 + $0x171] sm:$0xff]  ;;  %v3274_v39 = vld [vmem:[#allocation2 + $0x1a] sm:$0xff] }
  0x3c   : > { %v547_v44 = vld [vmem:[#allocation2 + $0xa] sm:$0xff]  ;;  %v3279_v45 = vld [vmem:[#allocation2 + $0x32] sm:$0xff]  ;;  %v3282_v46 = vld [vmem:[#allocation2 + $0x22] sm:$0xff] }
  0x3d   : > { %447 = vrot.lane.b32.xlu1 %v368_v53, %s2950_s19  ;;  %453 = vrot.lane.b32.xlu0 %v371_v56, %s2950_s19  ;;  %v3286_v50 = vld [vmem:[#allocation2 + $0x4a] sm:$0xff]  ;;  %v3290_v53 = vld [vmem:[#allocation2 + $0x3a] sm:$0xff]  ;;  %v3294_v56 = vld [vmem:[#allocation2 + $0x62] sm:$0xff] }
  0x3e   : > { %v3306_v12 = vld [vmem:[#allocation2 + $0x6a] sm:$0xff]  ;;  %v3326_v18 = vld [vmem:[#allocation2 + $0xc2] sm:$0xff]  ;;  %v564_v20 = vld [vmem:[#allocation2 + $0xda] sm:$0xff] }
  0x3f   : > { %v3318_v16 = vld [vmem:[#allocation2 + $0xaa] sm:$0xff]  ;;  %v566_v22 = vld [vmem:[#allocation2 + $0xf2] sm:$0xff]  ;;  %v567_v28 = vld [vmem:[#allocation2 + $0xfa] sm:$0xff] }
  0x41   : > { %451 = vrot.lane.b32.xlu1 %v370_v63, %s2950_s19  ;;  %457 = vrot.lane.b32.xlu0 %v373_v11, %s2950_s19  ;;  %v3298_v63 = vld [vmem:[#allocation2 + $0x52] sm:$0xff]  ;;  %v3302_v11 = vld [vmem:[#allocation2 + $0x7a] sm:$0xff] }
  0x45   : > { %455 = vrot.lane.b32.xlu1 %v372_v13, %s2950_s19  ;;  %461 = vrot.lane.b32.xlu0 %v375_v15, %s2950_s19  ;;  %v3310_v13 = vld [vmem:[#allocation2 + $0x92] sm:$0xff]  ;;  %v3314_v15 = vld [vmem:[#allocation2 + $0x82] sm:$0xff] }
  0x49   : > { %459 = vrot.lane.b32.xlu1 %v374_v17, %s2950_s19  ;;  %465 = vrot.lane.b32.xlu0 %v377_v19, %s2950_s19  ;;  %v3322_v17 = vld [vmem:[#allocation2 + $0x9a] sm:$0xff]  ;;  %v3330_v19 = vld [vmem:[#allocation2 + $0xb2] sm:$0xff] }
  0x4d   : > { %463 = vrot.lane.b32.xlu1 %v376_v21, %s2950_s19  ;;  %469 = vrot.lane.b32.xlu0 %v379_v23, %s2950_s19  ;;  %v3336_v21 = vld [vmem:[#allocation2 + $0xca] sm:$0xff]  ;;  %v565_v23 = vld [vmem:[#allocation2 + $0xe2] sm:$0xff] }
  0x51   : > { %467 = vrot.lane.b32.xlu1 %v378_v24, %s2950_s19  ;;  %473 = vrot.lane.b32.xlu0 %v381_v29, %s2950_s19  ;;  %v568_v24 = vld [vmem:[#allocation2 + $0x10a] sm:$0xff]  ;;  %v570_v29 = vld [vmem:[#allocation2 + $0x122] sm:$0xff] }
  0x55   : > { %471 = vrot.lane.b32.xlu1 %v380_v33, %s2950_s19  ;;  %477 = vrot.lane.b32.xlu0 %v383_v34, %s2950_s19  ;;  %v569_v33 = vld [vmem:[#allocation2 + $0x112] sm:$0xff]  ;;  %v572_v34 = vld [vmem:[#allocation2 + $0x13a] sm:$0xff] }
  0x59   : > { %475 = vrot.lane.b32.xlu1 %v382_v35, %s2950_s19  ;;  %610 = vrot.lane.b32.xlu0 %v546_v36, %s2951_s20  ;;  %v571_v36 = vld [vmem:[#allocation2 + $0x12a] sm:$0xff] }
  0x5d   : > { %479 = vrot.lane.b32.xlu1 %v384_v37, %s2950_s19  ;;  %614 = vrot.lane.b32.xlu0 %v3274_v39, %s2951_s20  ;;  %v574_v37 = vld [vmem:[#allocation2 + $0x152] sm:$0xff] }
  0x61   : > { %612 = vrot.lane.b32.xlu1 %v547_v44, %s2951_s20  ;;  %618 = vrot.lane.b32.xlu0 %v3279_v45, %s2951_s20 }
  0x65   : > { %616 = vrot.lane.b32.xlu1 %v3282_v46, %s2951_s20  ;;  %622 = vrot.lane.b32.xlu0 %v3286_v50, %s2951_s20 }
  0x69   : > { %620 = vrot.lane.b32.xlu1 %v3290_v53, %s2951_s20  ;;  %626 = vrot.lane.b32.xlu0 %v3294_v56, %s2951_s20 }
  0x6d   : > { %624 = vrot.lane.b32.xlu1 %v3298_v63, %s2951_s20  ;;  %630 = vrot.lane.b32.xlu0 %v3302_v11, %s2951_s20 }
  0x71   : > { %628 = vrot.lane.b32.xlu1 %v3306_v12, %s2951_s20  ;;  %634 = vrot.lane.b32.xlu0 %v3310_v13, %s2951_s20 }
  0x75   : > { %632 = vrot.lane.b32.xlu1 %v3314_v15, %s2951_s20  ;;  %638 = vrot.lane.b32.xlu0 %v3318_v16, %s2951_s20 }
  0x79   : > { %636 = vrot.lane.b32.xlu1 %v3322_v17, %s2951_s20  ;;  %642 = vrot.lane.b32.xlu0 %v3326_v18, %s2951_s20 }
  0x7d   : > { %640 = vrot.lane.b32.xlu1 %v3330_v19, %s2951_s20  ;;  %646 = vrot.lane.b32.xlu0 %v564_v20, %s2951_s20  ;;  %v573_v20 = vld [vmem:[#allocation2 + $0x142] sm:$0xff] }
  0x80   : > { %v418_v35 = vpop.permute.xlu0 %417 }
  0x81   : > { %644 = vrot.lane.b32.xlu1 %v3336_v21, %s2951_s20  ;;  %650 = vrot.lane.b32.xlu0 %v566_v22, %s2951_s20  ;;  %514 = vst.msk [vmem:[#allocation3] sm:$0xff] %vm513_vm3, %v418_v35 }
  0x84   : > { %v420_v44 = vpop.permute.xlu0 %419 }
  0x85   : > { %648 = vrot.lane.b32.xlu1 %v565_v23, %s2951_s20  ;;  %654 = vrot.lane.b32.xlu0 %v568_v24, %s2951_s20  ;;  %515 = vst.msk [vmem:[#allocation3 + $0x8] sm:$0xff] %vm513_vm3, %v420_v44  ;;  %v576_v23 = vld [vmem:[#allocation2 + $0x16a] sm:$0xff] }
  0x89   : > { %652 = vrot.lane.b32.xlu1 %v567_v28, %s2951_s20  ;;  %658 = vrot.lane.b32.xlu0 %v570_v29, %s2951_s20  ;;  %v575_v28 = vld [vmem:[#allocation2 + $0x15a] sm:$0xff] }
  0x8d   : > { %656 = vrot.lane.b32.xlu1 %v569_v33, %s2951_s20  ;;  %662 = vrot.lane.b32.xlu0 %v572_v34, %s2951_s20  ;;  %v577_v34 = vld [vmem:[#allocation2 + $0x172] sm:$0xff] }
  0x91   : > { %660 = vrot.lane.b32.xlu1 %v571_v36, %s2951_s20  ;;  %666 = vrot.lane.b32.xlu0 %v574_v37, %s2951_s20 }
  0x93   : > { %v422_v22 = vpop.permute.xlu1 %421  ;;  %v426_v24 = vpop.permute.xlu0 %425 }
  0x94   : > { %516 = vst.msk [vmem:[#allocation3 + $0x10] sm:$0xff] %vm513_vm3, %v422_v22  ;;  %518 = vst.msk [vmem:[#allocation3 + $0x20] sm:$0xff] %vm513_vm3, %v426_v24 }
  0x95   : > { %664 = vrot.lane.b32.xlu1 %v573_v20, %s2951_s20  ;;  %670 = vrot.lane.b32.xlu0 %v576_v23, %s2951_s20 }
  0x97   : > { %v424_v29 = vpop.permute.xlu1 %423  ;;  %v430_v33 = vpop.permute.xlu0 %429 }
  0x98   : > { %517 = vst.msk [vmem:[#allocation3 + $0x18] sm:$0xff] %vm513_vm3, %v424_v29  ;;  %520 = vst.msk [vmem:[#allocation3 + $0x30] sm:$0xff] %vm513_vm3, %v430_v33  ;;  %v1930_v33 = vld [vmem:[%s4105_s1] sm:$0xff] }
  0x99   : > { %668 = vrot.lane.b32.xlu1 %v575_v28, %s2951_s20  ;;  %803 = vrot.lane.b32.xlu0 %v3152_v48, %s2952_s21 }
  0x9b   : > { %v428_v35 = vpop.permute.xlu1 %427  ;;  %v434_v36 = vpop.permute.xlu0 %433 }
  0x9c   : > { %519 = vst.msk [vmem:[#allocation3 + $0x28] sm:$0xff] %vm513_vm3, %v428_v35  ;;  %522 = vst.msk [vmem:[#allocation3 + $0x40] sm:$0xff] %vm513_vm3, %v434_v36 }
  0x9d   : > { %672 = vrot.lane.b32.xlu1 %v577_v34, %s2951_s20  ;;  %807 = vrot.lane.b32.xlu0 %v3157_v49, %s2952_s21  ;;  %v1931_v34 = vld [vmem:[%s4105_s1 + $0x8] sm:$0xff]  ;;  %s2957_s20 = smov 64  }
  0x9e   : > { %v2898_v35 = vpack.c.bf16 %v1931_v34, %v1930_v33  ;;  %v1938_v34 = vld [vmem:[%s4105_s1 + $0x40] sm:$0xff] }
  0x9f   : > { %v432_v37 = vpop.permute.xlu1 %431  ;;  %v438_v44 = vpop.permute.xlu0 %437 }
  0xa0   : > { %521 = vst.msk [vmem:[#allocation3 + $0x38] sm:$0xff] %vm513_vm3, %v432_v37  ;;  %524 = vst.msk [vmem:[#allocation3 + $0x50] sm:$0xff] %vm513_vm3, %v438_v44  ;;  %2899 = vmatprep.subr.bf16.mxu0 %v2898_v35  ;;  %2914 = vmatprep.subr.bf16.mxu1 %v2898_v35  ;;  %v1932_v37 = vld [vmem:[%s4105_s1 + $0x10] sm:$0xff]  ;;  %v1933_v44 = vld [vmem:[%s4105_s1 + $0x18] sm:$0xff] }
  0xa1   : > { %805 = vrot.lane.b32.xlu1 %v3161_v51, %s2952_s21  ;;  %811 = vrot.lane.b32.xlu0 %v3163_v52, %s2952_s21 }
  0xa2   : > { %2901 = vmatpush3.bf16.msra.mxu0 %v2898_v35  ;;  %2919 = vmatpush3.bf16.msra.mxu1 %v2898_v35 }
  0xa3   : > { %v436_v48 = vpop.permute.xlu1 %435  ;;  %v442_v20 = vpop.permute.xlu0 %441 }
  0xa4   : > { %523 = vst.msk [vmem:[#allocation3 + $0x48] sm:$0xff] %vm513_vm3, %v436_v48  ;;  %526 = vst.msk [vmem:[#allocation3 + $0x60] sm:$0xff] %vm513_vm3, %v442_v20  ;;  %v1934_v20 = vld [vmem:[%s4105_s1 + $0x20] sm:$0xff] }
  0xa5   : > { %809 = vrot.lane.b32.xlu1 %v3171_v54, %s2952_s21  ;;  %815 = vrot.lane.b32.xlu0 %v3173_v55, %s2952_s21 }
  0xa7   : > { %v440_v22 = vpop.permute.xlu1 %439  ;;  %v446_v51 = vpop.permute.xlu0 %445 }
  0xa8   : > { %525 = vst.msk [vmem:[#allocation3 + $0x58] sm:$0xff] %vm513_vm3, %v440_v22  ;;  %528 = vst.msk [vmem:[#allocation3 + $0x70] sm:$0xff] %vm513_vm3, %v446_v51  ;;  %v1935_v22 = vld [vmem:[%s4105_s1 + $0x28] sm:$0xff] }
  0xa9   : > { %813 = vrot.lane.b32.xlu1 %v3179_v57, %s2952_s21  ;;  %819 = vrot.lane.b32.xlu0 %v3181_v58, %s2952_s21 }
  0xab   : > { %v444_v23 = vpop.permute.xlu1 %443  ;;  %v450_v24 = vpop.permute.xlu0 %449 }
  0xac   : > { %527 = vst.msk [vmem:[#allocation3 + $0x68] sm:$0xff] %vm513_vm3, %v444_v23  ;;  %530 = vst.msk [vmem:[#allocation3 + $0x80] sm:$0xff] %vm513_vm3, %v450_v24  ;;  %v1936_v23 = vld [vmem:[%s4105_s1 + $0x30] sm:$0xff]  ;;  %v1937_v24 = vld [vmem:[%s4105_s1 + $0x38] sm:$0xff] }
  0xad   : > { %817 = vrot.lane.b32.xlu1 %v3183_v59, %s2952_s21  ;;  %996 = vrot.lane.b32.xlu0 %v3085_v25, %s2953_s22 }
  0xaf   : > { %v448_v28 = vpop.permute.xlu1 %447  ;;  %v454_v29 = vpop.permute.xlu0 %453 }
  0xb0   : > { %529 = vst.msk [vmem:[#allocation3 + $0x78] sm:$0xff] %vm513_vm3, %v448_v28  ;;  %532 = vst.msk [vmem:[#allocation3 + $0x90] sm:$0xff] %vm513_vm3, %v454_v29  ;;  %v2910_v28 = vpack.c.bf16 %v1937_v24, %v1936_v23 }
  0xb1   : > { %821 = vrot.lane.b32.xlu1 %v3194_v61, %s2952_s21  ;;  %1189 = vrot.lane.b32.xlu0 %v3274_v39, %s2954_s27  ;;  %v2902_v39 = vpack.c.bf16 %v1933_v44, %v1932_v37 }
  0xb3   : > { %v452_v25 = vpop.permute.xlu1 %451  ;;  %v458_v36 = vpop.permute.xlu0 %457  ;;  %2903 = vmatprep.subr.bf16.mxu0 %v2902_v39  ;;  %2915 = vmatprep.subr.bf16.mxu1 %v2902_v39 }
  0xb4   : > { %531 = vst.msk [vmem:[#allocation3 + $0x88] sm:$0xff] %vm513_vm3, %v452_v25  ;;  %534 = vst.msk [vmem:[#allocation3 + $0xa0] sm:$0xff] %vm513_vm3, %v458_v36  ;;  %2905 = vmatpush3.bf16.msra.mxu0 %v2902_v39  ;;  %2920 = vmatpush3.bf16.msra.mxu1 %v2902_v39 }
  0xb5   : > { %998 = vrot.lane.b32.xlu1 %v3094_v27, %s2953_s22  ;;  %1383 = vrot.lane.b32.xlu0 %v3157_v49, %s2955_s5  ;;  %v2906_v49 = vpack.c.bf16 %v1935_v22, %v1934_v20 }
  0xb7   : > { %v456_v48 = vpop.permute.xlu1 %455  ;;  %v462_v27 = vpop.permute.xlu0 %461  ;;  %2907 = vmatprep.subr.bf16.mxu0 %v2906_v49  ;;  %2916 = vmatprep.subr.bf16.mxu1 %v2906_v49 }
  0xb8   : > { %533 = vst.msk [vmem:[#allocation3 + $0x98] sm:$0xff] %vm513_vm3, %v456_v48  ;;  %536 = vst.msk [vmem:[#allocation3 + $0xb0] sm:$0xff] %vm513_vm3, %v462_v27  ;;  %2909 = vmatpush3.bf16.msra.mxu0 %v2906_v49  ;;  %2921 = vmatpush3.bf16.msra.mxu1 %v2906_v49 }
  0xb9   : > { %1191 = vrot.lane.b32.xlu1 %v3282_v46, %s2954_s27  ;;  %1576 = vrot.lane.b32.xlu0 %v3087_v26, %s2956_s10 }
  0xba   : > { %2911 = vmatprep.subr.bf16.mxu0 %v2910_v28  ;;  %2917 = vmatprep.subr.bf16.mxu1 %v2910_v28 }
  0xbb   : > { %v460_v51 = vpop.permute.xlu1 %459  ;;  %v466_v46 = vpop.permute.xlu0 %465 }
  0xbc   : > { %535 = vst.msk [vmem:[#allocation3 + $0xa8] sm:$0xff] %vm513_vm3, %v460_v51  ;;  %538 = vst.msk [vmem:[#allocation3 + $0xc0] sm:$0xff] %vm513_vm3, %v466_v46  ;;  %2913 = vmatpush3.bf16.msra.mxu0 %v2910_v28  ;;  %2922 = vmatpush3.bf16.msra.mxu1 %v2910_v28 }
  0xbd   : > { %1385 = vrot.lane.b32.xlu1 %v3171_v54, %s2955_s5  ;;  %1578 = vrot.lane.b32.xlu0 %v3106_v31, %s2956_s10 }
  0xbe   : > { %2848 = vmatprep.subr.mxu0 %v1938_v34  ;;  %2918 = vmatprep.subr.mxu1 %v1938_v34 }
  0xbf   : > { %v464_v29 = vpop.permute.xlu1 %463  ;;  %v470_v54 = vpop.permute.xlu0 %469 }
  0xc0   : > { %537 = vst.msk [vmem:[#allocation3 + $0xb8] sm:$0xff] %vm513_vm3, %v464_v29  ;;  %540 = vst.msk [vmem:[#allocation3 + $0xd0] sm:$0xff] %vm513_vm3, %v470_v54  ;;  %2849 = vmatpush3.msra.mxu0 %v1938_v34  ;;  %2923 = vmatpush3.msra.mxu1 %v1938_v34 }
  0xc1   : > { %1000 = vrot.lane.b32.xlu1 %v3087_v26, %s2953_s22  ;;  %1002 = vrot.lane.b32.xlu0 %v3106_v31, %s2953_s22 }
  0xc3   : > { %v468_v33 = vpop.permute.xlu1 %467  ;;  %v474_v35 = vpop.permute.xlu0 %473 }
  0xc4   : > { %539 = vst.msk [vmem:[#allocation3 + $0xc8] sm:$0xff] %vm513_vm3, %v468_v33  ;;  %542 = vst.msk [vmem:[#allocation3 + $0xe0] sm:$0xff] %vm513_vm3, %v474_v35 }
  0xc5   : > { %1769 = vrot.lane.b32.xlu1 %v3279_v45, %s2957_s20  ;;  %1771 = vrot.lane.b32.xlu0 %v3290_v53, %s2957_s20 }
  0xc7   : > { %v472_v26 = vpop.permute.xlu1 %471  ;;  %v478_v31 = vpop.permute.xlu0 %477 }
  0xc8   : > { %541 = vst.msk [vmem:[#allocation3 + $0xd8] sm:$0xff] %vm513_vm3, %v472_v26  ;;  %544 = vst.msk [vmem:[#allocation3 + $0xf0] sm:$0xff] %vm513_vm3, %v478_v31  ;;  %v1522_v31 = vld [vmem:[#allocation2 + $0xa9] sm:$0xff] }
  0xc9   : > { %1193 = vrot.lane.b32.xlu1 %v3279_v45, %s2954_s27  ;;  %1387 = vrot.lane.b32.xlu0 %v3163_v52, %s2955_s5 }
  0xcb   : > { %v476_v25 = vpop.permute.xlu1 %475  ;;  %v611_v36 = vpop.permute.xlu0 %610 }
  0xcc   : > { %543 = vst.msk [vmem:[#allocation3 + $0xe8] sm:$0xff] %vm513_vm3, %v476_v25  ;;  %v1523_v25 = vld [vmem:[#allocation2 + $0xb1] sm:$0xff] }
  0xcd   : > { %1195 = vrot.lane.b32.xlu1 %v3290_v53, %s2954_s27  ;;  %707 = vst.msk [vmem:[#allocation3] sm:$0xff] %vm706_vm4, %v611_v36  ;;  %1580 = vrot.lane.b32.xlu0 %v3102_v30, %s2956_s10 }
  0xcf   : > { %v480_v37 = vpop.permute.xlu1 %479  ;;  %v615_v45 = vpop.permute.xlu0 %614 }
  0xd0   : > { %545 = vst.msk [vmem:[#allocation3 + $0xf8] sm:$0xff] %vm513_vm3, %v480_v37 }
  0xd1   : > { %1389 = vrot.lane.b32.xlu1 %v3179_v57, %s2955_s5  ;;  %709 = vst.msk [vmem:[#allocation3 + $0x10] sm:$0xff] %vm706_vm4, %v615_v45  ;;  %1582 = vrot.lane.b32.xlu0 %v3122_v38, %s2956_s10 }
  0xd3   : > { %v613_v52 = vpop.permute.xlu1 %612  ;;  %v619_v53 = vpop.permute.xlu0 %618 }
  0xd4   : > { %708 = vst.msk [vmem:[#allocation3 + $0x8] sm:$0xff] %vm706_vm4, %v613_v52  ;;  %711 = vst.msk [vmem:[#allocation3 + $0x20] sm:$0xff] %vm706_vm4, %v619_v53 }
  0xd5   : > { %1004 = vrot.lane.b32.xlu1 %v3102_v30, %s2953_s22  ;;  %1006 = vrot.lane.b32.xlu0 %v3122_v38, %s2953_s22 }
  0xd7   : > { %v617_v44 = vpop.permute.xlu1 %616  ;;  %v623_v57 = vpop.permute.xlu0 %622 }
  0xd8   : > { %710 = vst.msk [vmem:[#allocation3 + $0x18] sm:$0xff] %vm706_vm4, %v617_v44  ;;  %713 = vst.msk [vmem:[#allocation3 + $0x30] sm:$0xff] %vm706_vm4, %v623_v57 }
  0xd9   : > { %1773 = vrot.lane.b32.xlu1 %v3286_v50, %s2957_s20  ;;  %1775 = vrot.lane.b32.xlu0 %v3298_v63, %s2957_s20 }
  0xdb   : > { %v621_v39 = vpop.permute.xlu1 %620  ;;  %v627_v30 = vpop.permute.xlu0 %626 }
  0xdc   : > { %712 = vst.msk [vmem:[#allocation3 + $0x28] sm:$0xff] %vm706_vm4, %v621_v39  ;;  %715 = vst.msk [vmem:[#allocation3 + $0x40] sm:$0xff] %vm706_vm4, %v627_v30  ;;  %v1524_v30 = vld [vmem:[#allocation2 + $0xc1] sm:$0xff] }
  0xdd   : > { %1197 = vrot.lane.b32.xlu1 %v3286_v50, %s2954_s27  ;;  %1391 = vrot.lane.b32.xlu0 %v3173_v55, %s2955_s5 }
  0xdf   : > { %v625_v38 = vpop.permute.xlu1 %624  ;;  %v631_v48 = vpop.permute.xlu0 %630 }
  0xe0   : > { %714 = vst.msk [vmem:[#allocation3 + $0x38] sm:$0xff] %vm706_vm4, %v625_v38  ;;  %717 = vst.msk [vmem:[#allocation3 + $0x50] sm:$0xff] %vm706_vm4, %v631_v48  ;;  %v1525_v48 = vld [vmem:[#allocation2 + $0xc9] sm:$0xff] }
  0xe1   : > { %1199 = vrot.lane.b32.xlu1 %v3298_v63, %s2954_s27  ;;  %1584 = vrot.lane.b32.xlu0 %v3110_v32, %s2956_s10 }
  0xe3   : > { %v629_v27 = vpop.permute.xlu1 %628  ;;  %v635_v50 = vpop.permute.xlu0 %634 }
  0xe4   : > { %716 = vst.msk [vmem:[#allocation3 + $0x48] sm:$0xff] %vm706_vm4, %v629_v27  ;;  %719 = vst.msk [vmem:[#allocation3 + $0x60] sm:$0xff] %vm706_vm4, %v635_v50 }
  0xe5   : > { %1393 = vrot.lane.b32.xlu1 %v3183_v59, %s2955_s5  ;;  %1586 = vrot.lane.b32.xlu0 %v3134_v41, %s2956_s10 }
  0xe7   : > { %v633_v55 = vpop.permute.xlu1 %632  ;;  %v639_v63 = vpop.permute.xlu0 %638 }
  0xe8   : > { %718 = vst.msk [vmem:[#allocation3 + $0x58] sm:$0xff] %vm706_vm4, %v633_v55  ;;  %721 = vst.msk [vmem:[#allocation3 + $0x70] sm:$0xff] %vm706_vm4, %v639_v63 }
  0xe9   : > { %1008 = vrot.lane.b32.xlu1 %v3110_v32, %s2953_s22  ;;  %1010 = vrot.lane.b32.xlu0 %v3134_v41, %s2953_s22 }
  0xeb   : > { %v637_v20 = vpop.permute.xlu1 %636  ;;  %v643_v59 = vpop.permute.xlu0 %642 }
  0xec   : > { %720 = vst.msk [vmem:[#allocation3 + $0x68] sm:$0xff] %vm706_vm4, %v637_v20  ;;  %723 = vst.msk [vmem:[#allocation3 + $0x80] sm:$0xff] %vm706_vm4, %v643_v59 }
  0xed   : > { %1777 = vrot.lane.b32.xlu1 %v3294_v56, %s2957_s20  ;;  %1779 = vrot.lane.b32.xlu0 %v3306_v12, %s2957_s20 }
  0xef   : > { %v641_v22 = vpop.permute.xlu1 %640  ;;  %v647_v32 = vpop.permute.xlu0 %646 }
  0xf0   : > { %722 = vst.msk [vmem:[#allocation3 + $0x78] sm:$0xff] %vm706_vm4, %v641_v22  ;;  %725 = vst.msk [vmem:[#allocation3 + $0x90] sm:$0xff] %vm706_vm4, %v647_v32 }
  0xf1   : > { %1201 = vrot.lane.b32.xlu1 %v3294_v56, %s2954_s27  ;;  %1395 = vrot.lane.b32.xlu0 %v3181_v58, %s2955_s5 }
  0xf3   : > { %v645_v41 = vpop.permute.xlu1 %644  ;;  %v651_v49 = vpop.permute.xlu0 %650 }
  0xf4   : > { %724 = vst.msk [vmem:[#allocation3 + $0x88] sm:$0xff] %vm706_vm4, %v645_v41  ;;  %727 = vst.msk [vmem:[#allocation3 + $0xa0] sm:$0xff] %vm706_vm4, %v651_v49 }
  0xf5   : > { %1203 = vrot.lane.b32.xlu1 %v3306_v12, %s2954_s27  ;;  %1588 = vrot.lane.b32.xlu0 %v3130_v40, %s2956_s10 }
  0xf7   : > { %v649_v51 = vpop.permute.xlu1 %648  ;;  %v655_v56 = vpop.permute.xlu0 %654 }
  0xf8   : > { %726 = vst.msk [vmem:[#allocation3 + $0x98] sm:$0xff] %vm706_vm4, %v649_v51  ;;  %729 = vst.msk [vmem:[#allocation3 + $0xb0] sm:$0xff] %vm706_vm4, %v655_v56 }
  0xf9   : > { %1397 = vrot.lane.b32.xlu1 %v3194_v61, %s2955_s5  ;;  %1590 = vrot.lane.b32.xlu0 %v3142_v43, %s2956_s10 }
  0xfb   : > { %v653_v58 = vpop.permute.xlu1 %652  ;;  %v659_v12 = vpop.permute.xlu0 %658 }
  0xfc   : > { %728 = vst.msk [vmem:[#allocation3 + $0xa8] sm:$0xff] %vm706_vm4, %v653_v58  ;;  %731 = vst.msk [vmem:[#allocation3 + $0xc0] sm:$0xff] %vm706_vm4, %v659_v12  ;;  %v1527_v58 = vld [vmem:[#allocation2 + $0xe1] sm:$0xff] }
  0xfd   : > { %1012 = vrot.lane.b32.xlu1 %v3130_v40, %s2953_s22  ;;  %1014 = vrot.lane.b32.xlu0 %v3142_v43, %s2953_s22 }
  0xff   : > { %v657_v46 = vpop.permute.xlu1 %656  ;;  %v663_v61 = vpop.permute.xlu0 %662 }
 0x100   : > { %730 = vst.msk [vmem:[#allocation3 + $0xb8] sm:$0xff] %vm706_vm4, %v657_v46  ;;  %733 = vst.msk [vmem:[#allocation3 + $0xd0] sm:$0xff] %vm706_vm4, %v663_v61 }
 0x101   : > { %1781 = vrot.lane.b32.xlu1 %v3302_v11, %s2957_s20  ;;  %1783 = vrot.lane.b32.xlu0 %v3314_v15, %s2957_s20 }
 0x103   : > { %v661_v23 = vpop.permute.xlu1 %660  ;;  %v667_v40 = vpop.permute.xlu0 %666 }
 0x104   : > { %732 = vst.msk [vmem:[#allocation3 + $0xc8] sm:$0xff] %vm706_vm4, %v661_v23  ;;  %735 = vst.msk [vmem:[#allocation3 + $0xe0] sm:$0xff] %vm706_vm4, %v667_v40  ;;  %v1720_v23 = vld [vmem:[#allocation2 + $0xe2] sm:$0xff] }
 0x105   : > { %1205 = vrot.lane.b32.xlu1 %v3302_v11, %s2954_s27  ;;  %1399 = vrot.lane.b32.xlu0 %v3192_v60, %s2955_s5 }
 0x107   : > { %v665_v43 = vpop.permute.xlu1 %664  ;;  %v671_v24 = vpop.permute.xlu0 %670 }
 0x108   : > { %734 = vst.msk [vmem:[#allocation3 + $0xd8] sm:$0xff] %vm706_vm4, %v665_v43  ;;  %737 = vst.msk [vmem:[#allocation3 + $0xf0] sm:$0xff] %vm706_vm4, %v671_v24 }
 0x109   : > { %1207 = vrot.lane.b32.xlu1 %v3314_v15, %s2954_s27  ;;  %1401 = vrot.lane.b32.xlu0 %v3204_v0, %s2955_s5 }
 0x10b   : > { %v669_v28 = vpop.permute.xlu1 %668  ;;  %v804_v11 = vpop.permute.xlu0 %803 }
 0x10c   : > { %736 = vst.msk [vmem:[#allocation3 + $0xe8] sm:$0xff] %vm706_vm4, %v669_v28 }
 0x10d   : > { %823 = vrot.lane.b32.xlu1 %v3192_v60, %s2952_s21  ;;  %900 = vst.msk [vmem:[#allocation3] sm:$0xff] %vm899_vm5, %v804_v11  ;;  %825 = vrot.lane.b32.xlu0 %v3204_v0, %s2952_s21 }
 0x10f   : > { %v673_v29 = vpop.permute.xlu1 %672  ;;  %v808_v15 = vpop.permute.xlu0 %807 }
 0x110   : > { %738 = vst.msk [vmem:[#allocation3 + $0xf8] sm:$0xff] %vm706_vm4, %v673_v29 }
 0x111   : > { %1592 = vrot.lane.b32.xlu1 %v3138_v42, %s2956_s10  ;;  %902 = vst.msk [vmem:[#allocation3 + $0x10] sm:$0xff] %vm899_vm5, %v808_v15  ;;  %1594 = vrot.lane.b32.xlu0 %v3149_v47, %s2956_s10 }
 0x113   : > { %v806_v54 = vpop.permute.xlu1 %805  ;;  %v812_v60 = vpop.permute.xlu0 %811 }
 0x114   : > { %901 = vst.msk [vmem:[#allocation3 + $0x8] sm:$0xff] %vm899_vm5, %v806_v54  ;;  %904 = vst.msk [vmem:[#allocation3 + $0x20] sm:$0xff] %vm899_vm5, %v812_v60 }
 0x115   : > { %1016 = vrot.lane.b32.xlu1 %v3138_v42, %s2953_s22  ;;  %1018 = vrot.lane.b32.xlu0 %v3149_v47, %s2953_s22 }
 0x117   : > { %v810_v0 = vpop.permute.xlu1 %809  ;;  %v816_v33 = vpop.permute.xlu0 %815 }
 0x118   : > { %903 = vst.msk [vmem:[#allocation3 + $0x18] sm:$0xff] %vm899_vm5, %v810_v0  ;;  %906 = vst.msk [vmem:[#allocation3 + $0x30] sm:$0xff] %vm899_vm5, %v816_v33  ;;  %v1528_v0 = vld [vmem:[#allocation2 + $0xf1] sm:$0xff] }
 0x119   : > { %1785 = vrot.lane.b32.xlu1 %v3310_v13, %s2957_s20  ;;  %1787 = vrot.lane.b32.xlu0 %v3322_v17, %s2957_s20  ;;  %v255_v33 = vld [vmem:[%s3040_s18 + $0xf0] sm:$0xff] }
 0x11a   : > { %287 = vst.msk [vmem:[#allocation2 + $0x181] sm:$0xff] %vm182_vm0, %v255_v33  ;;  %v1727_v33 = vld [vmem:[#allocation2 + $0x13a] sm:$0xff] }
 0x11b   : > { %v814_v34 = vpop.permute.xlu1 %813  ;;  %v820_v42 = vpop.permute.xlu0 %819 }
 0x11c   : > { %905 = vst.msk [vmem:[#allocation3 + $0x28] sm:$0xff] %vm899_vm5, %v814_v34  ;;  %908 = vst.msk [vmem:[#allocation3 + $0x40] sm:$0xff] %vm899_vm5, %v820_v42  ;;  %v1529_v42 = vld [vmem:[#allocation2 + $0xf9] sm:$0xff] }
 0x11d   : > { %1209 = vrot.lane.b32.xlu1 %v3310_v13, %s2954_s27  ;;  %1403 = vrot.lane.b32.xlu0 %v3196_v62, %s2955_s5 }
 0x11f   : > { %v818_v47 = vpop.permute.xlu1 %817  ;;  %v997_v35 = vpop.permute.xlu0 %996 }
 0x120   : > { %907 = vst.msk [vmem:[#allocation3 + $0x38] sm:$0xff] %vm899_vm5, %v818_v47 }
 0x121   : > { %1211 = vrot.lane.b32.xlu1 %v3322_v17, %s2954_s27  ;;  %1093 = vst.msk [vmem:[#allocation3] sm:$0xff] %vm1092_vm6, %v997_v35  ;;  %1405 = vrot.lane.b32.xlu0 %v3208_v2, %s2955_s5  ;;  %v256_v35 = vld [vmem:[%s3040_s18 + $0xf8] sm:$0xff]  ;;  %s2758_s18 = sshll.u32 %s4110_s13, 7 }
 0x122   : > { %288 = vst.msk [vmem:[#allocation2 + $0x189] sm:$0xff] %vm182_vm0, %v256_v35  ;;  %s3890_s23 = scalar_lea.vmem %s4106_s2, %s2758_s18 }
 0x123   : > { %v822_v26 = vpop.permute.xlu1 %821  ;;  %v1190_v13 = vpop.permute.xlu0 %1189 }
 0x124   : > { %909 = vst.msk [vmem:[#allocation3 + $0x48] sm:$0xff] %vm899_vm5, %v822_v26  ;;  %v1721_v26 = vld [vmem:[#allocation2 + $0xf2] sm:$0xff] }
 0x125   : > { %827 = vrot.lane.b32.xlu1 %v3196_v62, %s2952_s21  ;;  %1286 = vst.msk [vmem:[#allocation3] sm:$0xff] %vm1285_vm7, %v1190_v13  ;;  %829 = vrot.lane.b32.xlu0 %v3208_v2, %s2952_s21 }
 0x127   : > { %v999_v17 = vpop.permute.xlu1 %998  ;;  %v1384_v36 = vpop.permute.xlu0 %1383 }
 0x128   : > { %1094 = vst.msk [vmem:[#allocation3 + $0x8] sm:$0xff] %vm1092_vm6, %v999_v17 }
 0x129   : > { %1596 = vrot.lane.b32.xlu1 %v1522_v31, %s2956_s10  ;;  %1480 = vst.msk [vmem:[#allocation3] sm:$0xff] %vm1479_vm8, %v1384_v36  ;;  %1598 = vrot.lane.b32.xlu0 %v1523_v25, %s2956_s10 }
 0x12b   : > { %v1192_v37 = vpop.permute.xlu1 %1191  ;;  %v1577_v62 = vpop.permute.xlu0 %1576 }
 0x12c   : > { %1287 = vst.msk [vmem:[#allocation3 + $0x8] sm:$0xff] %vm1285_vm7, %v1192_v37 }
 0x12d   : > { %1020 = vrot.lane.b32.xlu1 %v1522_v31, %s2953_s22  ;;  %1673 = vst.msk [vmem:[#allocation3] sm:$0xff] %vm1672_vm9, %v1577_v62  ;;  %1022 = vrot.lane.b32.xlu0 %v1523_v25, %s2953_s22  ;;  %v1722_v31 = vld [vmem:[#allocation2 + $0xfa] sm:$0xff] }
 0x12f   : > { %v1386_v2 = vpop.permute.xlu1 %1385  ;;  %v1579_v45 = vpop.permute.xlu0 %1578 }
 0x130   : > { %1481 = vst.msk [vmem:[#allocation3 + $0x8] sm:$0xff] %vm1479_vm8, %v1386_v2 }
 0x131   : > { %1789 = vrot.lane.b32.xlu1 %v3318_v16, %s2957_s20  ;;  %1674 = vst.msk [vmem:[#allocation3 + $0x8] sm:$0xff] %vm1672_vm9, %v1579_v45  ;;  %1791 = vrot.lane.b32.xlu0 %v3330_v19, %s2957_s20 }
 0x133   : > { %v1001_v52 = vpop.permute.xlu1 %1000  ;;  %v1003_v53 = vpop.permute.xlu0 %1002 }
 0x134   : > { %1095 = vst.msk [vmem:[#allocation3 + $0x10] sm:$0xff] %vm1092_vm6, %v1001_v52  ;;  %1096 = vst.msk [vmem:[#allocation3 + $0x18] sm:$0xff] %vm1092_vm6, %v1003_v53 }
 0x135   : > { %1213 = vrot.lane.b32.xlu1 %v3318_v16, %s2954_s27  ;;  %1407 = vrot.lane.b32.xlu0 %v3206_v1, %s2955_s5 }
 0x137   : > { %v1770_v44 = vpop.permute.xlu1 %1769  ;;  %v1772_v57 = vpop.permute.xlu0 %1771 }
 0x138   : > { %1866 = vst.msk [vmem:[#allocation3] sm:$0xff] %vm1865_vm10, %v1770_v44  ;;  %1867 = vst.msk [vmem:[#allocation3 + $0x8] sm:$0xff] %vm1865_vm10, %v1772_v57  ;;  %v1530_v44 = vld [vmem:[#allocation2 + $0x109] sm:$0xff] }
 0x139   : > { %1215 = vrot.lane.b32.xlu1 %v3330_v19, %s2954_s27  ;;  %1409 = vrot.lane.b32.xlu0 %v3219_v4, %s2955_s5 }
 0x13b   : > { %v1194_v39 = vpop.permute.xlu1 %1193  ;;  %v1388_v16 = vpop.permute.xlu0 %1387 }
 0x13c   : > { %1288 = vst.msk [vmem:[#allocation3 + $0x10] sm:$0xff] %vm1285_vm7, %v1194_v39  ;;  %v1531_v39 = vld [vmem:[#allocation2 + $0x111] sm:$0xff] }
 0x13d   : > { %831 = vrot.lane.b32.xlu1 %v3206_v1, %s2952_s21  ;;  %1482 = vst.msk [vmem:[#allocation3 + $0x10] sm:$0xff] %vm1479_vm8, %v1388_v16  ;;  %833 = vrot.lane.b32.xlu0 %v3219_v4, %s2952_s21 }
 0x13f   : > { %v1196_v19 = vpop.permute.xlu1 %1195  ;;  %v1898_v38 = vld [vmem:[#allocation3] sm:$0xff]  ;;  %v1581_v27 = vpop.permute.xlu0 %1580  ;;  %v1899_v50 = vld [vmem:[#allocation3 + $0x8] sm:$0xff] }
 0x140   : > { %1289 = vst.msk [vmem:[#allocation3 + $0x18] sm:$0xff] %vm1285_vm7, %v1196_v19  ;;  %2850 = vmatprep.mubr.msk.f32.mxu0 %vm1939_vm11, %v1898_v38  ;;  %v1724_v38 = vld [vmem:[#allocation2 + $0x112] sm:$0xff] }
 0x141   : > { %1600 = vrot.lane.b32.xlu1 %v1524_v30, %s2956_s10  ;;  %1675 = vst.msk [vmem:[#allocation3 + $0x10] sm:$0xff] %vm1672_vm9, %v1581_v27  ;;  %2851 = vmatmul.mubr.msk.f32.vlgmr.msra.gmra.mrb[0].mxu0 %vm1939_vm11, %v1899_v50 }
 0x142   : > { %1602 = vrot.lane.b32.xlu0 %v1525_v48, %s2956_s10 }
 0x143   : > { %v1390_v1 = vpop.permute.xlu1 %1389  ;;  %v1583_v4 = vpop.permute.xlu0 %1582 }
 0x144   : > { %1483 = vst.msk [vmem:[#allocation3 + $0x18] sm:$0xff] %vm1479_vm8, %v1390_v1 }
 0x145   : > { %1024 = vrot.lane.b32.xlu1 %v1524_v30, %s2953_s22  ;;  %1676 = vst.msk [vmem:[#allocation3 + $0x18] sm:$0xff] %vm1672_vm9, %v1583_v4 }
 0x146   : > { %1026 = vrot.lane.b32.xlu0 %v1525_v48, %s2953_s22 }
 0x147   : > { %v1005_v55 = vpop.permute.xlu1 %1004  ;;  %v1007_v63 = vpop.permute.xlu0 %1006 }
 0x148   : > { %1097 = vst.msk [vmem:[#allocation3 + $0x20] sm:$0xff] %vm1092_vm6, %v1005_v55  ;;  %1098 = vst.msk [vmem:[#allocation3 + $0x28] sm:$0xff] %vm1092_vm6, %v1007_v63 }
 0x149   : > { %1793 = vrot.lane.b32.xlu1 %v3326_v18, %s2957_s20 }
 0x14a   : > { %1795 = vrot.lane.b32.xlu0 %v3336_v21, %s2957_s20 }
 0x14b   : > { %v1774_v20 = vpop.permute.xlu1 %1773  ;;  %v1776_v59 = vpop.permute.xlu0 %1775 }
 0x14c   : > { %1868 = vst.msk [vmem:[#allocation3 + $0x10] sm:$0xff] %vm1865_vm10, %v1774_v20  ;;  %1869 = vst.msk [vmem:[#allocation3 + $0x18] sm:$0xff] %vm1865_vm10, %v1776_v59  ;;  %v761_v20 = vld [vmem:[#allocation2 + $0x120] sm:$0xff] }
 0x14d   : > { %1217 = vrot.lane.b32.xlu1 %v3326_v18, %s2954_s27 }
 0x14e   : > { %1411 = vrot.lane.b32.xlu0 %v3217_v3, %s2955_s5 }
 0x14f   : > { %v1198_v22 = vpop.permute.xlu1 %1197  ;;  %v1392_v32 = vpop.permute.xlu0 %1391 }
 0x150   : > { %1290 = vst.msk [vmem:[#allocation3 + $0x20] sm:$0xff] %vm1285_vm7, %v1198_v22 }
 0x151   : > { %1219 = vrot.lane.b32.xlu1 %v3336_v21, %s2954_s27  ;;  %1484 = vst.msk [vmem:[#allocation3 + $0x20] sm:$0xff] %vm1479_vm8, %v1392_v32  ;;  %v1526_v21 = vld [vmem:[#allocation2 + $0xd9] sm:$0xff] }
 0x152   : > { %1413 = vrot.lane.b32.xlu0 %v3229_v6, %s2955_s5 }
 0x153   : > { %v1200_v41 = vpop.permute.xlu1 %1199  ;;  %v1900_v49 = vld [vmem:[#allocation3 + $0x10] sm:$0xff]  ;;  %v1585_v18 = vpop.permute.xlu0 %1584  ;;  %v1901_v51 = vld [vmem:[#allocation3 + $0x18] sm:$0xff] }
 0x154   : > { %1291 = vst.msk [vmem:[#allocation3 + $0x28] sm:$0xff] %vm1285_vm7, %v1200_v41  ;;  %2853 = vmatprep.mubr.msk.f32.mxu0 %vm1939_vm11, %v1900_v49  ;;  %v1533_v41 = vld [vmem:[#allocation2 + $0x129] sm:$0xff] }
 0x155   : > { %835 = vrot.lane.b32.xlu1 %v3217_v3, %s2952_s21  ;;  %1677 = vst.msk [vmem:[#allocation3 + $0x20] sm:$0xff] %vm1672_vm9, %v1585_v18  ;;  %2854 = vmatmul.mubr.msk.f32.gmra.mrb[2].mxu0 %vm1939_vm11, %v1901_v51 }
 0x156   : > { %837 = vrot.lane.b32.xlu0 %v3229_v6, %s2952_s21  ;;  %v1719_v6 = vld [vmem:[#allocation2 + $0xda] sm:$0xff] }
 0x157   : > { %v1394_v56 = vpop.permute.xlu1 %1393  ;;  %v1587_v12 = vpop.permute.xlu0 %1586 }
 0x158   : > { %1485 = vst.msk [vmem:[#allocation3 + $0x28] sm:$0xff] %vm1479_vm8, %v1394_v56  ;;  %v1726_v56 = vld [vmem:[#allocation2 + $0x12a] sm:$0xff] }
 0x159   : > { %1604 = vrot.lane.b32.xlu1 %v1526_v21, %s2956_s10  ;;  %1678 = vst.msk [vmem:[#allocation3 + $0x28] sm:$0xff] %vm1672_vm9, %v1587_v12 }
 0x15a   : > { %1606 = vrot.lane.b32.xlu0 %v1527_v58, %s2956_s10 }
 0x15b   : > { %v1009_v3 = vpop.permute.xlu1 %1008  ;;  %v1011_v46 = vpop.permute.xlu0 %1010 }
 0x15c   : > { %1099 = vst.msk [vmem:[#allocation3 + $0x30] sm:$0xff] %vm1092_vm6, %v1009_v3  ;;  %1100 = vst.msk [vmem:[#allocation3 + $0x38] sm:$0xff] %vm1092_vm6, %v1011_v46  ;;  %v1341_v46 = vld [vmem:[#allocation2 + $0x138] sm:$0xff] }
 0x15d   : > { %1028 = vrot.lane.b32.xlu1 %v1526_v21, %s2953_s22 }
 0x15e   : > { %1030 = vrot.lane.b32.xlu0 %v1527_v58, %s2953_s22 }
 0x15f   : > { %v1778_v61 = vpop.permute.xlu1 %1777  ;;  %v1780_v40 = vpop.permute.xlu0 %1779 }
 0x160   : > { %1870 = vst.msk [vmem:[#allocation3 + $0x20] sm:$0xff] %vm1865_vm10, %v1778_v61  ;;  %1871 = vst.msk [vmem:[#allocation3 + $0x28] sm:$0xff] %vm1865_vm10, %v1780_v40  ;;  %v1342_v40 = vld [vmem:[#allocation2 + $0x140] sm:$0xff] }
 0x161   : > { %1797 = vrot.lane.b32.xlu1 %v1719_v6, %s2957_s20 }
 0x162   : > { %1799 = vrot.lane.b32.xlu0 %v1720_v23, %s2957_s20 }
 0x163   : > { %v1202_v43 = vpop.permute.xlu1 %1201  ;;  %v1396_v24 = vpop.permute.xlu0 %1395 }
 0x164   : > { %1292 = vst.msk [vmem:[#allocation3 + $0x30] sm:$0xff] %vm1285_vm7, %v1202_v43 }
 0x165   : > { %1221 = vrot.lane.b32.xlu1 %v1719_v6, %s2954_s27  ;;  %1486 = vst.msk [vmem:[#allocation3 + $0x30] sm:$0xff] %vm1479_vm8, %v1396_v24 }
 0x166   : > { %1415 = vrot.lane.b32.xlu0 %v3221_v5, %s2955_s5 }
 0x167   : > { %v1204_v28 = vpop.permute.xlu1 %1203  ;;  %v1902_v11 = vld [vmem:[#allocation3 + $0x20] sm:$0xff]  ;;  %v1589_v29 = vpop.permute.xlu0 %1588  ;;  %v1903_v15 = vld [vmem:[#allocation3 + $0x28] sm:$0xff] }
 0x168   : > { %1293 = vst.msk [vmem:[#allocation3 + $0x38] sm:$0xff] %vm1285_vm7, %v1204_v28  ;;  %2856 = vmatprep.mubr.msk.f32.mxu0 %vm1939_vm11, %v1902_v11  ;;  %v1534_v11 = vld [vmem:[#allocation2 + $0x139] sm:$0xff] }
 0x169   : > { %1223 = vrot.lane.b32.xlu1 %v1720_v23, %s2954_s27  ;;  %1679 = vst.msk [vmem:[#allocation3 + $0x30] sm:$0xff] %vm1672_vm9, %v1589_v29  ;;  %2857 = vmatmul.mubr.msk.f32.gmra.mrb[4].mxu0 %vm1939_vm11, %v1903_v15  ;;  %v1535_v15 = vld [vmem:[#allocation2 + $0x141] sm:$0xff] }
 0x16a   : > { %1417 = vrot.lane.b32.xlu0 %v3233_v8, %s2955_s5 }
 0x16b   : > { %v1398_v54 = vpop.permute.xlu1 %1397  ;;  %v1591_v60 = vpop.permute.xlu0 %1590 }
 0x16c   : > { %1487 = vst.msk [vmem:[#allocation3 + $0x38] sm:$0xff] %vm1479_vm8, %v1398_v54 }
 0x16d   : > { %839 = vrot.lane.b32.xlu1 %v3221_v5, %s2952_s21  ;;  %1680 = vst.msk [vmem:[#allocation3 + $0x38] sm:$0xff] %vm1672_vm9, %v1591_v60 }
 0x16e   : > { %841 = vrot.lane.b32.xlu0 %v3233_v8, %s2952_s21 }
 0x16f   : > { %v1013_v34 = vpop.permute.xlu1 %1012  ;;  %v1015_v47 = vpop.permute.xlu0 %1014 }
 0x170   : > { %1101 = vst.msk [vmem:[#allocation3 + $0x40] sm:$0xff] %vm1092_vm6, %v1013_v34  ;;  %1102 = vst.msk [vmem:[#allocation3 + $0x48] sm:$0xff] %vm1092_vm6, %v1015_v47 }
 0x171   : > { %1608 = vrot.lane.b32.xlu1 %v1528_v0, %s2956_s10 }
 0x172   : > { %1610 = vrot.lane.b32.xlu0 %v1529_v42, %s2956_s10 }
 0x173   : > { %v1782_v5 = vpop.permute.xlu1 %1781  ;;  %v1784_v8 = vpop.permute.xlu0 %1783 }
 0x174   : > { %1872 = vst.msk [vmem:[#allocation3 + $0x30] sm:$0xff] %vm1865_vm10, %v1782_v5  ;;  %1873 = vst.msk [vmem:[#allocation3 + $0x38] sm:$0xff] %vm1865_vm10, %v1784_v8  ;;  %v1343_v8 = vld [vmem:[#allocation2 + $0x150] sm:$0xff] }
 0x175   : > { %1032 = vrot.lane.b32.xlu1 %v1528_v0, %s2953_s22 }
 0x176   : > { %1034 = vrot.lane.b32.xlu0 %v1529_v42, %s2953_s22  ;;  %v1728_v42 = vld [vmem:[#allocation2 + $0x142] sm:$0xff] }
 0x177   : > { %v1206_v13 = vpop.permute.xlu1 %1205  ;;  %v1400_v17 = vpop.permute.xlu0 %1399 }
 0x178   : > { %1294 = vst.msk [vmem:[#allocation3 + $0x40] sm:$0xff] %vm1285_vm7, %v1206_v13 }
 0x179   : > { %1801 = vrot.lane.b32.xlu1 %v1721_v26, %s2957_s20  ;;  %1488 = vst.msk [vmem:[#allocation3 + $0x40] sm:$0xff] %vm1479_vm8, %v1400_v17  ;;  %v1344_v17 = vld [vmem:[#allocation2 + $0x158] sm:$0xff] }
 0x17a   : > { %1803 = vrot.lane.b32.xlu0 %v1722_v31, %s2957_s20 }
 0x17b   : > { %v1208_v25 = vpop.permute.xlu1 %1207  ;;  %v1904_v36 = vld [vmem:[#allocation3 + $0x30] sm:$0xff]  ;;  %v1402_v37 = vpop.permute.xlu0 %1401  ;;  %v1905_v62 = vld [vmem:[#allocation3 + $0x38] sm:$0xff] }
 0x17c   : > { %1295 = vst.msk [vmem:[#allocation3 + $0x48] sm:$0xff] %vm1285_vm7, %v1208_v25  ;;  %2859 = vmatprep.mubr.msk.f32.mxu0 %vm1939_vm11, %v1904_v36 }
 0x17d   : > { %1225 = vrot.lane.b32.xlu1 %v1721_v26, %s2954_s27  ;;  %1489 = vst.msk [vmem:[#allocation3 + $0x48] sm:$0xff] %vm1479_vm8, %v1402_v37  ;;  %2860 = vmatmul.mubr.msk.f32.gmra.mrb[6].mxu0 %vm1939_vm11, %v1905_v62  ;;  %v1536_v62 = vld [vmem:[#allocation2 + $0x151] sm:$0xff] }
 0x17e   : > { %1419 = vrot.lane.b32.xlu0 %v3231_v7, %s2955_s5 }
 0x17f   : > { %v824_v2 = vpop.permute.xlu1 %823  ;;  %v826_v45 = vpop.permute.xlu0 %825 }
 0x180   : > { %910 = vst.msk [vmem:[#allocation3 + $0x50] sm:$0xff] %vm899_vm5, %v824_v2  ;;  %911 = vst.msk [vmem:[#allocation3 + $0x58] sm:$0xff] %vm899_vm5, %v826_v45  ;;  %v1537_v45 = vld [vmem:[#allocation2 + $0x159] sm:$0xff] }
 0x181   : > { %1227 = vrot.lane.b32.xlu1 %v1722_v31, %s2954_s27 }
 0x182   : > { %1421 = vrot.lane.b32.xlu0 %v3244_v10, %s2955_s5 }
 0x183   : > { %v1593_v52 = vpop.permute.xlu1 %1592  ;;  %v1595_v53 = vpop.permute.xlu0 %1594 }
 0x184   : > { %1681 = vst.msk [vmem:[#allocation3 + $0x40] sm:$0xff] %vm1672_vm9, %v1593_v52  ;;  %1682 = vst.msk [vmem:[#allocation3 + $0x48] sm:$0xff] %vm1672_vm9, %v1595_v53 }
 0x185   : > { %843 = vrot.lane.b32.xlu1 %v3231_v7, %s2952_s21 }
 0x186   : > { %845 = vrot.lane.b32.xlu0 %v3244_v10, %s2952_s21  ;;  %v1723_v10 = vld [vmem:[#allocation2 + $0x10a] sm:$0xff] }
 0x187   : > { %v1017_v57 = vpop.permute.xlu1 %1016  ;;  %v1019_v16 = vpop.permute.xlu0 %1018 }
 0x188   : > { %1103 = vst.msk [vmem:[#allocation3 + $0x50] sm:$0xff] %vm1092_vm6, %v1017_v57  ;;  %1104 = vst.msk [vmem:[#allocation3 + $0x58] sm:$0xff] %vm1092_vm6, %v1019_v16  ;;  %v1729_v57 = vld [vmem:[#allocation2 + $0x152] sm:$0xff]  ;;  %v1730_v16 = vld [vmem:[#allocation2 + $0x15a] sm:$0xff] }
 0x189   : > { %1612 = vrot.lane.b32.xlu1 %v1530_v44, %s2956_s10 }
 0x18a   : > { %1614 = vrot.lane.b32.xlu0 %v1531_v39, %s2956_s10 }
 0x18b   : > { %v1786_v30 = vpop.permute.xlu1 %1785  ;;  %v1788_v7 = vpop.permute.xlu0 %1787 }
 0x18c   : > { %1874 = vst.msk [vmem:[#allocation3 + $0x40] sm:$0xff] %vm1865_vm10, %v1786_v30  ;;  %1875 = vst.msk [vmem:[#allocation3 + $0x48] sm:$0xff] %vm1865_vm10, %v1788_v7 }
 0x18d   : > { %1036 = vrot.lane.b32.xlu1 %v1530_v44, %s2953_s22 }
 0x18e   : > { %1038 = vrot.lane.b32.xlu0 %v1531_v39, %s2953_s22 }
 0x18f   : > { %v1210_v19 = vpop.permute.xlu1 %1209  ;;  %v1404_v48 = vpop.permute.xlu0 %1403 }
 0x190   : > { %1296 = vst.msk [vmem:[#allocation3 + $0x50] sm:$0xff] %vm1285_vm7, %v1210_v19  ;;  %v1345_v19 = vld [vmem:[#allocation2 + $0x168] sm:$0xff] }
 0x191   : > { %1805 = vrot.lane.b32.xlu1 %v1723_v10, %s2957_s20  ;;  %1490 = vst.msk [vmem:[#allocation3 + $0x50] sm:$0xff] %vm1479_vm8, %v1404_v48 }
 0x192   : > { %1807 = vrot.lane.b32.xlu0 %v1724_v38, %s2957_s20 }
 0x193   : > { %v1212_v27 = vpop.permute.xlu1 %1211  ;;  %v1906_v50 = vld [vmem:[#allocation3 + $0x40] sm:$0xff]  ;;  %v1406_v1 = vpop.permute.xlu0 %1405  ;;  %v1907_v4 = vld [vmem:[#allocation3 + $0x48] sm:$0xff] }
 0x194   : > { %1297 = vst.msk [vmem:[#allocation3 + $0x58] sm:$0xff] %vm1285_vm7, %v1212_v27  ;;  %2862 = vmatprep.mubr.msk.f32.mxu0 %vm1939_vm11, %v1906_v50  ;;  %v1346_v50 = vld [vmem:[#allocation2 + $0x170] sm:$0xff] }
 0x195   : > { %1229 = vrot.lane.b32.xlu1 %v1723_v10, %s2954_s27  ;;  %1491 = vst.msk [vmem:[#allocation3 + $0x58] sm:$0xff] %vm1479_vm8, %v1406_v1  ;;  %2863 = vmatmul.mubr.msk.f32.gmra.mrb[8].mxu0 %vm1939_vm11, %v1907_v4 }
 0x196   : > { %1423 = vrot.lane.b32.xlu0 %v3242_v9, %s2955_s5  ;;  %v1532_v9 = vld [vmem:[#allocation2 + $0x121] sm:$0xff] }
 0x197   : > { %v828_v55 = vpop.permute.xlu1 %827  ;;  %v830_v63 = vpop.permute.xlu0 %829 }
 0x198   : > { %912 = vst.msk [vmem:[#allocation3 + $0x60] sm:$0xff] %vm899_vm5, %v828_v55  ;;  %913 = vst.msk [vmem:[#allocation3 + $0x68] sm:$0xff] %vm899_vm5, %v830_v63  ;;  %v1538_v63 = vld [vmem:[#allocation2 + $0x169] sm:$0xff] }
 0x199   : > { %1231 = vrot.lane.b32.xlu1 %v1724_v38, %s2954_s27 }
 0x19a   : > { %1425 = vrot.lane.b32.xlu0 %v3252_v14, %s2955_s5 }
 0x19b   : > { %v1597_v59 = vpop.permute.xlu1 %1596  ;;  %v1599_v22 = vpop.permute.xlu0 %1598 }
 0x19c   : > { %1683 = vst.msk [vmem:[#allocation3 + $0x50] sm:$0xff] %vm1672_vm9, %v1597_v59  ;;  %1684 = vst.msk [vmem:[#allocation3 + $0x58] sm:$0xff] %vm1672_vm9, %v1599_v22  ;;  %v1539_v59 = vld [vmem:[#allocation2 + $0x171] sm:$0xff] }
 0x19d   : > { %847 = vrot.lane.b32.xlu1 %v761_v20, %s2952_s21 }
 0x19e   : > { %849 = vrot.lane.b32.xlu0 %v3252_v14, %s2952_s21  ;;  %v1725_v14 = vld [vmem:[#allocation2 + $0x122] sm:$0xff] }
 0x19f   : > { %v1021_v32 = vpop.permute.xlu1 %1020  ;;  %v1023_v49 = vpop.permute.xlu0 %1022 }
 0x1a0   : > { %1105 = vst.msk [vmem:[#allocation3 + $0x60] sm:$0xff] %vm1092_vm6, %v1021_v32  ;;  %1106 = vst.msk [vmem:[#allocation3 + $0x68] sm:$0xff] %vm1092_vm6, %v1023_v49 }
 0x1a1   : > { %1616 = vrot.lane.b32.xlu1 %v1532_v9, %s2956_s10 }
 0x1a2   : > { %1618 = vrot.lane.b32.xlu0 %v1533_v41, %s2956_s10 }
 0x1a3   : > { %v1790_v18 = vpop.permute.xlu1 %1789  ;;  %v1792_v51 = vpop.permute.xlu0 %1791 }
 0x1a4   : > { %1876 = vst.msk [vmem:[#allocation3 + $0x50] sm:$0xff] %vm1865_vm10, %v1790_v18  ;;  %1877 = vst.msk [vmem:[#allocation3 + $0x58] sm:$0xff] %vm1865_vm10, %v1792_v51  ;;  %v1732_v18 = vld [vmem:[#allocation2 + $0x172] sm:$0xff] }
 0x1a5   : > { %1040 = vrot.lane.b32.xlu1 %v1532_v9, %s2953_s22 }
 0x1a6   : > { %1042 = vrot.lane.b32.xlu0 %v1533_v41, %s2953_s22  ;;  %v1731_v41 = vld [vmem:[#allocation2 + $0x16a] sm:$0xff] }
 0x1a7   : > { %v1214_v21 = vpop.permute.xlu1 %1213  ;;  %v1408_v58 = vpop.permute.xlu0 %1407 }
 0x1a8   : > { %1298 = vst.msk [vmem:[#allocation3 + $0x60] sm:$0xff] %vm1285_vm7, %v1214_v21 }
 0x1a9   : > { %1809 = vrot.lane.b32.xlu1 %v1725_v14, %s2957_s20  ;;  %1492 = vst.msk [vmem:[#allocation3 + $0x60] sm:$0xff] %vm1479_vm8, %v1408_v58 }
 0x1aa   : > { %1811 = vrot.lane.b32.xlu0 %v1726_v56, %s2957_s20 }
 0x1ab   : > { %v1216_v12 = vpop.permute.xlu1 %1215  ;;  %v1908_v3 = vld [vmem:[#allocation3 + $0x50] sm:$0xff]  ;;  %v1410_v6 = vpop.permute.xlu0 %1409  ;;  %v1909_v61 = vld [vmem:[#allocation3 + $0x58] sm:$0xff] }
 0x1ac   : > { %1299 = vst.msk [vmem:[#allocation3 + $0x68] sm:$0xff] %vm1285_vm7, %v1216_v12  ;;  %2865 = vmatprep.mubr.msk.f32.mxu0 %vm1939_vm11, %v1908_v3 }
 0x1ad   : > { %1233 = vrot.lane.b32.xlu1 %v1725_v14, %s2954_s27  ;;  %1493 = vst.msk [vmem:[#allocation3 + $0x68] sm:$0xff] %vm1479_vm8, %v1410_v6  ;;  %2866 = vmatmul.mubr.msk.f32.gmra.mrb[10].mxu0 %vm1939_vm11, %v1909_v61 }
 0x1ae   : > { %1427 = vrot.lane.b32.xlu0 %v1341_v46, %s2955_s5 }
 0x1af   : > { %v832_v23 = vpop.permute.xlu1 %831  ;;  %v834_v43 = vpop.permute.xlu0 %833 }
 0x1b0   : > { %914 = vst.msk [vmem:[#allocation3 + $0x70] sm:$0xff] %vm899_vm5, %v832_v23  ;;  %915 = vst.msk [vmem:[#allocation3 + $0x78] sm:$0xff] %vm899_vm5, %v834_v43 }
 0x1b1   : > { %1235 = vrot.lane.b32.xlu1 %v1726_v56, %s2954_s27  ;;  %v1347_v56 = vld [vmem:[#allocation2 + $0x180] sm:$0xff] }
 0x1b2   : > { %1429 = vrot.lane.b32.xlu0 %v1342_v40, %s2955_s5 }
 0x1b3   : > { %v1601_v24 = vpop.permute.xlu1 %1600 }
 0x1b4   : > { %1685 = vst.msk [vmem:[#allocation3 + $0x60] sm:$0xff] %vm1672_vm9, %v1601_v24  ;;  %v1603_v28 = vpop.permute.xlu0 %1602  ;;  %v1541_v24 = vld [vmem:[#allocation2 + $0x189] sm:$0xff] }
 0x1b5   : > { %851 = vrot.lane.b32.xlu1 %v1341_v46, %s2952_s21  ;;  %1686 = vst.msk [vmem:[#allocation3 + $0x68] sm:$0xff] %vm1672_vm9, %v1603_v28  ;;  %v1348_v46 = vld [vmem:[#allocation2 + $0x188] sm:$0xff] }
 0x1b6   : > { %853 = vrot.lane.b32.xlu0 %v1342_v40, %s2952_s21  ;;  %v1540_v40 = vld [vmem:[#allocation2 + $0x181] sm:$0xff] }
 0x1b7   : > { %v1025_v29 = vpop.permute.xlu1 %1024 }
 0x1b8   : > { %1107 = vst.msk [vmem:[#allocation3 + $0x70] sm:$0xff] %vm1092_vm6, %v1025_v29  ;;  %v1027_v54 = vpop.permute.xlu0 %1026 }
 0x1b9   : > { %1620 = vrot.lane.b32.xlu1 %v1534_v11, %s2956_s10  ;;  %1108 = vst.msk [vmem:[#allocation3 + $0x78] sm:$0xff] %vm1092_vm6, %v1027_v54 }
 0x1ba   : > { %1622 = vrot.lane.b32.xlu0 %v1535_v15, %s2956_s10 }
 0x1bb   : > { %v1794_v60 = vpop.permute.xlu1 %1793 }
 0x1bc   : > { %1878 = vst.msk [vmem:[#allocation3 + $0x60] sm:$0xff] %vm1865_vm10, %v1794_v60  ;;  %v1796_v0 = vpop.permute.xlu0 %1795  ;;  %v1734_v60 = vld [vmem:[#allocation2 + $0x18a] sm:$0xff] }
 0x1bd   : > { %1044 = vrot.lane.b32.xlu1 %v1534_v11, %s2953_s22  ;;  %1879 = vst.msk [vmem:[#allocation3 + $0x68] sm:$0xff] %vm1865_vm10, %v1796_v0 }
 0x1be   : > { %1046 = vrot.lane.b32.xlu0 %v1535_v15, %s2953_s22  ;;  %v1733_v15 = vld [vmem:[#allocation2 + $0x182] sm:$0xff] }
 0x1bf   : > { %v1218_v34 = vpop.permute.xlu1 %1217 }
 0x1c0   : > { %1300 = vst.msk [vmem:[#allocation3 + $0x70] sm:$0xff] %vm1285_vm7, %v1218_v34  ;;  %v1412_v47 = vpop.permute.xlu0 %1411 }
 0x1c1   : > { %1813 = vrot.lane.b32.xlu1 %v1727_v33, %s2957_s20  ;;  %1494 = vst.msk [vmem:[#allocation3 + $0x70] sm:$0xff] %vm1479_vm8, %v1412_v47 }
 0x1c2   : > { %1815 = vrot.lane.b32.xlu0 %v1728_v42, %s2957_s20 }
 0x1c3   : > { %v1220_v35 = vpop.permute.xlu1 %1219  ;;  %v1910_v5 = vld [vmem:[#allocation3 + $0x60] sm:$0xff] }
 0x1c4   : > { %1301 = vst.msk [vmem:[#allocation3 + $0x78] sm:$0xff] %vm1285_vm7, %v1220_v35  ;;  %2868 = vmatprep.mubr.msk.f32.mxu0 %vm1939_vm11, %v1910_v5  ;;  %v1414_v26 = vpop.permute.xlu0 %1413  ;;  %v1911_v13 = vld [vmem:[#allocation3 + $0x68] sm:$0xff] }
 0x1c5   : > { %1237 = vrot.lane.b32.xlu1 %v1727_v33, %s2954_s27  ;;  %1495 = vst.msk [vmem:[#allocation3 + $0x78] sm:$0xff] %vm1479_vm8, %v1414_v26  ;;  %2869 = vmatmul.mubr.msk.f32.gmra.mrb[12].mxu0 %vm1939_vm11, %v1911_v13  ;;  %v1350_v13 = vld [vmem:[#allocation2 + $0x1a0] sm:$0xff] }
 0x1c6   : > { %1431 = vrot.lane.b32.xlu0 %v1343_v8, %s2955_s5 }
 0x1c7   : > { %v836_v31 = vpop.permute.xlu1 %835 }
 0x1c8   : > { %916 = vst.msk [vmem:[#allocation3 + $0x80] sm:$0xff] %vm899_vm5, %v836_v31  ;;  %v838_v25 = vpop.permute.xlu0 %837 }
 0x1c9   : > { %1239 = vrot.lane.b32.xlu1 %v1728_v42, %s2954_s27  ;;  %917 = vst.msk [vmem:[#allocation3 + $0x88] sm:$0xff] %vm899_vm5, %v838_v25  ;;  %v1349_v42 = vld [vmem:[#allocation2 + $0x198] sm:$0xff] }
 0x1ca   : > { %1433 = vrot.lane.b32.xlu0 %v1344_v17, %s2955_s5 }
 0x1cb   : > { %v1605_v36 = vpop.permute.xlu1 %1604 }
 0x1cc   : > { %1687 = vst.msk [vmem:[#allocation3 + $0x70] sm:$0xff] %vm1672_vm9, %v1605_v36  ;;  %v1607_v37 = vpop.permute.xlu0 %1606 }
 0x1cd   : > { %855 = vrot.lane.b32.xlu1 %v1343_v8, %s2952_s21  ;;  %1688 = vst.msk [vmem:[#allocation3 + $0x78] sm:$0xff] %vm1672_vm9, %v1607_v37  ;;  %v1542_v8 = vld [vmem:[#allocation2 + $0x199] sm:$0xff] }
 0x1ce   : > { %857 = vrot.lane.b32.xlu0 %v1344_v17, %s2952_s21  ;;  %v1735_v17 = vld [vmem:[#allocation2 + $0x19a] sm:$0xff] }
 0x1cf   : > { %v1029_v2 = vpop.permute.xlu1 %1028 }
 0x1d0   : > { %1109 = vst.msk [vmem:[#allocation3 + $0x80] sm:$0xff] %vm1092_vm6, %v1029_v2  ;;  %v1031_v52 = vpop.permute.xlu0 %1030 }
 0x1d1   : > { %1624 = vrot.lane.b32.xlu1 %v1536_v62, %s2956_s10  ;;  %1110 = vst.msk [vmem:[#allocation3 + $0x88] sm:$0xff] %vm1092_vm6, %v1031_v52 }
 0x1d2   : > { %1626 = vrot.lane.b32.xlu0 %v1537_v45, %s2956_s10 }
 0x1d3   : > { %v1798_v53 = vpop.permute.xlu1 %1797 }
 0x1d4   : > { %1880 = vst.msk [vmem:[#allocation3 + $0x70] sm:$0xff] %vm1865_vm10, %v1798_v53  ;;  %v1800_v44 = vpop.permute.xlu0 %1799 }
 0x1d5   : > { %1048 = vrot.lane.b32.xlu1 %v1536_v62, %s2953_s22  ;;  %1881 = vst.msk [vmem:[#allocation3 + $0x78] sm:$0xff] %vm1865_vm10, %v1800_v44 }
 0x1d6   : > { %1050 = vrot.lane.b32.xlu0 %v1537_v45, %s2953_s22  ;;  %v1543_v45 = vld [vmem:[#allocation2 + $0x1a1] sm:$0xff] }
 0x1d7   : > { %v1222_v39 = vpop.permute.xlu1 %1221 }
 0x1d8   : > { %1302 = vst.msk [vmem:[#allocation3 + $0x80] sm:$0xff] %vm1285_vm7, %v1222_v39  ;;  %v1416_v30 = vpop.permute.xlu0 %1415 }
 0x1d9   : > { %1817 = vrot.lane.b32.xlu1 %v1729_v57, %s2957_s20  ;;  %1496 = vst.msk [vmem:[#allocation3 + $0x80] sm:$0xff] %vm1479_vm8, %v1416_v30 }
 0x1da   : > { %1819 = vrot.lane.b32.xlu0 %v1730_v16, %s2957_s20 }
 0x1db   : > { %v1224_v7 = vpop.permute.xlu1 %1223  ;;  %v1912_v10 = vld [vmem:[#allocation3 + $0x70] sm:$0xff] }
 0x1dc   : > { %1303 = vst.msk [vmem:[#allocation3 + $0x88] sm:$0xff] %vm1285_vm7, %v1224_v7  ;;  %2871 = vmatprep.mubr.msk.f32.mxu0 %vm1939_vm11, %v1912_v10  ;;  %v1418_v38 = vpop.permute.xlu0 %1417  ;;  %v1913_v48 = vld [vmem:[#allocation3 + $0x78] sm:$0xff] }
 0x1dd   : > { %1241 = vrot.lane.b32.xlu1 %v1729_v57, %s2954_s27  ;;  %1497 = vst.msk [vmem:[#allocation3 + $0x88] sm:$0xff] %vm1479_vm8, %v1418_v38  ;;  %2872 = vmatmul.mubr.msk.f32.gmra.mrb[14].mxu0 %vm1939_vm11, %v1913_v48  ;;  %v1736_v38 = vld [vmem:[#allocation2 + $0x1a2] sm:$0xff] }
 0x1de   : > { %1435 = vrot.lane.b32.xlu0 %v1345_v19, %s2955_s5 }
 0x1df   : > { %v840_v27 = vpop.permute.xlu1 %839 }
 0x1e0   : > { %918 = vst.msk [vmem:[#allocation3 + $0x90] sm:$0xff] %vm899_vm5, %v840_v27  ;;  %v842_v1 = vpop.permute.xlu0 %841 }
 0x1e1   : > { %1243 = vrot.lane.b32.xlu1 %v1730_v16, %s2954_s27  ;;  %919 = vst.msk [vmem:[#allocation3 + $0x98] sm:$0xff] %vm899_vm5, %v842_v1 }
 0x1e2   : > { %1437 = vrot.lane.b32.xlu0 %v1346_v50, %s2955_s5 }
 0x1e3   : > { %v1609_v4 = vpop.permute.xlu1 %1608 }
 0x1e4   : > { %1689 = vst.msk [vmem:[#allocation3 + $0x80] sm:$0xff] %vm1672_vm9, %v1609_v4  ;;  %v1611_v55 = vpop.permute.xlu0 %1610 }
 0x1e5   : > { %859 = vrot.lane.b32.xlu1 %v1345_v19, %s2952_s21  ;;  %1690 = vst.msk [vmem:[#allocation3 + $0x88] sm:$0xff] %vm1672_vm9, %v1611_v55 }
 0x1e6   : > { %861 = vrot.lane.b32.xlu0 %v1346_v50, %s2952_s21 }
 0x1e7   : > { %v1033_v20 = vpop.permute.xlu1 %1032 }
 0x1e8   : > { %1111 = vst.msk [vmem:[#allocation3 + $0x90] sm:$0xff] %vm1092_vm6, %v1033_v20  ;;  %v1035_v22 = vpop.permute.xlu0 %1034 }
 0x1e9   : > { %1628 = vrot.lane.b32.xlu1 %v1538_v63, %s2956_s10  ;;  %1112 = vst.msk [vmem:[#allocation3 + $0x98] sm:$0xff] %vm1092_vm6, %v1035_v22 }
 0x1ea   : > { %1630 = vrot.lane.b32.xlu0 %v1539_v59, %s2956_s10 }
 0x1eb   : > { %v1802_v9 = vpop.permute.xlu1 %1801 }
 0x1ec   : > { %1882 = vst.msk [vmem:[#allocation3 + $0x80] sm:$0xff] %vm1865_vm10, %v1802_v9  ;;  %v1804_v32 = vpop.permute.xlu0 %1803 }
 0x1ed   : > { %1052 = vrot.lane.b32.xlu1 %v1538_v63, %s2953_s22  ;;  %1883 = vst.msk [vmem:[#allocation3 + $0x88] sm:$0xff] %vm1865_vm10, %v1804_v32 }
 0x1ee   : > { %1054 = vrot.lane.b32.xlu0 %v1539_v59, %s2953_s22 }
 0x1ef   : > { %v1226_v49 = vpop.permute.xlu1 %1225 }
 0x1f0   : > { %1304 = vst.msk [vmem:[#allocation3 + $0x90] sm:$0xff] %vm1285_vm7, %v1226_v49  ;;  %v1420_v51 = vpop.permute.xlu0 %1419 }
 0x1f1   : > { %1821 = vrot.lane.b32.xlu1 %v1731_v41, %s2957_s20  ;;  %1498 = vst.msk [vmem:[#allocation3 + $0x90] sm:$0xff] %vm1479_vm8, %v1420_v51 }
 0x1f2   : > { %1823 = vrot.lane.b32.xlu0 %v1732_v18, %s2957_s20 }
 0x1f3   : > { %v1228_v14 = vpop.permute.xlu1 %1227  ;;  %v1914_v21 = vld [vmem:[#allocation3 + $0x80] sm:$0xff] }
 0x1f4   : > { %1305 = vst.msk [vmem:[#allocation3 + $0x98] sm:$0xff] %vm1285_vm7, %v1228_v14  ;;  %2874 = vmatprep.mubr.msk.f32.mxu1 %vm1939_vm11, %v1914_v21  ;;  %v1422_v58 = vpop.permute.xlu0 %1421  ;;  %v1915_v12 = vld [vmem:[#allocation3 + $0x88] sm:$0xff] }
 0x1f5   : > { %1245 = vrot.lane.b32.xlu1 %v1731_v41, %s2954_s27  ;;  %1499 = vst.msk [vmem:[#allocation3 + $0x98] sm:$0xff] %vm1479_vm8, %v1422_v58  ;;  %2875 = vmatmul.mubr.msk.f32.vlgmr.msra.gmra.mrb[0].mxu1 %vm1939_vm11, %v1915_v12 }
 0x1f6   : > { %1439 = vrot.lane.b32.xlu0 %v1347_v56, %s2955_s5 }
 0x1f7   : > { %v844_v3 = vpop.permute.xlu1 %843 }
 0x1f8   : > { %920 = vst.msk [vmem:[#allocation3 + $0xa0] sm:$0xff] %vm899_vm5, %v844_v3  ;;  %v846_v6 = vpop.permute.xlu0 %845 }
 0x1f9   : > { %1247 = vrot.lane.b32.xlu1 %v1732_v18, %s2954_s27  ;;  %921 = vst.msk [vmem:[#allocation3 + $0xa8] sm:$0xff] %vm899_vm5, %v846_v6 }
 0x1fa   : > { %1441 = vrot.lane.b32.xlu0 %v1348_v46, %s2955_s5 }
 0x1fb   : > { %v1613_v61 = vpop.permute.xlu1 %1612 }
 0x1fc   : > { %1691 = vst.msk [vmem:[#allocation3 + $0x90] sm:$0xff] %vm1672_vm9, %v1613_v61  ;;  %v1615_v23 = vpop.permute.xlu0 %1614 }
 0x1fd   : > { %863 = vrot.lane.b32.xlu1 %v1347_v56, %s2952_s21  ;;  %1692 = vst.msk [vmem:[#allocation3 + $0x98] sm:$0xff] %vm1672_vm9, %v1615_v23 }
 0x1fe   : > { %865 = vrot.lane.b32.xlu0 %v1348_v46, %s2952_s21 }
 0x1ff   : > { %v1037_v43 = vpop.permute.xlu1 %1036 }
 0x200   : > { %1113 = vst.msk [vmem:[#allocation3 + $0xa0] sm:$0xff] %vm1092_vm6, %v1037_v43  ;;  %v1039_v28 = vpop.permute.xlu0 %1038 }
 0x201   : > { %1632 = vrot.lane.b32.xlu1 %v1540_v40, %s2956_s10  ;;  %1114 = vst.msk [vmem:[#allocation3 + $0xa8] sm:$0xff] %vm1092_vm6, %v1039_v28 }
 0x202   : > { %1634 = vrot.lane.b32.xlu0 %v1541_v24, %s2956_s10 }
 0x203   : > { %v1806_v11 = vpop.permute.xlu1 %1805 }
 0x204   : > { %1884 = vst.msk [vmem:[#allocation3 + $0x90] sm:$0xff] %vm1865_vm10, %v1806_v11  ;;  %v1808_v29 = vpop.permute.xlu0 %1807 }
 0x205   : > { %1056 = vrot.lane.b32.xlu1 %v1540_v40, %s2953_s22  ;;  %1885 = vst.msk [vmem:[#allocation3 + $0x98] sm:$0xff] %vm1865_vm10, %v1808_v29 }
 0x206   : > { %1058 = vrot.lane.b32.xlu0 %v1541_v24, %s2953_s22 }
 0x207   : > { %v1230_v54 = vpop.permute.xlu1 %1229 }
 0x208   : > { %1306 = vst.msk [vmem:[#allocation3 + $0xa0] sm:$0xff] %vm1285_vm7, %v1230_v54  ;;  %v1424_v0 = vpop.permute.xlu0 %1423 }
 0x209   : > { %1825 = vrot.lane.b32.xlu1 %v1733_v15, %s2957_s20  ;;  %1500 = vst.msk [vmem:[#allocation3 + $0xa0] sm:$0xff] %vm1479_vm8, %v1424_v0 }
 0x20a   : > { %1827 = vrot.lane.b32.xlu0 %v1734_v60, %s2957_s20 }
 0x20b   : > { %v1232_v33 = vpop.permute.xlu1 %1231  ;;  %v1916_v34 = vld [vmem:[#allocation3 + $0x90] sm:$0xff] }
 0x20c   : > { %1307 = vst.msk [vmem:[#allocation3 + $0xa8] sm:$0xff] %vm1285_vm7, %v1232_v33  ;;  %2877 = vmatprep.mubr.msk.f32.mxu1 %vm1939_vm11, %v1916_v34  ;;  %v1426_v47 = vpop.permute.xlu0 %1425  ;;  %v1917_v35 = vld [vmem:[#allocation3 + $0x98] sm:$0xff] }
 0x20d   : > { %1249 = vrot.lane.b32.xlu1 %v1733_v15, %s2954_s27  ;;  %1501 = vst.msk [vmem:[#allocation3 + $0xa8] sm:$0xff] %vm1479_vm8, %v1426_v47  ;;  %2878 = vmatmul.mubr.msk.f32.gmra.mrb[2].mxu1 %vm1939_vm11, %v1917_v35 }
 0x20e   : > { %1443 = vrot.lane.b32.xlu0 %v1349_v42, %s2955_s5 }
 0x20f   : > { %v848_v5 = vpop.permute.xlu1 %847 }
 0x210   : > { %922 = vst.msk [vmem:[#allocation3 + $0xb0] sm:$0xff] %vm899_vm5, %v848_v5  ;;  %v850_v26 = vpop.permute.xlu0 %849 }
 0x211   : > { %1251 = vrot.lane.b32.xlu1 %v1734_v60, %s2954_s27  ;;  %923 = vst.msk [vmem:[#allocation3 + $0xb8] sm:$0xff] %vm899_vm5, %v850_v26  ;;  %s181_s27 = scalar_lea.vmem %s4107_s3, %s2690_s24 }
 0x212   : > { %1636 = vrot.lane.b32.xlu0 %v1542_v8, %s2956_s10 }
 0x213   : > { %v1617_v31 = vpop.permute.xlu1 %1616 }
 0x214   : > { %1693 = vst.msk [vmem:[#allocation3 + $0xa0] sm:$0xff] %vm1672_vm9, %v1617_v31  ;;  %v1619_v25 = vpop.permute.xlu0 %1618  ;;  %v2852_v36 = vpop.f32.mrb[0].mxu0 }
 0x215   : > { %1445 = vrot.lane.b32.xlu1 %v1350_v13, %s2955_s5  ;;  %1694 = vst.msk [vmem:[#allocation3 + $0xa8] sm:$0xff] %vm1672_vm9, %v1619_v25  ;;  %v2262_v37 = vsel %vm182_vm0, %v2852_v36, 0.0  ;;  %v2331_v62 = vmul.f32 %v2852_v36, %v2852_v36  ;;  %v2760_v2 = vpack.c.bf16 %v2852_v36, %v2852_v36  ;;  %v2102_v52 = vpop.f32.mrb[1].mxu0 }
 0x216   : > { %v2261_v44 = vsel %vm182_vm0, %v2102_v52, 0.0  ;;  %v2330_v57 = vmul.f32 %v2102_v52, %v2102_v52  ;;  %v2759_v39 = vpack.c.bf16 %v2102_v52, %v2102_v52  ;;  %1829 = vrot.lane.b32.xlu0 %v1735_v17, %s2957_s20 }
 0x217   : > { %v1041_v53 = vpop.permute.xlu1 %1040  ;;  %v2363_v16 = vsel %vm182_vm0, %v2331_v62, 0.0  ;;  %2564 = vst.msk [vmem:[%s3890_s23 + $0x4] sm:$0xf] %vm2562_vm12, %v2760_v2  ;;  %v2263_v30 = vadd.f32 %v2262_v37, %v2261_v44 }
 0x218   : > { %1115 = vst.msk [vmem:[#allocation3 + $0xb0] sm:$0xff] %vm1092_vm6, %v1041_v53  ;;  %v1043_v7 = vpop.permute.xlu0 %1042  ;;  %v2362_v10 = vsel %vm182_vm0, %v2330_v57, 0.0 }
 0x219   : > { %1638 = vrot.lane.b32.xlu1 %v1543_v45, %s2956_s10  ;;  %2563 = vst.msk [vmem:[%s3890_s23] sm:$0xf] %vm2562_vm12, %v2759_v39  ;;  %v2364_v19 = vadd.f32 %v2363_v16, %v2362_v10 }
 0x21a   : > { %1116 = vst.msk [vmem:[#allocation3 + $0xb8] sm:$0xff] %vm1092_vm6, %v1043_v7 }
 0x21b   : > { %v1810_v48 = vpop.permute.xlu1 %1809 }
 0x21c   : > { %1886 = vst.msk [vmem:[#allocation3 + $0xa0] sm:$0xff] %vm1865_vm10, %v1810_v48  ;;  %v1812_v27 = vpop.permute.xlu0 %1811 }
 0x21d   : > { %1831 = vrot.lane.b32.xlu1 %v1736_v38, %s2957_s20  ;;  %1887 = vst.msk [vmem:[#allocation3 + $0xa8] sm:$0xff] %vm1865_vm10, %v1812_v27 }
 0x21f   : > { %v1234_v50 = vpop.permute.xlu1 %1233 }
 0x220   : > { %1308 = vst.msk [vmem:[#allocation3 + $0xb0] sm:$0xff] %vm1285_vm7, %v1234_v50  ;;  %v1428_v1 = vpop.permute.xlu0 %1427 }
 0x221   : > { %1502 = vst.msk [vmem:[#allocation3 + $0xb0] sm:$0xff] %vm1479_vm8, %v1428_v1 }
 0x223   : > { %v1236_v4 = vpop.permute.xlu1 %1235  ;;  %v1918_v55 = vld [vmem:[#allocation3 + $0xa0] sm:$0xff] }
 0x224   : > { %1309 = vst.msk [vmem:[#allocation3 + $0xb8] sm:$0xff] %vm1285_vm7, %v1236_v4  ;;  %2880 = vmatprep.mubr.msk.f32.mxu1 %vm1939_vm11, %v1918_v55  ;;  %v1430_v63 = vpop.permute.xlu0 %1429  ;;  %v1919_v20 = vld [vmem:[#allocation3 + $0xa8] sm:$0xff] }
 0x225   : > { %1503 = vst.msk [vmem:[#allocation3 + $0xb8] sm:$0xff] %vm1479_vm8, %v1430_v63  ;;  %2881 = vmatmul.mubr.msk.f32.gmra.mrb[4].mxu1 %vm1939_vm11, %v1919_v20 }
 0x227   : > { %v852_v59 = vpop.permute.xlu1 %851 }
 0x228   : > { %924 = vst.msk [vmem:[#allocation3 + $0xc0] sm:$0xff] %vm899_vm5, %v852_v59  ;;  %v854_v22 = vpop.permute.xlu0 %853  ;;  %v2855_v9 = vpop.f32.mrb[2].mxu0 }
 0x229   : > { %925 = vst.msk [vmem:[#allocation3 + $0xc8] sm:$0xff] %vm899_vm5, %v854_v22  ;;  %v2333_v32 = vmul.f32 %v2855_v9, %v2855_v9  ;;  %v2762_v41 = vpack.c.bf16 %v2855_v9, %v2855_v9  ;;  %v2112_v49 = vpop.f32.mrb[3].mxu0  ;;  %v2266_v18 = vsel %vm182_vm0, %v2855_v9, 0.0 }
 0x22a   : > { %v2264_v51 = vsel %vm182_vm0, %v2112_v49, 0.0  ;;  %v2332_v14 = vmul.f32 %v2112_v49, %v2112_v49  ;;  %v2761_v21 = vpack.c.bf16 %v2112_v49, %v2112_v49 }
 0x22b   : > { %v1621_v56 = vpop.permute.xlu1 %1620  ;;  %2566 = vst.msk [vmem:[%s3890_s23 + $0xc] sm:$0xf] %vm2562_vm12, %v2762_v41  ;;  %v2265_v58 = vadd.f32 %v2264_v51, %v2263_v30  ;;  %v2367_v12 = vsel %vm182_vm0, %v2333_v32, 0.0 }
 0x22c   : > { %1695 = vst.msk [vmem:[#allocation3 + $0xb0] sm:$0xff] %vm1672_vm9, %v1621_v56  ;;  %v2365_v3 = vsel %vm182_vm0, %v2332_v14, 0.0  ;;  %v1623_v46 = vpop.permute.xlu0 %1622 }
 0x22d   : > { %2565 = vst.msk [vmem:[%s3890_s23 + $0x8] sm:$0xf] %vm2562_vm12, %v2761_v21  ;;  %v2366_v6 = vadd.f32 %v2365_v3, %v2364_v19  ;;  %v2267_v61 = vadd.f32 %v2266_v18, %v2265_v58 }
 0x22e   : > { %1696 = vst.msk [vmem:[#allocation3 + $0xb8] sm:$0xff] %vm1672_vm9, %v1623_v46 }
 0x22f   : > { %v1045_v23 = vpop.permute.xlu1 %1044  ;;  %v2368_v40 = vadd.f32 %v2367_v12, %v2366_v6 }
 0x230   : > { %1117 = vst.msk [vmem:[#allocation3 + $0xc0] sm:$0xff] %vm1092_vm6, %v1045_v23  ;;  %v1047_v43 = vpop.permute.xlu0 %1046 }
 0x231   : > { %1118 = vst.msk [vmem:[#allocation3 + $0xc8] sm:$0xff] %vm1092_vm6, %v1047_v43 }
 0x233   : > { %v1814_v24 = vpop.permute.xlu1 %1813 }
 0x234   : > { %1888 = vst.msk [vmem:[#allocation3 + $0xb0] sm:$0xff] %vm1865_vm10, %v1814_v24  ;;  %v1816_v28 = vpop.permute.xlu0 %1815 }
 0x235   : > { %1889 = vst.msk [vmem:[#allocation3 + $0xb8] sm:$0xff] %vm1865_vm10, %v1816_v28 }
 0x237   : > { %v1238_v11 = vpop.permute.xlu1 %1237 }
 0x238   : > { %1310 = vst.msk [vmem:[#allocation3 + $0xc0] sm:$0xff] %vm1285_vm7, %v1238_v11  ;;  %v1432_v29 = vpop.permute.xlu0 %1431 }
 0x239   : > { %1504 = vst.msk [vmem:[#allocation3 + $0xc0] sm:$0xff] %vm1479_vm8, %v1432_v29 }
 0x23b   : > { %v1240_v15 = vpop.permute.xlu1 %1239  ;;  %v1920_v54 = vld [vmem:[#allocation3 + $0xb0] sm:$0xff] }
 0x23c   : > { %1311 = vst.msk [vmem:[#allocation3 + $0xc8] sm:$0xff] %vm1285_vm7, %v1240_v15  ;;  %2883 = vmatprep.mubr.msk.f32.mxu1 %vm1939_vm11, %v1920_v54  ;;  %v1434_v60 = vpop.permute.xlu0 %1433  ;;  %v2858_v0 = vpop.f32.mrb[4].mxu0  ;;  %v1921_v33 = vld [vmem:[#allocation3 + $0xb8] sm:$0xff] }
 0x23d   : > { %1505 = vst.msk [vmem:[#allocation3 + $0xc8] sm:$0xff] %vm1479_vm8, %v1434_v60  ;;  %v2335_v34 = vmul.f32 %v2858_v0, %v2858_v0  ;;  %v2764_v42 = vpack.c.bf16 %v2858_v0, %v2858_v0  ;;  %v2122_v47 = vpop.f32.mrb[5].mxu0  ;;  %2884 = vmatmul.mubr.msk.f32.gmra.mrb[6].mxu1 %vm1939_vm11, %v1921_v33  ;;  %v2270_v35 = vsel %vm182_vm0, %v2858_v0, 0.0 }
 0x23e   : > { %v2268_v5 = vsel %vm182_vm0, %v2122_v47, 0.0  ;;  %v2334_v8 = vmul.f32 %v2122_v47, %v2122_v47  ;;  %v2763_v26 = vpack.c.bf16 %v2122_v47, %v2122_v47 }
 0x23f   : > { %v856_v13 = vpop.permute.xlu1 %855  ;;  %2568 = vst.msk [vmem:[%s3890_s23 + $0x14] sm:$0xf] %vm2562_vm12, %v2764_v42  ;;  %v2269_v31 = vadd.f32 %v2268_v5, %v2267_v61  ;;  %v2371_v17 = vsel %vm182_vm0, %v2335_v34, 0.0 }
 0x240   : > { %926 = vst.msk [vmem:[#allocation3 + $0xd0] sm:$0xff] %vm899_vm5, %v856_v13  ;;  %v2369_v25 = vsel %vm182_vm0, %v2334_v8, 0.0  ;;  %v858_v36 = vpop.permute.xlu0 %857 }
 0x241   : > { %2567 = vst.msk [vmem:[%s3890_s23 + $0x10] sm:$0xf] %vm2562_vm12, %v2763_v26  ;;  %v2370_v37 = vadd.f32 %v2369_v25, %v2368_v40  ;;  %v2271_v62 = vadd.f32 %v2270_v35, %v2269_v31 }
 0x242   : > { %927 = vst.msk [vmem:[#allocation3 + $0xd8] sm:$0xff] %vm899_vm5, %v858_v36 }
 0x243   : > { %v1625_v2 = vpop.permute.xlu1 %1624  ;;  %v2372_v45 = vadd.f32 %v2371_v17, %v2370_v37 }
 0x244   : > { %1697 = vst.msk [vmem:[#allocation3 + $0xc0] sm:$0xff] %vm1672_vm9, %v1625_v2  ;;  %v1627_v52 = vpop.permute.xlu0 %1626 }
 0x245   : > { %1698 = vst.msk [vmem:[#allocation3 + $0xc8] sm:$0xff] %vm1672_vm9, %v1627_v52 }
 0x247   : > { %v1049_v53 = vpop.permute.xlu1 %1048 }
 0x248   : > { %1119 = vst.msk [vmem:[#allocation3 + $0xd0] sm:$0xff] %vm1092_vm6, %v1049_v53  ;;  %v1051_v44 = vpop.permute.xlu0 %1050 }
 0x249   : > { %1120 = vst.msk [vmem:[#allocation3 + $0xd8] sm:$0xff] %vm1092_vm6, %v1051_v44 }
 0x24b   : > { %v1818_v57 = vpop.permute.xlu1 %1817 }
 0x24c   : > { %1890 = vst.msk [vmem:[#allocation3 + $0xc0] sm:$0xff] %vm1865_vm10, %v1818_v57  ;;  %v1820_v39 = vpop.permute.xlu0 %1819 }
 0x24d   : > { %1891 = vst.msk [vmem:[#allocation3 + $0xc8] sm:$0xff] %vm1865_vm10, %v1820_v39 }
 0x24f   : > { %v1242_v16 = vpop.permute.xlu1 %1241 }
 0x250   : > { %1312 = vst.msk [vmem:[#allocation3 + $0xd0] sm:$0xff] %vm1285_vm7, %v1242_v16  ;;  %v1436_v30 = vpop.permute.xlu0 %1435  ;;  %v2861_v7 = vpop.f32.mrb[6].mxu0 }
 0x251   : > { %1506 = vst.msk [vmem:[#allocation3 + $0xd0] sm:$0xff] %vm1479_vm8, %v1436_v30  ;;  %v2337_v10 = vmul.f32 %v2861_v7, %v2861_v7  ;;  %v2766_v19 = vpack.c.bf16 %v2861_v7, %v2861_v7  ;;  %v2132_v38 = vpop.f32.mrb[7].mxu0  ;;  %v2274_v48 = vsel %vm182_vm0, %v2861_v7, 0.0 }
 0x252   : > { %v2272_v27 = vsel %vm182_vm0, %v2132_v38, 0.0  ;;  %v2336_v50 = vmul.f32 %v2132_v38, %v2132_v38  ;;  %v2765_v1 = vpack.c.bf16 %v2132_v38, %v2132_v38 }
 0x253   : > { %v1244_v4 = vpop.permute.xlu1 %1243  ;;  %v1922_v55 = vld [vmem:[#allocation3 + $0xc0] sm:$0xff]  ;;  %2570 = vst.msk [vmem:[%s3890_s23 + $0x1c] sm:$0xf] %vm2562_vm12, %v2766_v19  ;;  %v2273_v63 = vadd.f32 %v2272_v27, %v2271_v62  ;;  %v2375_v20 = vsel %vm182_vm0, %v2337_v10, 0.0 }
 0x254   : > { %1313 = vst.msk [vmem:[#allocation3 + $0xd8] sm:$0xff] %vm1285_vm7, %v1244_v4  ;;  %2886 = vmatprep.mubr.msk.f32.mxu1 %vm1939_vm11, %v1922_v55  ;;  %v2373_v59 = vsel %vm182_vm0, %v2336_v50, 0.0  ;;  %v1438_v22 = vpop.permute.xlu0 %1437  ;;  %v1923_v9 = vld [vmem:[#allocation3 + $0xc8] sm:$0xff] }
 0x255   : > { %2569 = vst.msk [vmem:[%s3890_s23 + $0x18] sm:$0xf] %vm2562_vm12, %v2765_v1  ;;  %v2374_v32 = vadd.f32 %v2373_v59, %v2372_v45  ;;  %2887 = vmatmul.mubr.msk.f32.gmra.mrb[8].mxu1 %vm1939_vm11, %v1923_v9  ;;  %v2275_v41 = vadd.f32 %v2274_v48, %v2273_v63 }
 0x256   : > { %1507 = vst.msk [vmem:[#allocation3 + $0xd8] sm:$0xff] %vm1479_vm8, %v1438_v22 }
 0x257   : > { %v860_v49 = vpop.permute.xlu1 %859  ;;  %v2376_v18 = vadd.f32 %v2375_v20, %v2374_v32 }
 0x258   : > { %928 = vst.msk [vmem:[#allocation3 + $0xe0] sm:$0xff] %vm899_vm5, %v860_v49  ;;  %v862_v51 = vpop.permute.xlu0 %861 }
 0x259   : > { %929 = vst.msk [vmem:[#allocation3 + $0xe8] sm:$0xff] %vm899_vm5, %v862_v51 }
 0x25b   : > { %v1629_v14 = vpop.permute.xlu1 %1628 }
 0x25c   : > { %1699 = vst.msk [vmem:[#allocation3 + $0xd0] sm:$0xff] %vm1672_vm9, %v1629_v14  ;;  %v1631_v21 = vpop.permute.xlu0 %1630 }
 0x25d   : > { %1700 = vst.msk [vmem:[#allocation3 + $0xd8] sm:$0xff] %vm1672_vm9, %v1631_v21 }
 0x25f   : > { %v1053_v56 = vpop.permute.xlu1 %1052 }
 0x260   : > { %1121 = vst.msk [vmem:[#allocation3 + $0xe0] sm:$0xff] %vm1092_vm6, %v1053_v56  ;;  %v1055_v58 = vpop.permute.xlu0 %1054 }
 0x261   : > { %1122 = vst.msk [vmem:[#allocation3 + $0xe8] sm:$0xff] %vm1092_vm6, %v1055_v58 }
 0x263   : > { %v1822_v12 = vpop.permute.xlu1 %1821 }
 0x264   : > { %1892 = vst.msk [vmem:[#allocation3 + $0xd0] sm:$0xff] %vm1865_vm10, %v1822_v12  ;;  %v1824_v3 = vpop.permute.xlu0 %1823 }
 0x265   : > { %1893 = vst.msk [vmem:[#allocation3 + $0xd8] sm:$0xff] %vm1865_vm10, %v1824_v3 }
 0x267   : > { %v1246_v46 = vpop.permute.xlu1 %1245 }
 0x268   : > { %1314 = vst.msk [vmem:[#allocation3 + $0xe0] sm:$0xff] %vm1285_vm7, %v1246_v46  ;;  %v1440_v6 = vpop.permute.xlu0 %1439  ;;  %v2864_v61 = vpop.f32.mrb[8].mxu0 }
 0x269   : > { %1508 = vst.msk [vmem:[#allocation3 + $0xe0] sm:$0xff] %vm1479_vm8, %v1440_v6  ;;  %v2339_v23 = vmul.f32 %v2864_v61, %v2864_v61  ;;  %v2768_v40 = vpack.c.bf16 %v2864_v61, %v2864_v61  ;;  %v2142_v43 = vpop.f32.mrb[9].mxu0  ;;  %v2278_v24 = vsel %vm182_vm0, %v2864_v61, 0.0 }
 0x26a   : > { %v2276_v28 = vsel %vm182_vm0, %v2142_v43, 0.0  ;;  %v2338_v11 = vmul.f32 %v2142_v43, %v2142_v43  ;;  %v2767_v29 = vpack.c.bf16 %v2142_v43, %v2142_v43 }
 0x26b   : > { %v1248_v15 = vpop.permute.xlu1 %1247  ;;  %v1924_v54 = vld [vmem:[#allocation3 + $0xd0] sm:$0xff]  ;;  %2572 = vst.msk [vmem:[%s3890_s23 + $0x24] sm:$0xf] %vm2562_vm12, %v2768_v40  ;;  %v2277_v60 = vadd.f32 %v2276_v28, %v2275_v41  ;;  %v2379_v0 = vsel %vm182_vm0, %v2339_v23, 0.0 }
 0x26c   : > { %1315 = vst.msk [vmem:[#allocation3 + $0xe8] sm:$0xff] %vm1285_vm7, %v1248_v15  ;;  %2889 = vmatprep.mubr.msk.f32.mxu1 %vm1939_vm11, %v1924_v54  ;;  %v2377_v33 = vsel %vm182_vm0, %v2338_v11, 0.0  ;;  %v1442_v34 = vpop.permute.xlu0 %1441  ;;  %v1925_v42 = vld [vmem:[#allocation3 + $0xd8] sm:$0xff] }
 0x26d   : > { %2571 = vst.msk [vmem:[%s3890_s23 + $0x20] sm:$0xf] %vm2562_vm12, %v2767_v29  ;;  %v2378_v47 = vadd.f32 %v2377_v33, %v2376_v18  ;;  %2890 = vmatmul.mubr.msk.f32.gmra.mrb[10].mxu1 %vm1939_vm11, %v1925_v42  ;;  %v2279_v35 = vadd.f32 %v2278_v24, %v2277_v60 }
 0x26e   : > { %1509 = vst.msk [vmem:[#allocation3 + $0xe8] sm:$0xff] %vm1479_vm8, %v1442_v34 }
 0x26f   : > { %v864_v5 = vpop.permute.xlu1 %863  ;;  %v2380_v8 = vadd.f32 %v2379_v0, %v2378_v47 }
 0x270   : > { %930 = vst.msk [vmem:[#allocation3 + $0xf0] sm:$0xff] %vm899_vm5, %v864_v5  ;;  %v866_v26 = vpop.permute.xlu0 %865 }
 0x271   : > { %931 = vst.msk [vmem:[#allocation3 + $0xf8] sm:$0xff] %vm899_vm5, %v866_v26 }
 0x273   : > { %v1633_v13 = vpop.permute.xlu1 %1632 }
 0x274   : > { %1701 = vst.msk [vmem:[#allocation3 + $0xe0] sm:$0xff] %vm1672_vm9, %v1633_v13  ;;  %v1635_v31 = vpop.permute.xlu0 %1634 }
 0x275   : > { %1702 = vst.msk [vmem:[#allocation3 + $0xe8] sm:$0xff] %vm1672_vm9, %v1635_v31 }
 0x277   : > { %v1057_v17 = vpop.permute.xlu1 %1056 }
 0x278   : > { %1123 = vst.msk [vmem:[#allocation3 + $0xf0] sm:$0xff] %vm1092_vm6, %v1057_v17  ;;  %v1059_v25 = vpop.permute.xlu0 %1058 }
 0x279   : > { %1124 = vst.msk [vmem:[#allocation3 + $0xf8] sm:$0xff] %vm1092_vm6, %v1059_v25 }
 0x27b   : > { %v1826_v36 = vpop.permute.xlu1 %1825 }
 0x27c   : > { %1894 = vst.msk [vmem:[#allocation3 + $0xe0] sm:$0xff] %vm1865_vm10, %v1826_v36  ;;  %v1828_v37 = vpop.permute.xlu0 %1827 }
 0x27d   : > { %1895 = vst.msk [vmem:[#allocation3 + $0xe8] sm:$0xff] %vm1865_vm10, %v1828_v37 }
 0x27f   : > { %v1250_v62 = vpop.permute.xlu1 %1249 }
 0x280   : > { %1316 = vst.msk [vmem:[#allocation3 + $0xf0] sm:$0xff] %vm1285_vm7, %v1250_v62  ;;  %v2867_v2 = vpop.f32.mrb[10].mxu0  ;;  %v1444_v45 = vpop.permute.xlu0 %1443 }
 0x281   : > { %v2341_v52 = vmul.f32 %v2867_v2, %v2867_v2  ;;  %v2770_v53 = vpack.c.bf16 %v2867_v2, %v2867_v2  ;;  %v2152_v44 = vpop.f32.mrb[11].mxu0  ;;  %1510 = vst.msk [vmem:[#allocation3 + $0xf0] sm:$0xff] %vm1479_vm8, %v1444_v45  ;;  %v2282_v57 = vsel %vm182_vm0, %v2867_v2, 0.0 }
 0x282   : > { %v2280_v39 = vsel %vm182_vm0, %v2152_v44, 0.0  ;;  %v2340_v16 = vmul.f32 %v2152_v44, %v2152_v44  ;;  %v2769_v30 = vpack.c.bf16 %v2152_v44, %v2152_v44 }
 0x283   : > { %v1252_v7 = vpop.permute.xlu1 %1251  ;;  %v1926_v10 = vld [vmem:[#allocation3 + $0xe0] sm:$0xff]  ;;  %2574 = vst.msk [vmem:[%s3890_s23 + $0x2c] sm:$0xf] %vm2562_vm12, %v2770_v53  ;;  %v2281_v19 = vadd.f32 %v2280_v39, %v2279_v35  ;;  %v2383_v38 = vsel %vm182_vm0, %v2341_v52, 0.0 }
 0x284   : > { %1317 = vst.msk [vmem:[#allocation3 + $0xf8] sm:$0xff] %vm1285_vm7, %v1252_v7  ;;  %2892 = vmatprep.mubr.msk.f32.mxu1 %vm1939_vm11, %v1926_v10  ;;  %v2381_v48 = vsel %vm182_vm0, %v2340_v16, 0.0  ;;  %v1927_v27 = vld [vmem:[#allocation3 + $0xe8] sm:$0xff]  ;;  %v1637_v50 = vpop.permute.xlu0 %1636 }
 0x285   : > { %2573 = vst.msk [vmem:[%s3890_s23 + $0x28] sm:$0xf] %vm2562_vm12, %v2769_v30  ;;  %v2382_v1 = vadd.f32 %v2381_v48, %v2380_v8  ;;  %2893 = vmatmul.mubr.msk.f32.gmra.mrb[12].mxu1 %vm1939_vm11, %v1927_v27  ;;  %v2283_v4 = vadd.f32 %v2282_v57, %v2281_v19 }
 0x286   : > { %1703 = vst.msk [vmem:[#allocation3 + $0xf0] sm:$0xff] %vm1672_vm9, %v1637_v50 }
 0x287   : > { %v1446_v55 = vpop.permute.xlu1 %1445  ;;  %v2384_v63 = vadd.f32 %v2383_v38, %v2382_v1 }
 0x288   : > { %1511 = vst.msk [vmem:[#allocation3 + $0xf8] sm:$0xff] %vm1479_vm8, %v1446_v55  ;;  %v1830_v20 = vpop.permute.xlu0 %1829 }
 0x289   : > { %1896 = vst.msk [vmem:[#allocation3 + $0xf0] sm:$0xff] %vm1865_vm10, %v1830_v20 }
 0x28b   : > { %v1639_v59 = vpop.permute.xlu1 %1638 }
 0x28c   : > { %1704 = vst.msk [vmem:[#allocation3 + $0xf8] sm:$0xff] %vm1672_vm9, %v1639_v59 }
 0x28f   : > { %v1832_v22 = vpop.permute.xlu1 %1831 }
 0x290   : > { %1897 = vst.msk [vmem:[#allocation3 + $0xf8] sm:$0xff] %vm1865_vm10, %v1832_v22  ;;  %v1928_v9 = vld [vmem:[#allocation3 + $0xf0] sm:$0xff] }
 0x291   : > { %2895 = vmatprep.mubr.msk.f32.mxu1 %vm1939_vm11, %v1928_v9 }
 0x297   : > { %v1929_v32 = vld [vmem:[#allocation3 + $0xf8] sm:$0xff] }
 0x298   : > { %2896 = vmatmul.mubr.msk.f32.gmra.mrb[14].mxu1 %vm1939_vm11, %v1929_v32  ;;  %v2870_v41 = vpop.f32.mrb[12].mxu0 }
 0x299   : > { %v2343_v49 = vmul.f32 %v2870_v41, %v2870_v41  ;;  %v2772_v18 = vpack.c.bf16 %v2870_v41, %v2870_v41  ;;  %v2162_v51 = vpop.f32.mrb[13].mxu0  ;;  %v2286_v14 = vsel %vm182_vm0, %v2870_v41, 0.0 }
 0x29a   : > { %v2284_v21 = vsel %vm182_vm0, %v2162_v51, 0.0  ;;  %v2342_v56 = vmul.f32 %v2162_v51, %v2162_v51  ;;  %v2771_v58 = vpack.c.bf16 %v2162_v51, %v2162_v51 }
 0x29b   : > { %2576 = vst.msk [vmem:[%s3890_s23 + $0x34] sm:$0xf] %vm2562_vm12, %v2772_v18  ;;  %v2285_v12 = vadd.f32 %v2284_v21, %v2283_v4  ;;  %v2387_v3 = vsel %vm182_vm0, %v2343_v49, 0.0 }
 0x29c   : > { %v2385_v46 = vsel %vm182_vm0, %v2342_v56, 0.0  ;;  %2575 = vst.msk [vmem:[%s3890_s23 + $0x30] sm:$0xf] %vm2562_vm12, %v2771_v58 }
 0x29d   : > { %v2386_v6 = vadd.f32 %v2385_v46, %v2384_v63  ;;  %v2287_v61 = vadd.f32 %v2286_v14, %v2285_v12 }
 0x29f   : > { %v2388_v23 = vadd.f32 %v2387_v3, %v2386_v6 }
 0x2b0   : > { %v2873_v40 = vpop.f32.mrb[14].mxu0 }
 0x2b1   : > { %v2345_v43 = vmul.f32 %v2873_v40, %v2873_v40  ;;  %v2774_v24 = vpack.c.bf16 %v2873_v40, %v2873_v40  ;;  %v2172_v28 = vpop.f32.mrb[15].mxu0  ;;  %v2290_v11 = vsel %vm182_vm0, %v2873_v40, 0.0 }
 0x2b2   : > { %v2288_v29 = vsel %vm182_vm0, %v2172_v28, 0.0  ;;  %v2344_v15 = vmul.f32 %v2172_v28, %v2172_v28  ;;  %v2773_v54 = vpack.c.bf16 %v2172_v28, %v2172_v28 }
 0x2b3   : > { %2578 = vst.msk [vmem:[%s3890_s23 + $0x3c] sm:$0xf] %vm2562_vm12, %v2774_v24  ;;  %v2289_v60 = vadd.f32 %v2288_v29, %v2287_v61  ;;  %v2391_v0 = vsel %vm182_vm0, %v2345_v43, 0.0 }
 0x2b4   : > { %v2389_v33 = vsel %vm182_vm0, %v2344_v15, 0.0  ;;  %2577 = vst.msk [vmem:[%s3890_s23 + $0x38] sm:$0xf] %vm2562_vm12, %v2773_v54 }
 0x2b5   : > { %v2291_v34 = vadd.f32 %v2290_v11, %v2289_v60  ;;  %v2390_v42 = vadd.f32 %v2389_v33, %v2388_v23 }
 0x2b7   : > { %v2392_v47 = vadd.f32 %v2391_v0, %v2390_v42 }
 0x2c8   : > { %v2876_v35 = vpop.f32.mrb[0].mxu1 }
 0x2c9   : > { %v2347_v5 = vmul.f32 %v2876_v35, %v2876_v35  ;;  %v2776_v8 = vpack.c.bf16 %v2876_v35, %v2876_v35  ;;  %v2182_v26 = vpop.f32.mrb[1].mxu1  ;;  %v2294_v13 = vsel %vm182_vm0, %v2876_v35, 0.0 }
 0x2ca   : > { %v2292_v31 = vsel %vm182_vm0, %v2182_v26, 0.0  ;;  %v2346_v17 = vmul.f32 %v2182_v26, %v2182_v26  ;;  %v2775_v25 = vpack.c.bf16 %v2182_v26, %v2182_v26 }
 0x2cb   : > { %2580 = vst.msk [vmem:[%s3890_s23 + $0x44] sm:$0xf] %vm2562_vm12, %v2776_v8  ;;  %v2293_v36 = vadd.f32 %v2292_v31, %v2291_v34  ;;  %v2395_v37 = vsel %vm182_vm0, %v2347_v5, 0.0 }
 0x2cc   : > { %v2393_v62 = vsel %vm182_vm0, %v2346_v17, 0.0  ;;  %2579 = vst.msk [vmem:[%s3890_s23 + $0x40] sm:$0xf] %vm2562_vm12, %v2775_v25 }
 0x2cd   : > { %v2394_v2 = vadd.f32 %v2393_v62, %v2392_v47  ;;  %v2295_v45 = vadd.f32 %v2294_v13, %v2293_v36 }
 0x2cf   : > { %v2396_v52 = vadd.f32 %v2395_v37, %v2394_v2 }
 0x2e0   : > { %v2879_v53 = vpop.f32.mrb[2].mxu1 }
 0x2e1   : > { %v2349_v44 = vmul.f32 %v2879_v53, %v2879_v53  ;;  %v2778_v57 = vpack.c.bf16 %v2879_v53, %v2879_v53  ;;  %v2192_v39 = vpop.f32.mrb[3].mxu1  ;;  %v2298_v16 = vsel %vm182_vm0, %v2879_v53, 0.0 }
 0x2e2   : > { %v2296_v30 = vsel %vm182_vm0, %v2192_v39, 0.0  ;;  %v2348_v7 = vmul.f32 %v2192_v39, %v2192_v39  ;;  %v2777_v10 = vpack.c.bf16 %v2192_v39, %v2192_v39 }
 0x2e3   : > { %2582 = vst.msk [vmem:[%s3890_s23 + $0x4c] sm:$0xf] %vm2562_vm12, %v2778_v57  ;;  %v2297_v19 = vadd.f32 %v2296_v30, %v2295_v45  ;;  %v2399_v38 = vsel %vm182_vm0, %v2349_v44, 0.0 }
 0x2e4   : > { %v2397_v48 = vsel %vm182_vm0, %v2348_v7, 0.0  ;;  %2581 = vst.msk [vmem:[%s3890_s23 + $0x48] sm:$0xf] %vm2562_vm12, %v2777_v10 }
 0x2e5   : > { %v2398_v27 = vadd.f32 %v2397_v48, %v2396_v52  ;;  %v2299_v50 = vadd.f32 %v2298_v16, %v2297_v19 }
 0x2e7   : > { %v2400_v1 = vadd.f32 %v2399_v38, %v2398_v27 }
 0x2f8   : > { %v2882_v4 = vpop.f32.mrb[4].mxu1 }
 0x2f9   : > { %v2351_v55 = vmul.f32 %v2882_v4, %v2882_v4  ;;  %v2780_v63 = vpack.c.bf16 %v2882_v4, %v2882_v4  ;;  %v2202_v20 = vpop.f32.mrb[5].mxu1  ;;  %v2302_v59 = vsel %vm182_vm0, %v2882_v4, 0.0 }
 0x2fa   : > { %v2300_v22 = vsel %vm182_vm0, %v2202_v20, 0.0  ;;  %v2350_v9 = vmul.f32 %v2202_v20, %v2202_v20  ;;  %v2779_v32 = vpack.c.bf16 %v2202_v20, %v2202_v20 }
 0x2fb   : > { %2584 = vst.msk [vmem:[%s3890_s23 + $0x54] sm:$0xf] %vm2562_vm12, %v2780_v63  ;;  %v2301_v41 = vadd.f32 %v2300_v22, %v2299_v50  ;;  %v2403_v49 = vsel %vm182_vm0, %v2351_v55, 0.0 }
 0x2fc   : > { %v2401_v18 = vsel %vm182_vm0, %v2350_v9, 0.0  ;;  %2583 = vst.msk [vmem:[%s3890_s23 + $0x50] sm:$0xf] %vm2562_vm12, %v2779_v32 }
 0x2fd   : > { %v2402_v51 = vadd.f32 %v2401_v18, %v2400_v1  ;;  %v2303_v14 = vadd.f32 %v2302_v59, %v2301_v41 }
 0x2ff   : > { %v2404_v21 = vadd.f32 %v2403_v49, %v2402_v51 }
 0x310   : > { %v2885_v56 = vpop.f32.mrb[6].mxu1 }
 0x311   : > { %v2353_v58 = vmul.f32 %v2885_v56, %v2885_v56  ;;  %v2782_v12 = vpack.c.bf16 %v2885_v56, %v2885_v56  ;;  %v2212_v3 = vpop.f32.mrb[7].mxu1  ;;  %v2306_v46 = vsel %vm182_vm0, %v2885_v56, 0.0 }
 0x312   : > { %v2304_v6 = vsel %vm182_vm0, %v2212_v3, 0.0  ;;  %v2352_v61 = vmul.f32 %v2212_v3, %v2212_v3  ;;  %v2781_v23 = vpack.c.bf16 %v2212_v3, %v2212_v3 }
 0x313   : > { %2586 = vst.msk [vmem:[%s3890_s23 + $0x5c] sm:$0xf] %vm2562_vm12, %v2782_v12  ;;  %v2305_v40 = vadd.f32 %v2304_v6, %v2303_v14  ;;  %v2407_v43 = vsel %vm182_vm0, %v2353_v58, 0.0 }
 0x314   : > { %v2405_v24 = vsel %vm182_vm0, %v2352_v61, 0.0  ;;  %2585 = vst.msk [vmem:[%s3890_s23 + $0x58] sm:$0xf] %vm2562_vm12, %v2781_v23 }
 0x315   : > { %v2406_v28 = vadd.f32 %v2405_v24, %v2404_v21  ;;  %v2307_v11 = vadd.f32 %v2306_v46, %v2305_v40 }
 0x317   : > { %v2408_v29 = vadd.f32 %v2407_v43, %v2406_v28 }
 0x328   : > { %v2888_v15 = vpop.f32.mrb[8].mxu1 }
 0x329   : > { %v2355_v54 = vmul.f32 %v2888_v15, %v2888_v15  ;;  %v2784_v60 = vpack.c.bf16 %v2888_v15, %v2888_v15  ;;  %v2222_v0 = vpop.f32.mrb[9].mxu1  ;;  %v2310_v33 = vsel %vm182_vm0, %v2888_v15, 0.0 }
 0x32a   : > { %v2308_v34 = vsel %vm182_vm0, %v2222_v0, 0.0  ;;  %v2354_v42 = vmul.f32 %v2222_v0, %v2222_v0  ;;  %v2783_v47 = vpack.c.bf16 %v2222_v0, %v2222_v0 }
 0x32b   : > { %2588 = vst.msk [vmem:[%s3890_s23 + $0x64] sm:$0xf] %vm2562_vm12, %v2784_v60  ;;  %v2309_v35 = vadd.f32 %v2308_v34, %v2307_v11  ;;  %v2411_v5 = vsel %vm182_vm0, %v2355_v54, 0.0 }
 0x32c   : > { %v2409_v8 = vsel %vm182_vm0, %v2354_v42, 0.0  ;;  %2587 = vst.msk [vmem:[%s3890_s23 + $0x60] sm:$0xf] %vm2562_vm12, %v2783_v47 }
 0x32d   : > { %v2410_v26 = vadd.f32 %v2409_v8, %v2408_v29  ;;  %v2311_v13 = vadd.f32 %v2310_v33, %v2309_v35 }
 0x32f   : > { %v2412_v31 = vadd.f32 %v2411_v5, %v2410_v26 }
 0x340   : > { %v2891_v17 = vpop.f32.mrb[10].mxu1 }
 0x341   : > { %v2357_v25 = vmul.f32 %v2891_v17, %v2891_v17  ;;  %v2786_v36 = vpack.c.bf16 %v2891_v17, %v2891_v17  ;;  %v2232_v37 = vpop.f32.mrb[11].mxu1  ;;  %v2314_v62 = vsel %vm182_vm0, %v2891_v17, 0.0 }
 0x342   : > { %v2312_v2 = vsel %vm182_vm0, %v2232_v37, 0.0  ;;  %v2356_v45 = vmul.f32 %v2232_v37, %v2232_v37  ;;  %v2785_v52 = vpack.c.bf16 %v2232_v37, %v2232_v37 }
 0x343   : > { %2590 = vst.msk [vmem:[%s3890_s23 + $0x6c] sm:$0xf] %vm2562_vm12, %v2786_v36  ;;  %v2313_v53 = vadd.f32 %v2312_v2, %v2311_v13  ;;  %v2415_v44 = vsel %vm182_vm0, %v2357_v25, 0.0 }
 0x344   : > { %v2413_v57 = vsel %vm182_vm0, %v2356_v45, 0.0  ;;  %2589 = vst.msk [vmem:[%s3890_s23 + $0x68] sm:$0xf] %vm2562_vm12, %v2785_v52 }
 0x345   : > { %v2414_v39 = vadd.f32 %v2413_v57, %v2412_v31  ;;  %v2315_v16 = vadd.f32 %v2314_v62, %v2313_v53 }
 0x347   : > { %v2416_v30 = vadd.f32 %v2415_v44, %v2414_v39 }
 0x358   : > { %v2894_v7 = vpop.f32.mrb[12].mxu1 }
 0x359   : > { %v2359_v10 = vmul.f32 %v2894_v7, %v2894_v7  ;;  %v2788_v19 = vpack.c.bf16 %v2894_v7, %v2894_v7  ;;  %v2242_v38 = vpop.f32.mrb[13].mxu1  ;;  %v2318_v48 = vsel %vm182_vm0, %v2894_v7, 0.0 }
 0x35a   : > { %v2316_v27 = vsel %vm182_vm0, %v2242_v38, 0.0  ;;  %v2358_v50 = vmul.f32 %v2242_v38, %v2242_v38  ;;  %v2787_v1 = vpack.c.bf16 %v2242_v38, %v2242_v38 }
 0x35b   : > { %2592 = vst.msk [vmem:[%s3890_s23 + $0x74] sm:$0xf] %vm2562_vm12, %v2788_v19  ;;  %v2317_v4 = vadd.f32 %v2316_v27, %v2315_v16  ;;  %v2419_v55 = vsel %vm182_vm0, %v2359_v10, 0.0 }
 0x35c   : > { %v2417_v63 = vsel %vm182_vm0, %v2358_v50, 0.0  ;;  %2591 = vst.msk [vmem:[%s3890_s23 + $0x70] sm:$0xf] %vm2562_vm12, %v2787_v1 }
 0x35d   : > { %v2418_v20 = vadd.f32 %v2417_v63, %v2416_v30  ;;  %v2319_v59 = vadd.f32 %v2318_v48, %v2317_v4 }
 0x35f   : > { %v2420_v22 = vadd.f32 %v2419_v55, %v2418_v20 }
 0x36b   : > { %v2897_v9 = vpop.f32.mrb[14].mxu1 }
 0x36c   : > { %v2790_v32 = vpack.c.bf16 %v2897_v9, %v2897_v9  ;;  %v2252_v41 = vpop.f32.mrb[15].mxu1  ;;  %v2361_v49 = vmul.f32 %v2897_v9, %v2897_v9  ;;  %v2322_v56 = vsel %vm182_vm0, %v2897_v9, 0.0 }
 0x36d   : > { %v2320_v18 = vsel %vm182_vm0, %v2252_v41, 0.0  ;;  %v2360_v51 = vmul.f32 %v2252_v41, %v2252_v41  ;;  %v2789_v14 = vpack.c.bf16 %v2252_v41, %v2252_v41 }
 0x36e   : > { %2594 = vst.msk [vmem:[%s3890_s23 + $0x7c] sm:$0xf] %vm2562_vm12, %v2790_v32  ;;  %v2321_v21 = vadd.f32 %v2320_v18, %v2319_v59  ;;  %v2423_v46 = vsel %vm182_vm0, %v2361_v49, 0.0 }
 0x36f   : > { %v2421_v58 = vsel %vm182_vm0, %v2360_v51, 0.0  ;;  %2593 = vst.msk [vmem:[%s3890_s23 + $0x78] sm:$0xf] %vm2562_vm12, %v2789_v14 }
 0x370   : > { %v2323_v12 = vadd.f32 %v2322_v56, %v2321_v21  ;;  %v2422_v3 = vadd.f32 %v2421_v58, %v2420_v22 }
 0x372   : > { %v2324_v6 = vrot.slane %v2323_v12, 4  ;;  %v2424_v61 = vadd.f32 %v2423_v46, %v2422_v3 }
 0x374   : > { %v2325_v23 = vadd.f32 %v2324_v6, %v2323_v12  ;;  %v2425_v40 = vrot.slane %v2424_v61, 4 }
 0x376   : > { %v2326_v43 = vrot.slane %v2325_v23, 2  ;;  %v2426_v24 = vadd.f32 %v2425_v40, %v2424_v61 }
 0x378   : > { %v2327_v28 = vadd.f32 %v2326_v43, %v2325_v23  ;;  %v2427_v11 = vrot.slane %v2426_v24, 2 }
 0x37a   : > { %v2328_v29 = vrot.slane %v2327_v28, 1  ;;  %v2428_v15 = vadd.f32 %v2427_v11, %v2426_v24 }
 0x37c   : > { %v2429_v54 = vrot.slane %v2428_v15, 1  ;;  %v2329_v60 = vadd.f32 %v2328_v29, %v2327_v28 }
 0x37e   : > { %v2430_v0 = vadd.f32 %v2429_v54, %v2428_v15 }
 0x380   : > { %v2432_v33 = vsel %vm2431_vm13, %v2329_v60, %v2430_v0 }
 0x381   : > { %2433 = vst.msk [vmem:[%s181_s27] sm:$0x3] %vm185_vm1, %v2432_v33 }
 0x382 PF: > { %s14_s12 = sadd.s32 1, %s2947_s12  }
 0x383   : > { %p11_p4 = scmp.ge.s32.totalorder %s14_s12, 4  }
 0x385   :  { %13 = sbr.rel (!%p11_p4) target bundleno = 1 (0x1), region = 73 }

// kernel: basic_block_forward.5
= control target key start
LH: loop header
LB: loop body
LE: loop exit
PB: predicated region body
PF: predicated region fallthrough
CT: control target
= control target key end

     0   :  { %s465_s21 = smov 0   ;;  %s497_s0 = inlined_call_operand.vmem [shape: bf16[32,128], index: 0, kind: input, shape index: {}]   ;;  %s498_s1 = inlined_call_operand.vmem [shape: f32[32,128], index: 1, kind: input, shape index: {}]   ;;  %s499_s2 = inlined_call_operand.vmem [shape: f32[1,128], index: 2, kind: input, shape index: {}]   ;;  %s500_s3 = inlined_call_operand.vmem [shape: f32[1,128], index: 3, kind: input, shape index: {}]   ;;  %s501_s4 = inlined_call_operand.vmem [shape: f32[1,128], index: 4, kind: input, shape index: {}]   ;;  %s502_s5 = inlined_call_operand.vmem [shape: f32[1,128], index: 5, kind: input, shape index: {}]   ;;  %s503_s6 = inlined_call_operand.vmem [shape: f32[32,128], index: 6, kind: output, shape index: {}]  }
   0x1 LB: > { %s393_s22 = sadd.s32 4294967295, %s428_s21   ;;  %p397_p0 = scmp.ge.s32.totalorder %s428_s21, 1  ;;  %s428_s21 = sphi %s465_s21, %s16_s21  }
   0x2   : > { %p224_p1 = scmp.lt.s32.totalorder %s428_s21, 3 }
   0x4   : > { %p225_p2 = pnand %p397_p0, %p224_p1 }
   0x5   : > { %s398_s23 = sshll.u32 (!%p225_p2), %s393_s22, 1  ;;  %v406_v0 = vld [vmem:[%s501_s4] ss:$0 sm:$0xff] (!%p225_p2) }
   0x6   : > { %228 = sbr.rel (%p225_p2) target bundleno = 28 (0x1c), region = 44  ;;  %p260_p3 = scmp.lt.s32.totalorder (!%p225_p2), %s398_s23, 3  ;;  %v404_v1 = vld [vmem:[%s499_s2] ss:$0 sm:$0xff] (!%p225_p2) }
   0x7   : > { %v407_v2 = vld [vmem:[%s502_s5] ss:$0 sm:$0xff] (!%p225_p2) }
   0x8   : > { %v405_v10 = vld [vmem:[%s500_s3] ss:$0 sm:$0xff] (!%p225_p2) }
   0xd   : > { %s505_s23 = smov (!%p260_p3, %s398_s23), 3 }
   0xe   : > { %s399_s24 = sshll.u32 %s505_s23, 2  ;;  %s401_s25 = sshll.u32 %s505_s23, 3 }
   0xf   : > { %s263_s30 = scalar_lea.vmem %s497_s0, %s399_s24  ;;  %s269_s9 = scalar_lea.vmem %s498_s1, %s401_s25 }
  0x10   : > { %v411_v3 = vld [vmem:[%s263_s30] sm:$0xff]   ;;  %v300_v5 = vld [vmem:[%s269_s9 + $0x8] sm:$0xff]  ;;  %s275_s18 = scalar_lea.vmem %s503_s6, %s401_s25 }
  0x11   : > { %v299_v4 = vld [vmem:[%s269_s9] sm:$0xff]  ;;  %v412_v6 = vunpack.c.l.bf16 %v411_v3  ;;  %v413_v7 = vunpack.c.h.bf16 %v411_v3  ;;  %v309_v9 = vmul.f32 %v406_v0, %v300_v5 }
  0x12   : > { %v308_v8 = vmul.f32 %v406_v0, %v299_v4 }
  0x13   : > { %v288_v11 = vmul.f32 %v412_v6, %v404_v1  ;;  %v289_v12 = vmul.f32 %v413_v7, %v404_v1  ;;  %v318_v14 = vadd.f32 %v407_v2, %v309_v9 }
  0x14   : > { %v317_v13 = vadd.f32 %v407_v2, %v308_v8 }
  0x15   : > { %v297_v15 = vadd.f32 %v405_v10, %v288_v11  ;;  %v298_v16 = vadd.f32 %v405_v10, %v289_v12 }
  0x17   : > { %v319_v17 = vadd.f32 %v317_v13, %v297_v15  ;;  %v320_v18 = vadd.f32 %v318_v14, %v298_v16 }
  0x19   : > { %v321_v19 = vmax.f32 %v319_v17, 0.0  ;;  %v322_v20 = vmax.f32 %v320_v18, 0.0 }
  0x1b   : > { %323 = vst [vmem:[%s275_s18] sm:$0xff] %v321_v19  ;;  %324 = vst [vmem:[%s275_s18 + $0x8] sm:$0xff] %v322_v20 }
  0x1c PF: > { %s16_s21 = sadd.s32 1, %s428_s21  }
  0x1d   : > { %p13_p4 = scmp.ge.s32.totalorder %s16_s21, 4  }
  0x1f   :  { %15 = sbr.rel (!%p13_p4) target bundleno = 1 (0x1), region = 77 }

// kernel: basic_block_forward.4
= control target key start
LH: loop header
LB: loop body
LE: loop exit
PB: predicated region body
PF: predicated region fallthrough
CT: control target
= control target key end

     0   :  { %s3267_s18 = smov 0   ;;  %s4451_s0 = inlined_call_operand.vmem [shape: bf16[2,16,16,8], index: 0, kind: input, shape index: {}]   ;;  %s4452_s1 = inlined_call_operand.vmem [shape: f32[1,8], index: 1, kind: input, shape index: {}]   ;;  %s4453_s2 = inlined_call_operand.vmem [shape: f32[1,8], index: 2, kind: input, shape index: {}]   ;;  %s4454_s3 = inlined_call_operand.vmem [shape: f32[72,8], index: 3, kind: input, shape index: {}]   ;;  %s4455_s4 = inlined_call_operand.vmem [shape: bf16[2,16,16,8], index: 4, kind: output, shape index: {0}]   ;;  %s4456_s5 = inlined_call_operand.vmem [shape: f32[2,2,8], index: 5, kind: output, shape index: {1}]  }
   0x1 LB: > { %s2877_s19 = sadd.s32 4294967295, %s3226_s18   ;;  %p2881_p0 = scmp.ge.s32.totalorder %s3226_s18, 1  ;;  %s3226_s18 = sphi %s3267_s18, %s16_s18  }
   0x2   : > { %p190_p1 = scmp.lt.s32.totalorder %s3226_s18, 3 }
   0x4   : > { %p191_p2 = pnand %p2881_p0, %p190_p1 }
   0x5   : > { %vm410_vm0 = vcmask (!%p191_p2), 64512   ;;  %vm413_vm1 = vcmask (!%p191_p2), 58368   ;;  %p3277_p3 = scmp.lt.s32.totalorder (!%p191_p2), %s2877_s19, 1  ;;  %vm420_vm2 = vcmask (!%p191_p2), 57344   ;;  %v3228_v0 = vmov (!%p191_p2), 0.0   ;;  %s3229_s29 = smov (!%p191_p2), 8  }
   0x6   : > { %194 = sbr.rel (%p191_p2) target bundleno = 899 (0x383), region = 36  ;;  %411 = vst.msk [vmem:[#allocation2] sm:$0xff] (!%p191_p2), %vm410_vm0, %v3228_v0  ;;  %412 = vst.msk [vmem:[#allocation2 + $0x8] sm:$0xff] (!%p191_p2), %vm410_vm0, %v3228_v0  ;;  %v3336_v1 = vld [vmem:[%s4452_s1] ss:$0 sm:$0xff] (!%p191_p2)  ;;  %s3230_s30 = smov (!%p191_p2), 16  }
   0x7   : > { %416 = vst.msk [vmem:[#allocation2 + $0x198] sm:$0xff] (!%p191_p2), %vm410_vm0, %v3228_v0  ;;  %417 = vst.msk [vmem:[#allocation2 + $0x1a0] sm:$0xff] (!%p191_p2), %vm410_vm0, %v3228_v0  ;;  %v3346_v12 = vld [vmem:[%s4453_s2] ss:$0 sm:$0xff] (!%p191_p2)  ;;  %vm709_vm3 = vcmask (!%p191_p2), 130112   ;;  %s3231_s6 = smov (!%p191_p2), 24  }
   0x8   : > { %414 = vst.msk [vmem:[#allocation2 + $0x10] sm:$0x3] (!%p191_p2), %vm413_vm1, %v3228_v0  ;;  %418 = vst.msk [vmem:[#allocation2 + $0x1a8] sm:$0x3] (!%p191_p2), %vm413_vm1, %v3228_v0  ;;  %s3232_s7 = smov (!%p191_p2), 32   ;;  %s3233_s8 = smov (!%p191_p2), 40  }
   0x9   : > { %437 = vst.msk [vmem:[#allocation2 + $0x29] sm:$0x1] (!%p191_p2), %vm420_vm2, %v3228_v0  ;;  %421 = vst.msk [vmem:[#allocation2 + $0x18] sm:$0x1] (!%p191_p2), %vm420_vm2, %v3228_v0  ;;  %s3234_s13 = smov (!%p191_p2), 48   ;;  %s3235_s20 = smov (!%p191_p2), 56  }
   0xa   : > { %422 = vst.msk [vmem:[#allocation2 + $0x30] sm:$0x1] (!%p191_p2), %vm420_vm2, %v3228_v0  ;;  %423 = vst.msk [vmem:[#allocation2 + $0x48] sm:$0x1] (!%p191_p2), %vm420_vm2, %v3228_v0  ;;  %s3236_s11 = smov (!%p191_p2), 64   ;;  %vm902_vm4 = vcmask (!%p191_p2), 195712  }
   0xb   : > { %424 = vst.msk [vmem:[#allocation2 + $0x60] sm:$0x1] (!%p191_p2), %vm420_vm2, %v3228_v0  ;;  %425 = vst.msk [vmem:[#allocation2 + $0x78] sm:$0x1] (!%p191_p2), %vm420_vm2, %v3228_v0  ;;  %vm1095_vm5 = vcmask (!%p191_p2), 261312   ;;  %vm1288_vm6 = vcmask (!%p191_p2), 326912  }
   0xc   : > { %426 = vst.msk [vmem:[#allocation2 + $0x90] sm:$0x1] (!%p191_p2), %vm420_vm2, %v3228_v0  ;;  %427 = vst.msk [vmem:[#allocation2 + $0xa8] sm:$0x1] (!%p191_p2), %vm420_vm2, %v3228_v0  ;;  %vm1481_vm7 = vcmask (!%p191_p2), 392512   ;;  %vm1675_vm8 = vcmask (!%p191_p2), 458112  }
   0xd   : > { %428 = vst.msk [vmem:[#allocation2 + $0xc0] sm:$0x1] %vm420_vm2, %v3228_v0  ;;  %429 = vst.msk [vmem:[#allocation2 + $0xd8] sm:$0x1] %vm420_vm2, %v3228_v0  ;;  %s4459_s19 = smov (!%p3277_p3, %s2877_s19), 1  ;;  %v549_v11 = vld [vmem:[#allocation2 + $0x1] sm:$0xff] }
   0xe   : > { %430 = vst.msk [vmem:[#allocation2 + $0xf0] sm:$0x1] %vm420_vm2, %v3228_v0  ;;  %431 = vst.msk [vmem:[#allocation2 + $0x108] sm:$0x1] %vm420_vm2, %v3228_v0  ;;  %s2955_s21 = sshll.u32 %s4459_s19, 7  ;;  %613 = vrot.lane.b32.xlu0 %v549_v11, %s3229_s29  ;;  %v485_v36 = vld [vmem:[#allocation2] sm:$0xff] }
   0xf   : > { %432 = vst.msk [vmem:[#allocation2 + $0x120] sm:$0x1] %vm420_vm2, %v3228_v0  ;;  %433 = vst.msk [vmem:[#allocation2 + $0x138] sm:$0x1] %vm420_vm2, %v3228_v0  ;;  %s3331_s24 = scalar_lea.vmem %s4451_s0, %s2955_s21  ;;  %v550_v21 = vld [vmem:[#allocation2 + $0x9] sm:$0xff]  ;;  %vm1868_vm9 = vcmask 523712   ;;  %s4236_s16 = scalar_lea.vmem %s4455_s4, %s2955_s21 }
  0x10   : > { %434 = vst.msk [vmem:[#allocation2 + $0x150] sm:$0x1] %vm420_vm2, %v3228_v0  ;;  %435 = vst.msk [vmem:[#allocation2 + $0x168] sm:$0x1] %vm420_vm2, %v3228_v0  ;;  %v2990_v2 = vld [vmem:[%s3331_s24] sm:$0xff]   ;;  %v3053_v3 = vld [vmem:[%s3331_s24 + $0x8] sm:$0xff]  }
  0x11   : > { %436 = vst.msk [vmem:[#allocation2 + $0x180] sm:$0x1] %vm420_vm2, %v3228_v0  ;;  %438 = vst.msk [vmem:[#allocation2 + $0x41] sm:$0x1] %vm420_vm2, %v3228_v0  ;;  %v3054_v4 = vld [vmem:[%s3331_s24 + $0x10] sm:$0xff]   ;;  %v2991_v5 = vunpack.c.l.bf16 %v2990_v2  ;;  %v2995_v6 = vunpack.c.l.bf16 %v3053_v3  ;;  %v2992_v7 = vunpack.c.h.bf16 %v2990_v2  ;;  %v3055_v9 = vld [vmem:[%s3331_s24 + $0x18] sm:$0xff]   ;;  %v2996_v13 = vunpack.c.h.bf16 %v3053_v3 }
  0x12   : > { %439 = vst.msk [vmem:[#allocation2 + $0x59] sm:$0x1] %vm420_vm2, %v3228_v0  ;;  %440 = vst.msk [vmem:[#allocation2 + $0x71] sm:$0x1] %vm420_vm2, %v3228_v0  ;;  %v2999_v8 = vunpack.c.l.bf16 %v3054_v4  ;;  %v3056_v10 = vld [vmem:[%s3331_s24 + $0x20] sm:$0xff]   ;;  %v3003_v14 = vunpack.c.l.bf16 %v3055_v9  ;;  %v3000_v15 = vunpack.c.h.bf16 %v3054_v4  ;;  %v3057_v30 = vld [vmem:[%s3331_s24 + $0x28] sm:$0xff]   ;;  %615 = vrot.lane.b32.xlu0 %v550_v21, %s3229_s29  ;;  %v3004_v48 = vunpack.c.h.bf16 %v3055_v9 }
  0x13   : > { %441 = vst.msk [vmem:[#allocation2 + $0x89] sm:$0x1] %vm420_vm2, %v3228_v0  ;;  %442 = vst.msk [vmem:[#allocation2 + $0xa1] sm:$0x1] %vm420_vm2, %v3228_v0  ;;  %v3007_v16 = vunpack.c.l.bf16 %v3056_v10  ;;  %v307_v17 = vmul.f32 %v2991_v5, %v3336_v1  ;;  %v309_v18 = vmul.f32 %v2995_v6, %v3336_v1  ;;  %v308_v19 = vmul.f32 %v2992_v7, %v3336_v1  ;;  %v3058_v35 = vld [vmem:[%s3331_s24 + $0x30] sm:$0xff]   ;;  %v486_v37 = vld [vmem:[#allocation2 + $0x8] sm:$0xff] }
  0x14   : > { %443 = vst.msk [vmem:[#allocation2 + $0xb9] sm:$0x1] %vm420_vm2, %v3228_v0  ;;  %444 = vst.msk [vmem:[#allocation2 + $0xd1] sm:$0x1] %vm420_vm2, %v3228_v0  ;;  %v311_v20 = vmul.f32 %v2999_v8, %v3336_v1  ;;  %v310_v22 = vmul.f32 %v2996_v13, %v3336_v1  ;;  %v313_v23 = vmul.f32 %v3003_v14, %v3336_v1  ;;  %v3369_v42 = vld [vmem:[%s3331_s24 + $0x38] sm:$0xff]   ;;  %v3372_v43 = vld [vmem:[%s3331_s24 + $0x40] sm:$0xff]   ;;  %v3011_v49 = vunpack.c.l.bf16 %v3057_v30 }
  0x15   : > { %445 = vst.msk [vmem:[#allocation2 + $0xe9] sm:$0x1] %vm420_vm2, %v3228_v0  ;;  %446 = vst.msk [vmem:[#allocation2 + $0x101] sm:$0x1] %vm420_vm2, %v3228_v0  ;;  %v312_v24 = vmul.f32 %v3000_v15, %v3336_v1  ;;  %v315_v25 = vmul.f32 %v3007_v16, %v3336_v1  ;;  %v346_v26 = vadd.f32 %v3346_v12, %v307_v17  ;;  %v3008_v50 = vunpack.c.h.bf16 %v3056_v10  ;;  %v3061_v9 = vld [vmem:[%s3331_s24 + $0x48] sm:$0xff]   ;;  %v3062_v10 = vld [vmem:[%s3331_s24 + $0x50] sm:$0xff]  }
  0x16   : > { %447 = vst.msk [vmem:[#allocation2 + $0x119] sm:$0x1] %vm420_vm2, %v3228_v0  ;;  %448 = vst.msk [vmem:[#allocation2 + $0x131] sm:$0x1] %vm420_vm2, %v3228_v0  ;;  %v348_v27 = vadd.f32 %v3346_v12, %v309_v18  ;;  %v347_v28 = vadd.f32 %v3346_v12, %v308_v19  ;;  %v350_v29 = vadd.f32 %v3346_v12, %v311_v20  ;;  %v3015_v51 = vunpack.c.l.bf16 %v3058_v35  ;;  %v3405_v16 = vld [vmem:[%s3331_s24 + $0x58] sm:$0xff]   ;;  %s2886_s21 = sshll.u32 %s4459_s19, 1 }
  0x17   : > { %449 = vst.msk [vmem:[#allocation2 + $0x149] sm:$0x1] %vm420_vm2, %v3228_v0  ;;  %450 = vst.msk [vmem:[#allocation2 + $0x161] sm:$0x1] %vm420_vm2, %v3228_v0  ;;  %v349_v31 = vadd.f32 %v3346_v12, %v310_v22  ;;  %v352_v32 = vadd.f32 %v3346_v12, %v313_v23  ;;  %v351_v33 = vadd.f32 %v3346_v12, %v312_v24  ;;  %v378_v38 = vmax.f32 %v346_v26, 0.0  ;;  %v3413_v23 = vld [vmem:[%s3331_s24 + $0x60] sm:$0xff]   ;;  %s235_s17 = scalar_lea.vmem %s4456_s5, %s2886_s21 }
  0x18   : > { %451 = vst.msk [vmem:[#allocation2 + $0x179] sm:$0x1] %vm420_vm2, %v3228_v0  ;;  %452 = vst.msk [vmem:[#allocation2 + $0x191] sm:$0x1] %vm420_vm2, %v3228_v0  ;;  %v354_v34 = vadd.f32 %v3346_v12, %v315_v25  ;;  %v380_v39 = vmax.f32 %v348_v27, 0.0  ;;  %v379_v40 = vmax.f32 %v347_v28, 0.0  ;;  %v3012_v52 = vunpack.c.h.bf16 %v3057_v30 }
  0x19   : > { %v382_v41 = vmax.f32 %v350_v29, 0.0  ;;  %517 = vst.msk [vmem:[#allocation3] sm:$0xff] %vm410_vm0, %v485_v36  ;;  %518 = vst.msk [vmem:[#allocation3 + $0x8] sm:$0xff] %vm410_vm0, %v486_v37  ;;  %v381_v44 = vmax.f32 %v349_v31, 0.0  ;;  %v384_v45 = vmax.f32 %v352_v32, 0.0  ;;  %v383_v46 = vmax.f32 %v351_v33, 0.0 }
  0x1a   : > { %v386_v47 = vmax.f32 %v354_v34, 0.0  ;;  %453 = vst.msk [vmem:[#allocation2 + $0x19] sm:$0xff] %vm410_vm0, %v378_v38  ;;  %455 = vst.msk [vmem:[#allocation2 + $0x31] sm:$0xff] %vm410_vm0, %v380_v39  ;;  %v3019_v53 = vunpack.c.l.bf16 %v3369_v42  ;;  %v3016_v54 = vunpack.c.h.bf16 %v3058_v35  ;;  %v3023_v55 = vunpack.c.l.bf16 %v3372_v43 }
  0x1b   : > { %454 = vst.msk [vmem:[#allocation2 + $0x21] sm:$0xff] %vm410_vm0, %v379_v40  ;;  %457 = vst.msk [vmem:[#allocation2 + $0x49] sm:$0xff] %vm410_vm0, %v382_v41  ;;  %v314_v56 = vmul.f32 %v3004_v48, %v3336_v1  ;;  %v317_v57 = vmul.f32 %v3011_v49, %v3336_v1  ;;  %v316_v58 = vmul.f32 %v3008_v50, %v3336_v1  ;;  %v3020_v22 = vunpack.c.h.bf16 %v3369_v42 }
  0x1c   : > { %456 = vst.msk [vmem:[#allocation2 + $0x39] sm:$0xff] %vm410_vm0, %v381_v44  ;;  %459 = vst.msk [vmem:[#allocation2 + $0x61] sm:$0xff] %vm410_vm0, %v384_v45  ;;  %v319_v59 = vmul.f32 %v3015_v51, %v3336_v1  ;;  %v318_v60 = vmul.f32 %v3012_v52, %v3336_v1  ;;  %v321_v61 = vmul.f32 %v3019_v53, %v3336_v1  ;;  %v3027_v25 = vunpack.c.l.bf16 %v3061_v9  ;;  %v3065_v44 = vld [vmem:[%s3331_s24 + $0x68] sm:$0xff]   ;;  %v3066_v45 = vld [vmem:[%s3331_s24 + $0x70] sm:$0xff]  }
  0x1d   : > { %458 = vst.msk [vmem:[#allocation2 + $0x51] sm:$0xff] %vm410_vm0, %v383_v46  ;;  %461 = vst.msk [vmem:[#allocation2 + $0x79] sm:$0xff] %vm410_vm0, %v386_v47  ;;  %v320_v62 = vmul.f32 %v3016_v54, %v3336_v1  ;;  %v323_v63 = vmul.f32 %v3023_v55, %v3336_v1  ;;  %v353_v0 = vadd.f32 %v3346_v12, %v314_v56  ;;  %v3024_v26 = vunpack.c.h.bf16 %v3372_v43 }
  0x1e   : > { %v356_v2 = vadd.f32 %v3346_v12, %v317_v57  ;;  %v355_v3 = vadd.f32 %v3346_v12, %v316_v58  ;;  %v358_v4 = vadd.f32 %v3346_v12, %v319_v59  ;;  %v357_v5 = vadd.f32 %v3346_v12, %v318_v60 }
  0x1f   : > { %v360_v6 = vadd.f32 %v3346_v12, %v321_v61  ;;  %v359_v7 = vadd.f32 %v3346_v12, %v320_v62  ;;  %v362_v8 = vadd.f32 %v3346_v12, %v323_v63  ;;  %v385_v11 = vmax.f32 %v353_v0, 0.0 }
  0x20   : > { %v388_v13 = vmax.f32 %v356_v2, 0.0  ;;  %v387_v14 = vmax.f32 %v355_v3, 0.0  ;;  %v390_v15 = vmax.f32 %v358_v4, 0.0  ;;  %v389_v19 = vmax.f32 %v357_v5, 0.0 }
  0x21   : > { %v3407_v17 = vld [vmem:[#allocation2 + $0x19] sm:$0xff]  ;;  %v3409_v18 = vld [vmem:[#allocation2 + $0x31] sm:$0xff]  ;;  %v392_v20 = vmax.f32 %v360_v6, 0.0  ;;  %v391_v21 = vmax.f32 %v359_v7, 0.0  ;;  %460 = vst.msk [vmem:[#allocation2 + $0x69] sm:$0xff] %vm410_vm0, %v385_v11  ;;  %v394_v24 = vmax.f32 %v362_v8, 0.0  ;;  %v3031_v27 = vunpack.c.l.bf16 %v3062_v10 }
  0x22   : > { %617 = vrot.lane.b32.xlu1 %v3407_v17, %s3229_s29  ;;  %621 = vrot.lane.b32.xlu0 %v3409_v18, %s3229_s29  ;;  %463 = vst.msk [vmem:[#allocation2 + $0x91] sm:$0xff] %vm410_vm0, %v388_v13  ;;  %462 = vst.msk [vmem:[#allocation2 + $0x81] sm:$0xff] %vm410_vm0, %v387_v14  ;;  %v3424_v28 = vld [vmem:[#allocation2 + $0x21] sm:$0xff]  ;;  %v3426_v29 = vld [vmem:[#allocation2 + $0x49] sm:$0xff]  ;;  %v322_v30 = vmul.f32 %v3020_v22, %v3336_v1  ;;  %v3028_v31 = vunpack.c.h.bf16 %v3061_v9  ;;  %v3035_v32 = vunpack.c.l.bf16 %v3405_v16  ;;  %v3032_v33 = vunpack.c.h.bf16 %v3062_v10 }
  0x23   : > { %465 = vst.msk [vmem:[#allocation2 + $0xa9] sm:$0xff] %vm410_vm0, %v390_v15  ;;  %464 = vst.msk [vmem:[#allocation2 + $0x99] sm:$0xff] %vm410_vm0, %v389_v19  ;;  %v325_v34 = vmul.f32 %v3027_v25, %v3336_v1  ;;  %v324_v35 = vmul.f32 %v3024_v26, %v3336_v1  ;;  %v327_v36 = vmul.f32 %v3031_v27, %v3336_v1  ;;  %v3039_v37 = vunpack.c.l.bf16 %v3413_v23  ;;  %v3438_v38 = vld [vmem:[#allocation2 + $0x39] sm:$0xff]  ;;  %v3440_v39 = vld [vmem:[#allocation2 + $0x61] sm:$0xff] }
  0x24   : > { %467 = vst.msk [vmem:[#allocation2 + $0xc1] sm:$0xff] %vm410_vm0, %v392_v20  ;;  %466 = vst.msk [vmem:[#allocation2 + $0xb1] sm:$0xff] %vm410_vm0, %v391_v21  ;;  %v361_v40 = vadd.f32 %v3346_v12, %v322_v30  ;;  %v326_v41 = vmul.f32 %v3028_v31, %v3336_v1  ;;  %v329_v42 = vmul.f32 %v3035_v32, %v3336_v1  ;;  %v3448_v46 = vld [vmem:[#allocation2 + $0x18] sm:$0xff]  ;;  %v3036_v50 = vunpack.c.h.bf16 %v3405_v16  ;;  %v3460_v51 = vld [vmem:[#allocation2 + $0x30] sm:$0xff] }
  0x25   : > { %469 = vst.msk [vmem:[#allocation2 + $0xd9] sm:$0xff] %vm410_vm0, %v394_v24  ;;  %v328_v43 = vmul.f32 %v3032_v33, %v3336_v1  ;;  %v364_v47 = vadd.f32 %v3346_v12, %v325_v34  ;;  %v363_v48 = vadd.f32 %v3346_v12, %v324_v35  ;;  %v366_v49 = vadd.f32 %v3346_v12, %v327_v36  ;;  %v3462_v52 = vld [vmem:[#allocation2 + $0x20] sm:$0xff]  ;;  %v3464_v53 = vld [vmem:[#allocation2 + $0x48] sm:$0xff]  ;;  %v3475_v58 = vld [vmem:[#allocation2 + $0x38] sm:$0xff] }
  0x26   : > { %619 = vrot.lane.b32.xlu1 %v3424_v28, %s3229_s29  ;;  %625 = vrot.lane.b32.xlu0 %v3426_v29, %s3229_s29  ;;  %519 = vst.msk [vmem:[#allocation3 + $0x10] sm:$0xff] %vm410_vm0, %v3448_v46  ;;  %v393_v54 = vmax.f32 %v361_v40, 0.0  ;;  %v365_v55 = vadd.f32 %v3346_v12, %v326_v41  ;;  %v368_v56 = vadd.f32 %v3346_v12, %v329_v42  ;;  %521 = vst.msk [vmem:[#allocation3 + $0x20] sm:$0xff] %vm410_vm0, %v3460_v51  ;;  %v3477_v59 = vld [vmem:[#allocation2 + $0x60] sm:$0xff]  ;;  %v3479_v60 = vld [vmem:[#allocation2 + $0x50] sm:$0xff]  ;;  %vm2061_vm10 = vcmask 589312  }
  0x27   : > { %v367_v57 = vadd.f32 %v3346_v12, %v328_v43  ;;  %520 = vst.msk [vmem:[#allocation3 + $0x18] sm:$0xff] %vm410_vm0, %v3462_v52  ;;  %523 = vst.msk [vmem:[#allocation3 + $0x30] sm:$0xff] %vm410_vm0, %v3464_v53  ;;  %v396_v61 = vmax.f32 %v364_v47, 0.0  ;;  %v395_v62 = vmax.f32 %v363_v48, 0.0  ;;  %v398_v63 = vmax.f32 %v366_v49, 0.0  ;;  %v3488_v2 = vld [vmem:[#allocation2 + $0x78] sm:$0xff] }
  0x28   : > { %v331_v0 = vmul.f32 %v3039_v37, %v3336_v1  ;;  %522 = vst.msk [vmem:[#allocation3 + $0x28] sm:$0xff] %vm410_vm0, %v3475_v58  ;;  %525 = vst.msk [vmem:[#allocation3 + $0x40] sm:$0xff] %vm410_vm0, %v3477_v59  ;;  %v397_v3 = vmax.f32 %v365_v55, 0.0  ;;  %v400_v4 = vmax.f32 %v368_v56, 0.0  ;;  %v330_v6 = vmul.f32 %v3036_v50, %v3336_v1  ;;  %v3503_v11 = vld [vmem:[#allocation2 + $0x51] sm:$0xff]  ;;  %v559_v13 = vld [vmem:[#allocation2 + $0x79] sm:$0xff] }
  0x29   : > { %524 = vst.msk [vmem:[#allocation3 + $0x38] sm:$0xff] %vm410_vm0, %v3479_v60  ;;  %468 = vst.msk [vmem:[#allocation2 + $0xc9] sm:$0xff] %vm410_vm0, %v393_v54  ;;  %v399_v5 = vmax.f32 %v367_v57, 0.0  ;;  %v3043_v8 = vunpack.c.l.bf16 %v3065_v44  ;;  %v3040_v9 = vunpack.c.h.bf16 %v3413_v23  ;;  %v3047_v10 = vunpack.c.l.bf16 %v3066_v45  ;;  %v3512_v23 = vld [vmem:[#allocation2 + $0x69] sm:$0xff]  ;;  %v561_v27 = vld [vmem:[#allocation2 + $0x91] sm:$0xff] }
  0x2a   : > { %527 = vst.msk [vmem:[#allocation3 + $0x50] sm:$0xff] %vm410_vm0, %v3488_v2  ;;  %623 = vrot.lane.b32.xlu1 %v3438_v38, %s3229_s29  ;;  %629 = vrot.lane.b32.xlu0 %v3440_v39, %s3229_s29  ;;  %471 = vst.msk [vmem:[#allocation2 + $0xf1] sm:$0xff] %vm410_vm0, %v396_v61  ;;  %v370_v7 = vadd.f32 %v3346_v12, %v331_v0  ;;  %v369_v14 = vadd.f32 %v3346_v12, %v330_v6  ;;  %v3044_v15 = vunpack.c.h.bf16 %v3065_v44  ;;  %v3523_v33 = vld [vmem:[#allocation2 + $0x68] sm:$0xff]  ;;  %v3525_v34 = vld [vmem:[#allocation2 + $0x90] sm:$0xff]  ;;  %vm2135_vm11 = vcmask 588800  }
  0x2b   : > { %470 = vst.msk [vmem:[#allocation2 + $0xe1] sm:$0xff] %vm410_vm0, %v395_v62  ;;  %473 = vst.msk [vmem:[#allocation2 + $0x109] sm:$0xff] %vm410_vm0, %v398_v63  ;;  %v3048_v16 = vunpack.c.h.bf16 %v3066_v45  ;;  %v333_v20 = vmul.f32 %v3043_v8, %v3336_v1  ;;  %v332_v21 = vmul.f32 %v3040_v9, %v3336_v1  ;;  %v335_v22 = vmul.f32 %v3047_v10, %v3336_v1  ;;  %v3534_v36 = vld [vmem:[#allocation2 + $0x80] sm:$0xff]  ;;  %v3536_v37 = vld [vmem:[#allocation2 + $0xa8] sm:$0xff] }
  0x2c   : > { %472 = vst.msk [vmem:[#allocation2 + $0xf9] sm:$0xff] %vm410_vm0, %v397_v3  ;;  %475 = vst.msk [vmem:[#allocation2 + $0x121] sm:$0xff] %vm410_vm0, %v400_v4  ;;  %v402_v19 = vmax.f32 %v370_v7, 0.0  ;;  %v401_v24 = vmax.f32 %v369_v14, 0.0  ;;  %v334_v25 = vmul.f32 %v3044_v15, %v3336_v1  ;;  %v3538_v40 = vld [vmem:[#allocation2 + $0x98] sm:$0xff]  ;;  %v560_v45 = vld [vmem:[#allocation2 + $0x81] sm:$0xff] }
  0x2d   : > { %474 = vst.msk [vmem:[#allocation2 + $0x111] sm:$0xff] %vm410_vm0, %v399_v5  ;;  %v336_v26 = vmul.f32 %v3048_v16, %v3336_v1  ;;  %v372_v30 = vadd.f32 %v3346_v12, %v333_v20  ;;  %v371_v31 = vadd.f32 %v3346_v12, %v332_v21  ;;  %v374_v32 = vadd.f32 %v3346_v12, %v335_v22  ;;  %v563_v47 = vld [vmem:[#allocation2 + $0xa9] sm:$0xff]  ;;  %v3554_v48 = vld [vmem:[#allocation2 + $0xc0] sm:$0xff]  ;;  %v3564_v55 = vld [vmem:[#allocation2 + $0xd8] sm:$0xff] }
  0x2e   : > { %627 = vrot.lane.b32.xlu1 %v3503_v11, %s3229_s29  ;;  %633 = vrot.lane.b32.xlu0 %v559_v13, %s3229_s29  ;;  %477 = vst.msk [vmem:[#allocation2 + $0x139] sm:$0xff] %vm410_vm0, %v402_v19  ;;  %476 = vst.msk [vmem:[#allocation2 + $0x129] sm:$0xff] %vm410_vm0, %v401_v24  ;;  %v373_v1 = vadd.f32 %v3346_v12, %v334_v25  ;;  %v3556_v49 = vld [vmem:[#allocation2 + $0xb0] sm:$0xff]  ;;  %v562_v50 = vld [vmem:[#allocation2 + $0x99] sm:$0xff]  ;;  %vm2758_vm12 = vcmask 60416   ;;  %vm2627_vm13 = vcmask 1040384  }
  0x2f   : > { %v375_v35 = vadd.f32 %v3346_v12, %v336_v26  ;;  %526 = vst.msk [vmem:[#allocation3 + $0x48] sm:$0xff] %vm410_vm0, %v3523_v33  ;;  %529 = vst.msk [vmem:[#allocation3 + $0x60] sm:$0xff] %vm410_vm0, %v3525_v34  ;;  %v404_v41 = vmax.f32 %v372_v30, 0.0  ;;  %v403_v42 = vmax.f32 %v371_v31, 0.0  ;;  %v406_v43 = vmax.f32 %v374_v32, 0.0  ;;  %v565_v54 = vld [vmem:[#allocation2 + $0xc1] sm:$0xff] }
  0x30   : > { %528 = vst.msk [vmem:[#allocation3 + $0x58] sm:$0xff] %vm410_vm0, %v3534_v36  ;;  %531 = vst.msk [vmem:[#allocation3 + $0x70] sm:$0xff] %vm410_vm0, %v3536_v37  ;;  %v405_v12 = vmax.f32 %v373_v1, 0.0  ;;  %v3566_v56 = vld [vmem:[#allocation2 + $0xc8] sm:$0xff]  ;;  %v564_v62 = vld [vmem:[#allocation2 + $0xb1] sm:$0xff] }
  0x31   : > { %530 = vst.msk [vmem:[#allocation3 + $0x68] sm:$0xff] %vm410_vm0, %v3538_v40  ;;  %v407_v44 = vmax.f32 %v375_v35, 0.0  ;;  %479 = vst.msk [vmem:[#allocation2 + $0x151] sm:$0xff] %vm410_vm0, %v404_v41  ;;  %v3568_v57 = vld [vmem:[#allocation2 + $0xf0] sm:$0xff]  ;;  %v567_v63 = vld [vmem:[#allocation2 + $0xd9] sm:$0xff] }
  0x32   : > { %631 = vrot.lane.b32.xlu1 %v3512_v23, %s3229_s29  ;;  %637 = vrot.lane.b32.xlu0 %v561_v27, %s3229_s29  ;;  %478 = vst.msk [vmem:[#allocation2 + $0x141] sm:$0xff] %vm410_vm0, %v403_v42  ;;  %481 = vst.msk [vmem:[#allocation2 + $0x169] sm:$0xff] %vm410_vm0, %v406_v43  ;;  %v3576_v61 = vld [vmem:[#allocation2 + $0xe0] sm:$0xff]  ;;  %v3582_v0 = vld [vmem:[#allocation2 + $0x108] sm:$0xff] }
  0x33   : > { %480 = vst.msk [vmem:[#allocation2 + $0x159] sm:$0xff] %vm410_vm0, %v405_v12  ;;  %482 = vst.msk [vmem:[#allocation2 + $0x171] sm:$0xff] %vm410_vm0, %v407_v44  ;;  %v3586_v3 = vld [vmem:[#allocation2 + $0xf8] sm:$0xff]  ;;  %v3588_v4 = vld [vmem:[#allocation2 + $0x120] sm:$0xff] }
  0x34   : > { %533 = vst.msk [vmem:[#allocation3 + $0x80] sm:$0xff] %vm410_vm0, %v3554_v48  ;;  %532 = vst.msk [vmem:[#allocation3 + $0x78] sm:$0xff] %vm410_vm0, %v3556_v49  ;;  %v3596_v5 = vld [vmem:[#allocation2 + $0x110] sm:$0xff]  ;;  %v568_v10 = vld [vmem:[#allocation2 + $0xe1] sm:$0xff] }
  0x35   : > { %535 = vst.msk [vmem:[#allocation3 + $0x90] sm:$0xff] %vm410_vm0, %v3564_v55  ;;  %534 = vst.msk [vmem:[#allocation3 + $0x88] sm:$0xff] %vm410_vm0, %v3566_v56  ;;  %v566_v6 = vld [vmem:[#allocation2 + $0xc9] sm:$0xff]  ;;  %v569_v7 = vld [vmem:[#allocation2 + $0xf1] sm:$0xff] }
  0x36   : > { %635 = vrot.lane.b32.xlu1 %v560_v45, %s3229_s29  ;;  %641 = vrot.lane.b32.xlu0 %v563_v47, %s3229_s29  ;;  %537 = vst.msk [vmem:[#allocation3 + $0xa0] sm:$0xff] %vm410_vm0, %v3568_v57  ;;  %536 = vst.msk [vmem:[#allocation3 + $0x98] sm:$0xff] %vm410_vm0, %v3576_v61  ;;  %v511_v8 = vld [vmem:[#allocation2 + $0x138] sm:$0xff]  ;;  %v3603_v9 = vld [vmem:[#allocation2 + $0x128] sm:$0xff] }
  0x37   : > { %539 = vst.msk [vmem:[#allocation3 + $0xb0] sm:$0xff] %vm410_vm0, %v3582_v0  ;;  %538 = vst.msk [vmem:[#allocation3 + $0xa8] sm:$0xff] %vm410_vm0, %v3586_v3  ;;  %v571_v13 = vld [vmem:[#allocation2 + $0x109] sm:$0xff]  ;;  %v570_v16 = vld [vmem:[#allocation2 + $0xf9] sm:$0xff] }
  0x38   : > { %541 = vst.msk [vmem:[#allocation3 + $0xc0] sm:$0xff] %vm410_vm0, %v3588_v4  ;;  %540 = vst.msk [vmem:[#allocation3 + $0xb8] sm:$0xff] %vm410_vm0, %v3596_v5  ;;  %v513_v14 = vld [vmem:[#allocation2 + $0x150] sm:$0xff]  ;;  %v573_v19 = vld [vmem:[#allocation2 + $0x121] sm:$0xff] }
  0x39   : > { %543 = vst.msk [vmem:[#allocation3 + $0xd0] sm:$0xff] %vm410_vm0, %v511_v8  ;;  %542 = vst.msk [vmem:[#allocation3 + $0xc8] sm:$0xff] %vm410_vm0, %v3603_v9  ;;  %v512_v15 = vld [vmem:[#allocation2 + $0x140] sm:$0xff]  ;;  %v515_v20 = vld [vmem:[#allocation2 + $0x168] sm:$0xff] }
  0x3a   : > { %639 = vrot.lane.b32.xlu1 %v562_v50, %s3229_s29  ;;  %645 = vrot.lane.b32.xlu0 %v565_v54, %s3229_s29  ;;  %545 = vst.msk [vmem:[#allocation3 + $0xe0] sm:$0xff] %vm410_vm0, %v513_v14  ;;  %544 = vst.msk [vmem:[#allocation3 + $0xd8] sm:$0xff] %vm410_vm0, %v512_v15  ;;  %v514_v21 = vld [vmem:[#allocation2 + $0x158] sm:$0xff]  ;;  %v516_v25 = vld [vmem:[#allocation2 + $0x170] sm:$0xff] }
  0x3b   : > { %547 = vst.msk [vmem:[#allocation3 + $0xf0] sm:$0xff] %vm410_vm0, %v515_v20  ;;  %v572_v22 = vld [vmem:[#allocation2 + $0x111] sm:$0xff]  ;;  %v575_v24 = vld [vmem:[#allocation2 + $0x139] sm:$0xff]  ;;  %546 = vst.msk [vmem:[#allocation3 + $0xe8] sm:$0xff] %vm410_vm0, %v514_v21 }
  0x3c   : > { %v574_v26 = vld [vmem:[#allocation2 + $0x129] sm:$0xff]  ;;  %v577_v27 = vld [vmem:[#allocation2 + $0x151] sm:$0xff]  ;;  %548 = vst.msk [vmem:[#allocation3 + $0xf8] sm:$0xff] %vm410_vm0, %v516_v25  ;;  %v576_v30 = vld [vmem:[#allocation2 + $0x141] sm:$0xff] }
  0x3d   : > { %v579_v31 = vld [vmem:[#allocation2 + $0x169] sm:$0xff]  ;;  %v578_v32 = vld [vmem:[#allocation2 + $0x159] sm:$0xff]  ;;  %v580_v35 = vld [vmem:[#allocation2 + $0x171] sm:$0xff] }
  0x3e   : > { %643 = vrot.lane.b32.xlu1 %v564_v62, %s3229_s29  ;;  %649 = vrot.lane.b32.xlu0 %v567_v63, %s3229_s29  ;;  %v742_v1 = vld [vmem:[#allocation2 + $0x2] sm:$0xff]  ;;  %v3624_v41 = vld [vmem:[#allocation2 + $0x1a] sm:$0xff]  ;;  %v743_v42 = vld [vmem:[#allocation2 + $0xa] sm:$0xff] }
  0x3f   : > { %v3629_v43 = vld [vmem:[#allocation2 + $0x32] sm:$0xff]  ;;  %v3634_v12 = vld [vmem:[#allocation2 + $0x22] sm:$0xff]  ;;  %v3636_v44 = vld [vmem:[#allocation2 + $0x4a] sm:$0xff] }
  0x40   : > { %v3642_v45 = vld [vmem:[#allocation2 + $0x3a] sm:$0xff]  ;;  %v3644_v47 = vld [vmem:[#allocation2 + $0x62] sm:$0xff]  ;;  %v3650_v50 = vld [vmem:[#allocation2 + $0x52] sm:$0xff] }
  0x41   : > { %v3652_v54 = vld [vmem:[#allocation2 + $0x7a] sm:$0xff]  ;;  %v3658_v62 = vld [vmem:[#allocation2 + $0x6a] sm:$0xff]  ;;  %v3660_v63 = vld [vmem:[#allocation2 + $0x92] sm:$0xff] }
  0x42   : > { %647 = vrot.lane.b32.xlu1 %v566_v6, %s3229_s29  ;;  %653 = vrot.lane.b32.xlu0 %v569_v7, %s3229_s29  ;;  %v3666_v6 = vld [vmem:[#allocation2 + $0x82] sm:$0xff]  ;;  %v3668_v7 = vld [vmem:[#allocation2 + $0xaa] sm:$0xff]  ;;  %v3674_v8 = vld [vmem:[#allocation2 + $0x9a] sm:$0xff] }
  0x43   : > { %v760_v14 = vld [vmem:[#allocation2 + $0xda] sm:$0xff]  ;;  %v3687_v15 = vld [vmem:[#allocation2 + $0xca] sm:$0xff] }
  0x44   : > { %v764_v20 = vld [vmem:[#allocation2 + $0x10a] sm:$0xff] }
  0x46   : > { %651 = vrot.lane.b32.xlu1 %v568_v10, %s3229_s29  ;;  %657 = vrot.lane.b32.xlu0 %v571_v13, %s3229_s29  ;;  %v3676_v10 = vld [vmem:[#allocation2 + $0xc2] sm:$0xff]  ;;  %v3682_v13 = vld [vmem:[#allocation2 + $0xb2] sm:$0xff] }
  0x4a   : > { %655 = vrot.lane.b32.xlu1 %v570_v16, %s3229_s29  ;;  %661 = vrot.lane.b32.xlu0 %v573_v19, %s3229_s29  ;;  %v762_v16 = vld [vmem:[#allocation2 + $0xf2] sm:$0xff]  ;;  %v761_v19 = vld [vmem:[#allocation2 + $0xe2] sm:$0xff] }
  0x4e   : > { %659 = vrot.lane.b32.xlu1 %v572_v22, %s3229_s29  ;;  %665 = vrot.lane.b32.xlu0 %v575_v24, %s3229_s29  ;;  %v763_v22 = vld [vmem:[#allocation2 + $0xfa] sm:$0xff]  ;;  %v766_v24 = vld [vmem:[#allocation2 + $0x122] sm:$0xff] }
  0x52   : > { %663 = vrot.lane.b32.xlu1 %v574_v26, %s3229_s29  ;;  %669 = vrot.lane.b32.xlu0 %v577_v27, %s3229_s29  ;;  %v765_v26 = vld [vmem:[#allocation2 + $0x112] sm:$0xff]  ;;  %v768_v27 = vld [vmem:[#allocation2 + $0x13a] sm:$0xff] }
  0x56   : > { %667 = vrot.lane.b32.xlu1 %v576_v30, %s3229_s29  ;;  %673 = vrot.lane.b32.xlu0 %v579_v31, %s3229_s29  ;;  %v767_v30 = vld [vmem:[#allocation2 + $0x12a] sm:$0xff]  ;;  %v770_v31 = vld [vmem:[#allocation2 + $0x152] sm:$0xff] }
  0x5a   : > { %671 = vrot.lane.b32.xlu1 %v578_v32, %s3229_s29  ;;  %806 = vrot.lane.b32.xlu0 %v742_v1, %s3230_s30  ;;  %v769_v32 = vld [vmem:[#allocation2 + $0x142] sm:$0xff]  ;;  %v772_v1 = vld [vmem:[#allocation2 + $0x16a] sm:$0xff] }
  0x5e   : > { %675 = vrot.lane.b32.xlu1 %v580_v35, %s3229_s29  ;;  %810 = vrot.lane.b32.xlu0 %v3624_v41, %s3230_s30 }
  0x62   : > { %808 = vrot.lane.b32.xlu1 %v743_v42, %s3230_s30  ;;  %814 = vrot.lane.b32.xlu0 %v3629_v43, %s3230_s30 }
  0x66   : > { %812 = vrot.lane.b32.xlu1 %v3634_v12, %s3230_s30  ;;  %818 = vrot.lane.b32.xlu0 %v3636_v44, %s3230_s30 }
  0x6a   : > { %816 = vrot.lane.b32.xlu1 %v3642_v45, %s3230_s30  ;;  %822 = vrot.lane.b32.xlu0 %v3644_v47, %s3230_s30 }
  0x6e   : > { %820 = vrot.lane.b32.xlu1 %v3650_v50, %s3230_s30  ;;  %826 = vrot.lane.b32.xlu0 %v3652_v54, %s3230_s30 }
  0x72   : > { %824 = vrot.lane.b32.xlu1 %v3658_v62, %s3230_s30  ;;  %830 = vrot.lane.b32.xlu0 %v3660_v63, %s3230_s30 }
  0x76   : > { %828 = vrot.lane.b32.xlu1 %v3666_v6, %s3230_s30  ;;  %834 = vrot.lane.b32.xlu0 %v3668_v7, %s3230_s30 }
  0x7a   : > { %832 = vrot.lane.b32.xlu1 %v3674_v8, %s3230_s30  ;;  %838 = vrot.lane.b32.xlu0 %v3676_v10, %s3230_s30 }
  0x7e   : > { %836 = vrot.lane.b32.xlu1 %v3682_v13, %s3230_s30  ;;  %842 = vrot.lane.b32.xlu0 %v760_v14, %s3230_s30  ;;  %v771_v14 = vld [vmem:[#allocation2 + $0x15a] sm:$0xff] }
  0x80   : > { %v614_v21 = vpop.permute.xlu0 %613 }
  0x81   : > { %710 = vst.msk [vmem:[#allocation3] sm:$0xff] %vm709_vm3, %v614_v21 }
  0x82   : > { %840 = vrot.lane.b32.xlu1 %v3687_v15, %s3230_s30  ;;  %846 = vrot.lane.b32.xlu0 %v762_v16, %s3230_s30 }
  0x84   : > { %v616_v25 = vpop.permute.xlu0 %615 }
  0x85   : > { %711 = vst.msk [vmem:[#allocation3 + $0x8] sm:$0xff] %vm709_vm3, %v616_v25 }
  0x86   : > { %844 = vrot.lane.b32.xlu1 %v761_v19, %s3230_s30  ;;  %850 = vrot.lane.b32.xlu0 %v764_v20, %s3230_s30  ;;  %v773_v20 = vld [vmem:[#allocation2 + $0x172] sm:$0xff] }
  0x8a   : > { %848 = vrot.lane.b32.xlu1 %v763_v22, %s3230_s30  ;;  %854 = vrot.lane.b32.xlu0 %v766_v24, %s3230_s30 }
  0x8e   : > { %852 = vrot.lane.b32.xlu1 %v765_v26, %s3230_s30  ;;  %858 = vrot.lane.b32.xlu0 %v768_v27, %s3230_s30 }
  0x92   : > { %856 = vrot.lane.b32.xlu1 %v767_v30, %s3230_s30  ;;  %862 = vrot.lane.b32.xlu0 %v770_v31, %s3230_s30 }
  0x94   : > { %v618_v35 = vpop.permute.xlu1 %617  ;;  %v622_v42 = vpop.permute.xlu0 %621 }
  0x95   : > { %712 = vst.msk [vmem:[#allocation3 + $0x10] sm:$0xff] %vm709_vm3, %v618_v35  ;;  %714 = vst.msk [vmem:[#allocation3 + $0x20] sm:$0xff] %vm709_vm3, %v622_v42  ;;  %v2126_v35 = vld [vmem:[%s4454_s3] sm:$0xff] }
  0x96   : > { %860 = vrot.lane.b32.xlu1 %v769_v32, %s3230_s30  ;;  %866 = vrot.lane.b32.xlu0 %v772_v1, %s3230_s30 }
  0x98   : > { %v620_v16 = vpop.permute.xlu1 %619  ;;  %v626_v19 = vpop.permute.xlu0 %625 }
  0x99   : > { %713 = vst.msk [vmem:[#allocation3 + $0x18] sm:$0xff] %vm709_vm3, %v620_v16  ;;  %716 = vst.msk [vmem:[#allocation3 + $0x30] sm:$0xff] %vm709_vm3, %v626_v19  ;;  %v2129_v19 = vld [vmem:[%s4454_s3 + $0x18] sm:$0xff] }
  0x9a   : > { %864 = vrot.lane.b32.xlu1 %v771_v14, %s3230_s30  ;;  %999 = vrot.lane.b32.xlu0 %v3448_v46, %s3231_s6 }
  0x9c   : > { %v624_v21 = vpop.permute.xlu1 %623  ;;  %v630_v22 = vpop.permute.xlu0 %629 }
  0x9d   : > { %715 = vst.msk [vmem:[#allocation3 + $0x28] sm:$0xff] %vm709_vm3, %v624_v21  ;;  %718 = vst.msk [vmem:[#allocation3 + $0x40] sm:$0xff] %vm709_vm3, %v630_v22 }
  0x9e   : > { %868 = vrot.lane.b32.xlu1 %v773_v20, %s3230_s30  ;;  %1003 = vrot.lane.b32.xlu0 %v3460_v51, %s3231_s6 }
  0xa0   : > { %v628_v24 = vpop.permute.xlu1 %627  ;;  %v634_v25 = vpop.permute.xlu0 %633 }
  0xa1   : > { %717 = vst.msk [vmem:[#allocation3 + $0x38] sm:$0xff] %vm709_vm3, %v628_v24  ;;  %720 = vst.msk [vmem:[#allocation3 + $0x50] sm:$0xff] %vm709_vm3, %v634_v25 }
  0xa2   : > { %1001 = vrot.lane.b32.xlu1 %v3462_v52, %s3231_s6  ;;  %1007 = vrot.lane.b32.xlu0 %v3464_v53, %s3231_s6 }
  0xa4   : > { %v632_v46 = vpop.permute.xlu1 %631  ;;  %v638_v26 = vpop.permute.xlu0 %637 }
  0xa5   : > { %719 = vst.msk [vmem:[#allocation3 + $0x48] sm:$0xff] %vm709_vm3, %v632_v46  ;;  %722 = vst.msk [vmem:[#allocation3 + $0x60] sm:$0xff] %vm709_vm3, %v638_v26  ;;  %v2133_v26 = vld [vmem:[%s4454_s3 + $0x38] sm:$0xff] }
  0xa6   : > { %1005 = vrot.lane.b32.xlu1 %v3475_v58, %s3231_s6  ;;  %1011 = vrot.lane.b32.xlu0 %v3477_v59, %s3231_s6 }
  0xa8   : > { %v636_v27 = vpop.permute.xlu1 %635  ;;  %v642_v30 = vpop.permute.xlu0 %641 }
  0xa9   : > { %721 = vst.msk [vmem:[#allocation3 + $0x58] sm:$0xff] %vm709_vm3, %v636_v27  ;;  %724 = vst.msk [vmem:[#allocation3 + $0x70] sm:$0xff] %vm709_vm3, %v642_v30 }
  0xaa   : > { %1009 = vrot.lane.b32.xlu1 %v3479_v60, %s3231_s6  ;;  %1015 = vrot.lane.b32.xlu0 %v3488_v2, %s3231_s6 }
  0xac   : > { %v640_v52 = vpop.permute.xlu1 %639  ;;  %v646_v31 = vpop.permute.xlu0 %645 }
  0xad   : > { %723 = vst.msk [vmem:[#allocation3 + $0x68] sm:$0xff] %vm709_vm3, %v640_v52  ;;  %726 = vst.msk [vmem:[#allocation3 + $0x80] sm:$0xff] %vm709_vm3, %v646_v31 }
  0xae   : > { %1013 = vrot.lane.b32.xlu1 %v3523_v33, %s3231_s6  ;;  %1192 = vrot.lane.b32.xlu0 %v3407_v17, %s3232_s7  ;;  %v2127_v17 = vld [vmem:[%s4454_s3 + $0x8] sm:$0xff] }
  0xaf   : > { %v3175_v42 = vpack.c.bf16 %v2127_v17, %v2126_v35 }
  0xb0   : > { %v644_v32 = vpop.permute.xlu1 %643  ;;  %v650_v1 = vpop.permute.xlu0 %649 }
  0xb1   : > { %725 = vst.msk [vmem:[#allocation3 + $0x78] sm:$0xff] %vm709_vm3, %v644_v32  ;;  %728 = vst.msk [vmem:[#allocation3 + $0x90] sm:$0xff] %vm709_vm3, %v650_v1  ;;  %3176 = vmatprep.subr.bf16.mxu0 %v3175_v42  ;;  %3191 = vmatprep.subr.bf16.mxu1 %v3175_v42  ;;  %v2134_v32 = vld [vmem:[%s4454_s3 + $0x40] sm:$0xff] }
  0xb2   : > { %1017 = vrot.lane.b32.xlu1 %v3534_v36, %s3231_s6  ;;  %1385 = vrot.lane.b32.xlu0 %v3624_v41, %s3233_s8  ;;  %v2128_v41 = vld [vmem:[%s4454_s3 + $0x10] sm:$0xff] }
  0xb3   : > { %3178 = vmatpush3.bf16.msra.mxu0 %v3175_v42  ;;  %v3179_v20 = vpack.c.bf16 %v2129_v19, %v2128_v41  ;;  %3196 = vmatpush3.bf16.msra.mxu1 %v3175_v42 }
  0xb4   : > { %v648_v14 = vpop.permute.xlu1 %647  ;;  %v654_v16 = vpop.permute.xlu0 %653 }
  0xb5   : > { %727 = vst.msk [vmem:[#allocation3 + $0x88] sm:$0xff] %vm709_vm3, %v648_v14  ;;  %730 = vst.msk [vmem:[#allocation3 + $0xa0] sm:$0xff] %vm709_vm3, %v654_v16  ;;  %3180 = vmatprep.subr.bf16.mxu0 %v3179_v20  ;;  %3192 = vmatprep.subr.bf16.mxu1 %v3179_v20 }
  0xb6   : > { %1194 = vrot.lane.b32.xlu1 %v3424_v28, %s3232_s7  ;;  %1579 = vrot.lane.b32.xlu0 %v3460_v51, %s3234_s13  ;;  %v2130_v28 = vld [vmem:[%s4454_s3 + $0x20] sm:$0xff]  ;;  %v2131_v51 = vld [vmem:[%s4454_s3 + $0x28] sm:$0xff] }
  0xb7   : > { %3182 = vmatpush3.bf16.msra.mxu0 %v3179_v20  ;;  %v3183_v24 = vpack.c.bf16 %v2131_v51, %v2130_v28  ;;  %3197 = vmatpush3.bf16.msra.mxu1 %v3179_v20  ;;  %v1715_v51 = vld [vmem:[#allocation2 + $0x81] sm:$0xff] }
  0xb8   : > { %v652_v21 = vpop.permute.xlu1 %651  ;;  %v658_v22 = vpop.permute.xlu0 %657 }
  0xb9   : > { %729 = vst.msk [vmem:[#allocation3 + $0x98] sm:$0xff] %vm709_vm3, %v652_v21  ;;  %732 = vst.msk [vmem:[#allocation3 + $0xb0] sm:$0xff] %vm709_vm3, %v658_v22  ;;  %3184 = vmatprep.subr.bf16.mxu0 %v3183_v24  ;;  %3193 = vmatprep.subr.bf16.mxu1 %v3183_v24 }
  0xba   : > { %1387 = vrot.lane.b32.xlu1 %v3634_v12, %s3233_s8  ;;  %1772 = vrot.lane.b32.xlu0 %v3409_v18, %s3235_s20  ;;  %v2132_v12 = vld [vmem:[%s4454_s3 + $0x30] sm:$0xff] }
  0xbb   : > { %3186 = vmatpush3.bf16.msra.mxu0 %v3183_v24  ;;  %v3187_v27 = vpack.c.bf16 %v2133_v26, %v2132_v12  ;;  %3198 = vmatpush3.bf16.msra.mxu1 %v3183_v24 }
  0xbc   : > { %v656_v25 = vpop.permute.xlu1 %655  ;;  %v662_v46 = vpop.permute.xlu0 %661 }
  0xbd   : > { %731 = vst.msk [vmem:[#allocation3 + $0xa8] sm:$0xff] %vm709_vm3, %v656_v25  ;;  %734 = vst.msk [vmem:[#allocation3 + $0xc0] sm:$0xff] %vm709_vm3, %v662_v46  ;;  %3188 = vmatprep.subr.bf16.mxu0 %v3187_v27  ;;  %3194 = vmatprep.subr.bf16.mxu1 %v3187_v27 }
  0xbe   : > { %1581 = vrot.lane.b32.xlu1 %v3475_v58, %s3234_s13  ;;  %1774 = vrot.lane.b32.xlu0 %v3438_v38, %s3235_s20 }
  0xbf   : > { %3190 = vmatpush3.bf16.msra.mxu0 %v3187_v27  ;;  %3199 = vmatpush3.bf16.msra.mxu1 %v3187_v27 }
  0xc0   : > { %v660_v30 = vpop.permute.xlu1 %659  ;;  %v666_v52 = vpop.permute.xlu0 %665  ;;  %3125 = vmatprep.subr.mxu0 %v2134_v32  ;;  %3195 = vmatprep.subr.mxu1 %v2134_v32 }
  0xc1   : > { %733 = vst.msk [vmem:[#allocation3 + $0xb8] sm:$0xff] %vm709_vm3, %v660_v30  ;;  %736 = vst.msk [vmem:[#allocation3 + $0xd0] sm:$0xff] %vm709_vm3, %v666_v52 }
  0xc2   : > { %1196 = vrot.lane.b32.xlu1 %v3409_v18, %s3232_s7  ;;  %1198 = vrot.lane.b32.xlu0 %v3438_v38, %s3232_s7 }
  0xc3   : > { %3126 = vmatpush3.msra.mxu0 %v2134_v32  ;;  %3200 = vmatpush3.msra.mxu1 %v2134_v32 }
  0xc4   : > { %v664_v58 = vpop.permute.xlu1 %663  ;;  %v670_v31 = vpop.permute.xlu0 %669 }
  0xc5   : > { %735 = vst.msk [vmem:[#allocation3 + $0xc8] sm:$0xff] %vm709_vm3, %v664_v58  ;;  %738 = vst.msk [vmem:[#allocation3 + $0xe0] sm:$0xff] %vm709_vm3, %v670_v31  ;;  %v1717_v58 = vld [vmem:[#allocation2 + $0x99] sm:$0xff] }
  0xc6   : > { %1965 = vrot.lane.b32.xlu1 %v3629_v43, %s3236_s11  ;;  %1967 = vrot.lane.b32.xlu0 %v3642_v45, %s3236_s11 }
  0xc8   : > { %v668_v18 = vpop.permute.xlu1 %667  ;;  %v674_v38 = vpop.permute.xlu0 %673 }
  0xc9   : > { %737 = vst.msk [vmem:[#allocation3 + $0xd8] sm:$0xff] %vm709_vm3, %v668_v18  ;;  %740 = vst.msk [vmem:[#allocation3 + $0xf0] sm:$0xff] %vm709_vm3, %v674_v38 }
  0xca   : > { %1389 = vrot.lane.b32.xlu1 %v3629_v43, %s3233_s8  ;;  %1583 = vrot.lane.b32.xlu0 %v3464_v53, %s3234_s13 }
  0xcc   : > { %v672_v1 = vpop.permute.xlu1 %671  ;;  %v807_v35 = vpop.permute.xlu0 %806 }
  0xcd   : > { %739 = vst.msk [vmem:[#allocation3 + $0xe8] sm:$0xff] %vm709_vm3, %v672_v1 }
  0xce   : > { %903 = vst.msk [vmem:[#allocation3] sm:$0xff] %vm902_vm4, %v807_v35  ;;  %1391 = vrot.lane.b32.xlu1 %v3642_v45, %s3233_s8  ;;  %1776 = vrot.lane.b32.xlu0 %v3426_v29, %s3235_s20 }
  0xd0   : > { %v676_v17 = vpop.permute.xlu1 %675  ;;  %v811_v42 = vpop.permute.xlu0 %810 }
  0xd1   : > { %741 = vst.msk [vmem:[#allocation3 + $0xf8] sm:$0xff] %vm709_vm3, %v676_v17 }
  0xd2   : > { %905 = vst.msk [vmem:[#allocation3 + $0x10] sm:$0xff] %vm902_vm4, %v811_v42  ;;  %1585 = vrot.lane.b32.xlu1 %v3479_v60, %s3234_s13  ;;  %1778 = vrot.lane.b32.xlu0 %v3503_v11, %s3235_s20 }
  0xd4   : > { %v809_v53 = vpop.permute.xlu1 %808  ;;  %v815_v43 = vpop.permute.xlu0 %814 }
  0xd5   : > { %904 = vst.msk [vmem:[#allocation3 + $0x8] sm:$0xff] %vm902_vm4, %v809_v53  ;;  %907 = vst.msk [vmem:[#allocation3 + $0x20] sm:$0xff] %vm902_vm4, %v815_v43  ;;  %v1719_v43 = vld [vmem:[#allocation2 + $0xb1] sm:$0xff] }
  0xd6   : > { %1200 = vrot.lane.b32.xlu1 %v3426_v29, %s3232_s7  ;;  %1202 = vrot.lane.b32.xlu0 %v3503_v11, %s3232_s7 }
  0xd8   : > { %v813_v45 = vpop.permute.xlu1 %812  ;;  %v819_v14 = vpop.permute.xlu0 %818 }
  0xd9   : > { %906 = vst.msk [vmem:[#allocation3 + $0x18] sm:$0xff] %vm902_vm4, %v813_v45  ;;  %909 = vst.msk [vmem:[#allocation3 + $0x30] sm:$0xff] %vm902_vm4, %v819_v14 }
  0xda   : > { %1969 = vrot.lane.b32.xlu1 %v3636_v44, %s3236_s11  ;;  %1971 = vrot.lane.b32.xlu0 %v3650_v50, %s3236_s11 }
  0xdc   : > { %v817_v60 = vpop.permute.xlu1 %816  ;;  %v823_v16 = vpop.permute.xlu0 %822 }
  0xdd   : > { %908 = vst.msk [vmem:[#allocation3 + $0x28] sm:$0xff] %vm902_vm4, %v817_v60  ;;  %911 = vst.msk [vmem:[#allocation3 + $0x40] sm:$0xff] %vm902_vm4, %v823_v16 }
  0xde   : > { %1393 = vrot.lane.b32.xlu1 %v3636_v44, %s3233_s8  ;;  %1587 = vrot.lane.b32.xlu0 %v3477_v59, %s3234_s13  ;;  %v1134_v59 = vld [vmem:[#allocation2 + $0x61] sm:$0xff] }
  0xe0   : > { %v821_v29 = vpop.permute.xlu1 %820  ;;  %v827_v11 = vpop.permute.xlu0 %826 }
  0xe1   : > { %910 = vst.msk [vmem:[#allocation3 + $0x38] sm:$0xff] %vm902_vm4, %v821_v29  ;;  %913 = vst.msk [vmem:[#allocation3 + $0x50] sm:$0xff] %vm902_vm4, %v827_v11 }
  0xe2   : > { %1395 = vrot.lane.b32.xlu1 %v3650_v50, %s3233_s8  ;;  %1780 = vrot.lane.b32.xlu0 %v3440_v39, %s3235_s20 }
  0xe4   : > { %v825_v41 = vpop.permute.xlu1 %824  ;;  %v831_v19 = vpop.permute.xlu0 %830 }
  0xe5   : > { %912 = vst.msk [vmem:[#allocation3 + $0x48] sm:$0xff] %vm902_vm4, %v825_v41  ;;  %915 = vst.msk [vmem:[#allocation3 + $0x60] sm:$0xff] %vm902_vm4, %v831_v19 }
  0xe6   : > { %1589 = vrot.lane.b32.xlu1 %v3523_v33, %s3234_s13  ;;  %1782 = vrot.lane.b32.xlu0 %v3512_v23, %s3235_s20 }
  0xe8   : > { %v829_v44 = vpop.permute.xlu1 %828  ;;  %v835_v20 = vpop.permute.xlu0 %834 }
  0xe9   : > { %914 = vst.msk [vmem:[#allocation3 + $0x58] sm:$0xff] %vm902_vm4, %v829_v44  ;;  %917 = vst.msk [vmem:[#allocation3 + $0x70] sm:$0xff] %vm902_vm4, %v835_v20  ;;  %v1721_v44 = vld [vmem:[#allocation2 + $0xc9] sm:$0xff] }
  0xea   : > { %1204 = vrot.lane.b32.xlu1 %v1134_v59, %s3232_s7  ;;  %1206 = vrot.lane.b32.xlu0 %v3512_v23, %s3232_s7  ;;  %v1714_v23 = vld [vmem:[#allocation2 + $0x79] sm:$0xff] }
  0xec   : > { %v833_v39 = vpop.permute.xlu1 %832  ;;  %v839_v50 = vpop.permute.xlu0 %838 }
  0xed   : > { %916 = vst.msk [vmem:[#allocation3 + $0x68] sm:$0xff] %vm902_vm4, %v833_v39  ;;  %919 = vst.msk [vmem:[#allocation3 + $0x80] sm:$0xff] %vm902_vm4, %v839_v50 }
  0xee   : > { %1973 = vrot.lane.b32.xlu1 %v3644_v47, %s3236_s11  ;;  %1975 = vrot.lane.b32.xlu0 %v3658_v62, %s3236_s11 }
  0xf0   : > { %v837_v33 = vpop.permute.xlu1 %836  ;;  %v843_v21 = vpop.permute.xlu0 %842 }
  0xf1   : > { %918 = vst.msk [vmem:[#allocation3 + $0x78] sm:$0xff] %vm902_vm4, %v837_v33  ;;  %921 = vst.msk [vmem:[#allocation3 + $0x90] sm:$0xff] %vm902_vm4, %v843_v21 }
  0xf2   : > { %1397 = vrot.lane.b32.xlu1 %v3644_v47, %s3233_s8  ;;  %1591 = vrot.lane.b32.xlu0 %v3488_v2, %s3234_s13 }
  0xf4   : > { %v841_v22 = vpop.permute.xlu1 %840  ;;  %v847_v28 = vpop.permute.xlu0 %846 }
  0xf5   : > { %920 = vst.msk [vmem:[#allocation3 + $0x88] sm:$0xff] %vm902_vm4, %v841_v22  ;;  %923 = vst.msk [vmem:[#allocation3 + $0xa0] sm:$0xff] %vm902_vm4, %v847_v28 }
  0xf6   : > { %1399 = vrot.lane.b32.xlu1 %v3658_v62, %s3233_s8  ;;  %1784 = vrot.lane.b32.xlu0 %v1714_v23, %s3235_s20 }
  0xf8   : > { %v845_v24 = vpop.permute.xlu1 %844  ;;  %v851_v25 = vpop.permute.xlu0 %850 }
  0xf9   : > { %922 = vst.msk [vmem:[#allocation3 + $0x98] sm:$0xff] %vm902_vm4, %v845_v24  ;;  %925 = vst.msk [vmem:[#allocation3 + $0xb0] sm:$0xff] %vm902_vm4, %v851_v25 }
  0xfa   : > { %1593 = vrot.lane.b32.xlu1 %v3534_v36, %s3234_s13  ;;  %1786 = vrot.lane.b32.xlu0 %v1715_v51, %s3235_s20 }
  0xfc   : > { %v849_v2 = vpop.permute.xlu1 %848  ;;  %v855_v47 = vpop.permute.xlu0 %854 }
  0xfd   : > { %924 = vst.msk [vmem:[#allocation3 + $0xa8] sm:$0xff] %vm902_vm4, %v849_v2  ;;  %927 = vst.msk [vmem:[#allocation3 + $0xc0] sm:$0xff] %vm902_vm4, %v855_v47 }
  0xfe   : > { %1208 = vrot.lane.b32.xlu1 %v1714_v23, %s3232_s7  ;;  %1210 = vrot.lane.b32.xlu0 %v1715_v51, %s3232_s7 }
 0x100   : > { %v853_v62 = vpop.permute.xlu1 %852  ;;  %v859_v46 = vpop.permute.xlu0 %858 }
 0x101   : > { %926 = vst.msk [vmem:[#allocation3 + $0xb8] sm:$0xff] %vm902_vm4, %v853_v62  ;;  %929 = vst.msk [vmem:[#allocation3 + $0xd0] sm:$0xff] %vm902_vm4, %v859_v46  ;;  %v1723_v46 = vld [vmem:[#allocation2 + $0xe1] sm:$0xff] }
 0x102   : > { %1977 = vrot.lane.b32.xlu1 %v3652_v54, %s3236_s11  ;;  %1979 = vrot.lane.b32.xlu0 %v3666_v6, %s3236_s11 }
 0x104   : > { %v857_v36 = vpop.permute.xlu1 %856  ;;  %v863_v12 = vpop.permute.xlu0 %862 }
 0x105   : > { %928 = vst.msk [vmem:[#allocation3 + $0xc8] sm:$0xff] %vm902_vm4, %v857_v36  ;;  %931 = vst.msk [vmem:[#allocation3 + $0xe0] sm:$0xff] %vm902_vm4, %v863_v12 }
 0x106   : > { %1401 = vrot.lane.b32.xlu1 %v3652_v54, %s3233_s8  ;;  %1595 = vrot.lane.b32.xlu0 %v3525_v34, %s3234_s13  ;;  %v1716_v54 = vld [vmem:[#allocation2 + $0x91] sm:$0xff] }
 0x108   : > { %v861_v26 = vpop.permute.xlu1 %860  ;;  %v867_v27 = vpop.permute.xlu0 %866 }
 0x109   : > { %930 = vst.msk [vmem:[#allocation3 + $0xd8] sm:$0xff] %vm902_vm4, %v861_v26  ;;  %933 = vst.msk [vmem:[#allocation3 + $0xf0] sm:$0xff] %vm902_vm4, %v867_v27  ;;  %v1916_v27 = vld [vmem:[#allocation2 + $0xe2] sm:$0xff] }
 0x10a   : > { %1403 = vrot.lane.b32.xlu1 %v3666_v6, %s3233_s8  ;;  %1597 = vrot.lane.b32.xlu0 %v3538_v40, %s3234_s13 }
 0x10c   : > { %v865_v30 = vpop.permute.xlu1 %864  ;;  %v1000_v52 = vpop.permute.xlu0 %999 }
 0x10d   : > { %932 = vst.msk [vmem:[#allocation3 + $0xe8] sm:$0xff] %vm902_vm4, %v865_v30 }
 0x10e   : > { %1096 = vst.msk [vmem:[#allocation3] sm:$0xff] %vm1095_vm5, %v1000_v52  ;;  %1019 = vrot.lane.b32.xlu1 %v3525_v34, %s3231_s6  ;;  %1021 = vrot.lane.b32.xlu0 %v3538_v40, %s3231_s6 }
 0x110   : > { %v869_v31 = vpop.permute.xlu1 %868  ;;  %v1004_v6 = vpop.permute.xlu0 %1003 }
 0x111   : > { %934 = vst.msk [vmem:[#allocation3 + $0xf8] sm:$0xff] %vm902_vm4, %v869_v31 }
 0x112   : > { %1098 = vst.msk [vmem:[#allocation3 + $0x10] sm:$0xff] %vm1095_vm5, %v1004_v6  ;;  %1788 = vrot.lane.b32.xlu1 %v1716_v54, %s3235_s20  ;;  %1790 = vrot.lane.b32.xlu0 %v1717_v58, %s3235_s20 }
 0x114   : > { %v1002_v32 = vpop.permute.xlu1 %1001  ;;  %v1008_v18 = vpop.permute.xlu0 %1007 }
 0x115   : > { %1097 = vst.msk [vmem:[#allocation3 + $0x8] sm:$0xff] %vm1095_vm5, %v1002_v32  ;;  %1100 = vst.msk [vmem:[#allocation3 + $0x20] sm:$0xff] %vm1095_vm5, %v1008_v18 }
 0x116   : > { %1212 = vrot.lane.b32.xlu1 %v1716_v54, %s3232_s7  ;;  %1214 = vrot.lane.b32.xlu0 %v1717_v58, %s3232_s7  ;;  %v3067_v54 = vld [vmem:[%s3331_s24 + $0x78] sm:$0xff]  }
 0x117   : > { %v3051_v58 = vunpack.c.l.bf16 %v3067_v54 }
 0x118   : > { %v1006_v34 = vpop.permute.xlu1 %1005  ;;  %v1012_v40 = vpop.permute.xlu0 %1011 }
 0x119   : > { %1099 = vst.msk [vmem:[#allocation3 + $0x18] sm:$0xff] %vm1095_vm5, %v1006_v34  ;;  %1102 = vst.msk [vmem:[#allocation3 + $0x30] sm:$0xff] %vm1095_vm5, %v1012_v40  ;;  %v3218_v34 = vld [vmem:[%s4452_s1] ss:$0 sm:$0xff] }
 0x11a   : > { %1981 = vrot.lane.b32.xlu1 %v3660_v63, %s3236_s11  ;;  %1983 = vrot.lane.b32.xlu0 %v3674_v8, %s3236_s11  ;;  %v337_v40 = vmul.f32 %v3218_v34, %v3051_v58 }
 0x11c   : > { %v1010_v38 = vpop.permute.xlu1 %1009  ;;  %v1016_v1 = vpop.permute.xlu0 %1015 }
 0x11d   : > { %1101 = vst.msk [vmem:[#allocation3 + $0x28] sm:$0xff] %vm1095_vm5, %v1010_v38  ;;  %1104 = vst.msk [vmem:[#allocation3 + $0x40] sm:$0xff] %vm1095_vm5, %v1016_v1  ;;  %v3219_v38 = vld [vmem:[%s4453_s2] ss:$0 sm:$0xff] }
 0x11e   : > { %1405 = vrot.lane.b32.xlu1 %v3660_v63, %s3233_s8  ;;  %1599 = vrot.lane.b32.xlu0 %v3536_v37, %s3234_s13  ;;  %v1718_v63 = vld [vmem:[#allocation2 + $0xa9] sm:$0xff]  ;;  %v376_v1 = vadd.f32 %v3219_v38, %v337_v40  ;;  %v1538_v40 = vld [vmem:[#allocation2 + $0x140] sm:$0xff] }
 0x120   : > { %v1014_v35 = vpop.permute.xlu1 %1013  ;;  %v1193_v17 = vpop.permute.xlu0 %1192 }
 0x121   : > { %1103 = vst.msk [vmem:[#allocation3 + $0x38] sm:$0xff] %vm1095_vm5, %v1014_v35  ;;  %v3052_v35 = vunpack.c.h.bf16 %v3067_v54 }
 0x122   : > { %1289 = vst.msk [vmem:[#allocation3] sm:$0xff] %vm1288_vm6, %v1193_v17  ;;  %1407 = vrot.lane.b32.xlu1 %v3674_v8, %s3233_s8  ;;  %1601 = vrot.lane.b32.xlu0 %v3556_v49, %s3234_s13 }
 0x124   : > { %v1018_v42 = vpop.permute.xlu1 %1017  ;;  %v1386_v53 = vpop.permute.xlu0 %1385 }
 0x125   : > { %1105 = vst.msk [vmem:[#allocation3 + $0x48] sm:$0xff] %vm1095_vm5, %v1018_v42 }
 0x126   : > { %1482 = vst.msk [vmem:[#allocation3] sm:$0xff] %vm1481_vm7, %v1386_v53  ;;  %1023 = vrot.lane.b32.xlu1 %v3536_v37, %s3231_s6  ;;  %1025 = vrot.lane.b32.xlu0 %v3556_v49, %s3231_s6  ;;  %v408_v53 = vmax.f32 %v376_v1, 0.0 }
 0x128   : > { %v1195_v8 = vpop.permute.xlu1 %1194  ;;  %v1580_v45 = vpop.permute.xlu0 %1579  ;;  %483 = vst.msk [vmem:[#allocation2 + $0x181] sm:$0xff] %vm410_vm0, %v408_v53  ;;  %v1731_v53 = vld [vmem:[#allocation2 + $0x141] sm:$0xff] }
 0x129   : > { %1290 = vst.msk [vmem:[#allocation3 + $0x8] sm:$0xff] %vm1288_vm6, %v1195_v8 }
 0x12a   : > { %1676 = vst.msk [vmem:[#allocation3] sm:$0xff] %vm1675_vm8, %v1580_v45  ;;  %1792 = vrot.lane.b32.xlu1 %v1718_v63, %s3235_s20  ;;  %1794 = vrot.lane.b32.xlu0 %v1719_v43, %s3235_s20 }
 0x12c   : > { %v1388_v14 = vpop.permute.xlu1 %1387  ;;  %v1773_v60 = vpop.permute.xlu0 %1772 }
 0x12d   : > { %1483 = vst.msk [vmem:[#allocation3 + $0x8] sm:$0xff] %vm1481_vm7, %v1388_v14 }
 0x12e   : > { %1869 = vst.msk [vmem:[#allocation3] sm:$0xff] %vm1868_vm9, %v1773_v60  ;;  %1216 = vrot.lane.b32.xlu1 %v1718_v63, %s3232_s7  ;;  %1218 = vrot.lane.b32.xlu0 %v1719_v43, %s3232_s7  ;;  %v338_v63 = vmul.f32 %v3218_v34, %v3052_v35  ;;  %v1724_v43 = vld [vmem:[#allocation2 + $0xf1] sm:$0xff]  ;;  %v1725_v60 = vld [vmem:[#allocation2 + $0xf9] sm:$0xff] }
 0x12f   : > { %v1730_v35 = vld [vmem:[#allocation2 + $0x139] sm:$0xff] }
 0x130   : > { %v1582_v37 = vpop.permute.xlu1 %1581  ;;  %v1775_v49 = vpop.permute.xlu0 %1774  ;;  %v377_v8 = vadd.f32 %v3219_v38, %v338_v63 }
 0x131   : > { %1677 = vst.msk [vmem:[#allocation3 + $0x8] sm:$0xff] %vm1675_vm8, %v1582_v37 }
 0x132   : > { %1870 = vst.msk [vmem:[#allocation3 + $0x8] sm:$0xff] %vm1868_vm9, %v1775_v49  ;;  %1985 = vrot.lane.b32.xlu1 %v3668_v7, %s3236_s11  ;;  %1987 = vrot.lane.b32.xlu0 %v3682_v13, %s3236_s11  ;;  %v409_v37 = vmax.f32 %v377_v8, 0.0  ;;  %v1917_v49 = vld [vmem:[#allocation2 + $0xf2] sm:$0xff]  ;;  %v1923_v8 = vld [vmem:[#allocation2 + $0x13a] sm:$0xff] }
 0x134   : > { %v1197_v16 = vpop.permute.xlu1 %1196  ;;  %v1199_v29 = vpop.permute.xlu0 %1198  ;;  %484 = vst.msk [vmem:[#allocation2 + $0x189] sm:$0xff] %vm410_vm0, %v409_v37 }
 0x135   : > { %1291 = vst.msk [vmem:[#allocation3 + $0x10] sm:$0xff] %vm1288_vm6, %v1197_v16  ;;  %1292 = vst.msk [vmem:[#allocation3 + $0x18] sm:$0xff] %vm1288_vm6, %v1199_v29 }
 0x136   : > { %1409 = vrot.lane.b32.xlu1 %v3668_v7, %s3233_s8  ;;  %1603 = vrot.lane.b32.xlu0 %v3554_v48, %s3234_s13  ;;  %v1720_v7 = vld [vmem:[#allocation2 + $0xc1] sm:$0xff] }
 0x138   : > { %v1966_v11 = vpop.permute.xlu1 %1965  ;;  %v1968_v41 = vpop.permute.xlu0 %1967 }
 0x139   : > { %2062 = vst.msk [vmem:[#allocation3] sm:$0xff] %vm2061_vm10, %v1966_v11  ;;  %2063 = vst.msk [vmem:[#allocation3 + $0x8] sm:$0xff] %vm2061_vm10, %v1968_v41  ;;  %v1918_v11 = vld [vmem:[#allocation2 + $0xfa] sm:$0xff] }
 0x13a   : > { %1411 = vrot.lane.b32.xlu1 %v3682_v13, %s3233_s8  ;;  %1605 = vrot.lane.b32.xlu0 %v3566_v56, %s3234_s13 }
 0x13c   : > { %v1390_v19 = vpop.permute.xlu1 %1389  ;;  %v1584_v59 = vpop.permute.xlu0 %1583 }
 0x13d   : > { %1484 = vst.msk [vmem:[#allocation3 + $0x10] sm:$0xff] %vm1481_vm7, %v1390_v19 }
 0x13e   : > { %1678 = vst.msk [vmem:[#allocation3 + $0x10] sm:$0xff] %vm1675_vm8, %v1584_v59  ;;  %1027 = vrot.lane.b32.xlu1 %v3554_v48, %s3231_s6  ;;  %1029 = vrot.lane.b32.xlu0 %v3566_v56, %s3231_s6 }
 0x140   : > { %v1392_v20 = vpop.permute.xlu1 %1391  ;;  %v1777_v13 = vpop.permute.xlu0 %1776  ;;  %v2094_v39 = vld [vmem:[#allocation3] sm:$0xff]  ;;  %v2095_v50 = vld [vmem:[#allocation3 + $0x8] sm:$0xff] }
 0x141   : > { %1485 = vst.msk [vmem:[#allocation3 + $0x18] sm:$0xff] %vm1481_vm7, %v1392_v20  ;;  %3127 = vmatprep.mubr.msk.f32.mxu0 %vm2135_vm11, %v2094_v39 }
 0x142   : > { %1871 = vst.msk [vmem:[#allocation3 + $0x10] sm:$0xff] %vm1868_vm9, %v1777_v13  ;;  %1796 = vrot.lane.b32.xlu1 %v1720_v7, %s3235_s20  ;;  %1798 = vrot.lane.b32.xlu0 %v1721_v44, %s3235_s20 }
 0x143   : > { %3128 = vmatmul.mubr.msk.f32.vlgmr.msra.gmra.mrb[0].mxu0 %vm2135_vm11, %v2095_v50  ;;  %v1726_v50 = vld [vmem:[#allocation2 + $0x109] sm:$0xff] }
 0x144   : > { %v1586_v48 = vpop.permute.xlu1 %1585  ;;  %v1779_v56 = vpop.permute.xlu0 %1778 }
 0x145   : > { %1679 = vst.msk [vmem:[#allocation3 + $0x18] sm:$0xff] %vm1675_vm8, %v1586_v48 }
 0x146   : > { %1872 = vst.msk [vmem:[#allocation3 + $0x18] sm:$0xff] %vm1868_vm9, %v1779_v56  ;;  %1220 = vrot.lane.b32.xlu1 %v1720_v7, %s3232_s7  ;;  %1222 = vrot.lane.b32.xlu0 %v1721_v44, %s3232_s7 }
 0x148   : > { %v1201_v33 = vpop.permute.xlu1 %1200  ;;  %v1203_v21 = vpop.permute.xlu0 %1202 }
 0x149   : > { %1293 = vst.msk [vmem:[#allocation3 + $0x20] sm:$0xff] %vm1288_vm6, %v1201_v33  ;;  %1294 = vst.msk [vmem:[#allocation3 + $0x28] sm:$0xff] %vm1288_vm6, %v1203_v21  ;;  %v1727_v33 = vld [vmem:[#allocation2 + $0x111] sm:$0xff] }
 0x14a   : > { %1989 = vrot.lane.b32.xlu1 %v3676_v10, %s3236_s11  ;;  %1991 = vrot.lane.b32.xlu0 %v3687_v15, %s3236_s11 }
 0x14c   : > { %v1970_v23 = vpop.permute.xlu1 %1969  ;;  %v1972_v22 = vpop.permute.xlu0 %1971 }
 0x14d   : > { %2064 = vst.msk [vmem:[#allocation3 + $0x10] sm:$0xff] %vm2061_vm10, %v1970_v23  ;;  %2065 = vst.msk [vmem:[#allocation3 + $0x18] sm:$0xff] %vm2061_vm10, %v1972_v22 }
 0x14e   : > { %1413 = vrot.lane.b32.xlu1 %v3676_v10, %s3233_s8  ;;  %1607 = vrot.lane.b32.xlu0 %v3564_v55, %s3234_s13  ;;  %v1722_v10 = vld [vmem:[#allocation2 + $0xd9] sm:$0xff] }
 0x150   : > { %v1394_v28 = vpop.permute.xlu1 %1393  ;;  %v1588_v51 = vpop.permute.xlu0 %1587 }
 0x151   : > { %1486 = vst.msk [vmem:[#allocation3 + $0x20] sm:$0xff] %vm1481_vm7, %v1394_v28  ;;  %v1920_v28 = vld [vmem:[#allocation2 + $0x112] sm:$0xff] }
 0x152   : > { %1680 = vst.msk [vmem:[#allocation3 + $0x20] sm:$0xff] %vm1675_vm8, %v1588_v51  ;;  %1415 = vrot.lane.b32.xlu1 %v3687_v15, %s3233_s8  ;;  %1609 = vrot.lane.b32.xlu0 %v3576_v61, %s3234_s13 }
 0x154   : > { %v1396_v24 = vpop.permute.xlu1 %1395  ;;  %v1781_v25 = vpop.permute.xlu0 %1780  ;;  %v2096_v2 = vld [vmem:[#allocation3 + $0x10] sm:$0xff]  ;;  %v2097_v47 = vld [vmem:[#allocation3 + $0x18] sm:$0xff] }
 0x155   : > { %1487 = vst.msk [vmem:[#allocation3 + $0x28] sm:$0xff] %vm1481_vm7, %v1396_v24  ;;  %3130 = vmatprep.mubr.msk.f32.mxu0 %vm2135_vm11, %v2096_v2 }
 0x156   : > { %1873 = vst.msk [vmem:[#allocation3 + $0x20] sm:$0xff] %vm1868_vm9, %v1781_v25  ;;  %1031 = vrot.lane.b32.xlu1 %v3564_v55, %s3231_s6  ;;  %3131 = vmatmul.mubr.msk.f32.gmra.mrb[2].mxu0 %vm2135_vm11, %v2097_v47  ;;  %v1915_v55 = vld [vmem:[#allocation2 + $0xda] sm:$0xff] }
 0x157   : > { %1033 = vrot.lane.b32.xlu0 %v3576_v61, %s3231_s6 }
 0x158   : > { %v1590_v15 = vpop.permute.xlu1 %1589  ;;  %v1783_v62 = vpop.permute.xlu0 %1782 }
 0x159   : > { %1681 = vst.msk [vmem:[#allocation3 + $0x28] sm:$0xff] %vm1675_vm8, %v1590_v15  ;;  %v957_v15 = vld [vmem:[#allocation2 + $0x120] sm:$0xff] }
 0x15a   : > { %1874 = vst.msk [vmem:[#allocation3 + $0x28] sm:$0xff] %vm1868_vm9, %v1783_v62  ;;  %1800 = vrot.lane.b32.xlu1 %v1722_v10, %s3235_s20 }
 0x15b   : > { %1802 = vrot.lane.b32.xlu0 %v1723_v46, %s3235_s20 }
 0x15c   : > { %v1205_v36 = vpop.permute.xlu1 %1204  ;;  %v1207_v12 = vpop.permute.xlu0 %1206 }
 0x15d   : > { %1295 = vst.msk [vmem:[#allocation3 + $0x30] sm:$0xff] %vm1288_vm6, %v1205_v36  ;;  %1296 = vst.msk [vmem:[#allocation3 + $0x38] sm:$0xff] %vm1288_vm6, %v1207_v12 }
 0x15e   : > { %1224 = vrot.lane.b32.xlu1 %v1722_v10, %s3232_s7 }
 0x15f   : > { %1226 = vrot.lane.b32.xlu0 %v1723_v46, %s3232_s7 }
 0x160   : > { %v1974_v61 = vpop.permute.xlu1 %1973  ;;  %v1976_v26 = vpop.permute.xlu0 %1975 }
 0x161   : > { %2066 = vst.msk [vmem:[#allocation3 + $0x20] sm:$0xff] %vm2061_vm10, %v1974_v61  ;;  %2067 = vst.msk [vmem:[#allocation3 + $0x28] sm:$0xff] %vm2061_vm10, %v1976_v26 }
 0x162   : > { %1993 = vrot.lane.b32.xlu1 %v1915_v55, %s3236_s11 }
 0x163   : > { %1995 = vrot.lane.b32.xlu0 %v1916_v27, %s3236_s11 }
 0x164   : > { %v1398_v30 = vpop.permute.xlu1 %1397  ;;  %v1592_v52 = vpop.permute.xlu0 %1591 }
 0x165   : > { %1488 = vst.msk [vmem:[#allocation3 + $0x30] sm:$0xff] %vm1481_vm7, %v1398_v30 }
 0x166   : > { %1682 = vst.msk [vmem:[#allocation3 + $0x30] sm:$0xff] %vm1675_vm8, %v1592_v52  ;;  %1417 = vrot.lane.b32.xlu1 %v1915_v55, %s3233_s8  ;;  %v1729_v55 = vld [vmem:[#allocation2 + $0x129] sm:$0xff] }
 0x167   : > { %1611 = vrot.lane.b32.xlu0 %v3568_v57, %s3234_s13  ;;  %v1922_v52 = vld [vmem:[#allocation2 + $0x12a] sm:$0xff] }
 0x168   : > { %v1400_v31 = vpop.permute.xlu1 %1399  ;;  %v1785_v6 = vpop.permute.xlu0 %1784  ;;  %v2098_v32 = vld [vmem:[#allocation3 + $0x20] sm:$0xff]  ;;  %v2099_v18 = vld [vmem:[#allocation3 + $0x28] sm:$0xff] }
 0x169   : > { %1489 = vst.msk [vmem:[#allocation3 + $0x38] sm:$0xff] %vm1481_vm7, %v1400_v31  ;;  %3133 = vmatprep.mubr.msk.f32.mxu0 %vm2135_vm11, %v2098_v32  ;;  %v1537_v32 = vld [vmem:[#allocation2 + $0x138] sm:$0xff] }
 0x16a   : > { %1875 = vst.msk [vmem:[#allocation3 + $0x30] sm:$0xff] %vm1868_vm9, %v1785_v6  ;;  %1419 = vrot.lane.b32.xlu1 %v1916_v27, %s3233_s8  ;;  %3134 = vmatmul.mubr.msk.f32.gmra.mrb[4].mxu0 %vm2135_vm11, %v2099_v18 }
 0x16b   : > { %1613 = vrot.lane.b32.xlu0 %v3586_v3, %s3234_s13 }
 0x16c   : > { %v1594_v17 = vpop.permute.xlu1 %1593  ;;  %v1787_v42 = vpop.permute.xlu0 %1786 }
 0x16d   : > { %1683 = vst.msk [vmem:[#allocation3 + $0x38] sm:$0xff] %vm1675_vm8, %v1594_v17 }
 0x16e   : > { %1876 = vst.msk [vmem:[#allocation3 + $0x38] sm:$0xff] %vm1868_vm9, %v1787_v42  ;;  %1035 = vrot.lane.b32.xlu1 %v3568_v57, %s3231_s6 }
 0x16f   : > { %1037 = vrot.lane.b32.xlu0 %v3586_v3, %s3231_s6 }
 0x170   : > { %v1209_v45 = vpop.permute.xlu1 %1208  ;;  %v1211_v14 = vpop.permute.xlu0 %1210 }
 0x171   : > { %1297 = vst.msk [vmem:[#allocation3 + $0x40] sm:$0xff] %vm1288_vm6, %v1209_v45  ;;  %1298 = vst.msk [vmem:[#allocation3 + $0x48] sm:$0xff] %vm1288_vm6, %v1211_v14 }
 0x172   : > { %1804 = vrot.lane.b32.xlu1 %v1724_v43, %s3235_s20 }
 0x173   : > { %1806 = vrot.lane.b32.xlu0 %v1725_v60, %s3235_s20 }
 0x174   : > { %v1978_v57 = vpop.permute.xlu1 %1977  ;;  %v1980_v3 = vpop.permute.xlu0 %1979 }
 0x175   : > { %2068 = vst.msk [vmem:[#allocation3 + $0x30] sm:$0xff] %vm2061_vm10, %v1978_v57  ;;  %2069 = vst.msk [vmem:[#allocation3 + $0x38] sm:$0xff] %vm2061_vm10, %v1980_v3 }
 0x176   : > { %1228 = vrot.lane.b32.xlu1 %v1724_v43, %s3232_s7 }
 0x177   : > { %1230 = vrot.lane.b32.xlu0 %v1725_v60, %s3232_s7  ;;  %v1924_v60 = vld [vmem:[#allocation2 + $0x142] sm:$0xff] }
 0x178   : > { %v1402_v16 = vpop.permute.xlu1 %1401  ;;  %v1596_v29 = vpop.permute.xlu0 %1595 }
 0x179   : > { %1490 = vst.msk [vmem:[#allocation3 + $0x40] sm:$0xff] %vm1481_vm7, %v1402_v16  ;;  %v1539_v16 = vld [vmem:[#allocation2 + $0x150] sm:$0xff] }
 0x17a   : > { %1684 = vst.msk [vmem:[#allocation3 + $0x40] sm:$0xff] %vm1675_vm8, %v1596_v29  ;;  %1997 = vrot.lane.b32.xlu1 %v1917_v49, %s3236_s11 }
 0x17b   : > { %1999 = vrot.lane.b32.xlu0 %v1918_v11, %s3236_s11 }
 0x17c   : > { %v1404_v41 = vpop.permute.xlu1 %1403  ;;  %v1598_v19 = vpop.permute.xlu0 %1597  ;;  %v2100_v59 = vld [vmem:[#allocation3 + $0x30] sm:$0xff]  ;;  %v2101_v7 = vld [vmem:[#allocation3 + $0x38] sm:$0xff] }
 0x17d   : > { %1491 = vst.msk [vmem:[#allocation3 + $0x48] sm:$0xff] %vm1481_vm7, %v1404_v41  ;;  %3136 = vmatprep.mubr.msk.f32.mxu0 %vm2135_vm11, %v2100_v59 }
 0x17e   : > { %1685 = vst.msk [vmem:[#allocation3 + $0x48] sm:$0xff] %vm1675_vm8, %v1598_v19  ;;  %1421 = vrot.lane.b32.xlu1 %v1917_v49, %s3233_s8  ;;  %3137 = vmatmul.mubr.msk.f32.gmra.mrb[6].mxu0 %vm2135_vm11, %v2101_v7  ;;  %v1732_v7 = vld [vmem:[#allocation2 + $0x151] sm:$0xff] }
 0x17f   : > { %1615 = vrot.lane.b32.xlu0 %v3582_v0, %s3234_s13 }
 0x180   : > { %v1020_v44 = vpop.permute.xlu1 %1019  ;;  %v1022_v20 = vpop.permute.xlu0 %1021 }
 0x181   : > { %1106 = vst.msk [vmem:[#allocation3 + $0x50] sm:$0xff] %vm1095_vm5, %v1020_v44  ;;  %1107 = vst.msk [vmem:[#allocation3 + $0x58] sm:$0xff] %vm1095_vm5, %v1022_v20  ;;  %v1733_v20 = vld [vmem:[#allocation2 + $0x159] sm:$0xff] }
 0x182   : > { %1423 = vrot.lane.b32.xlu1 %v1918_v11, %s3233_s8  ;;  %v1540_v11 = vld [vmem:[#allocation2 + $0x158] sm:$0xff] }
 0x183   : > { %1617 = vrot.lane.b32.xlu0 %v3596_v5, %s3234_s13 }
 0x184   : > { %v1789_v13 = vpop.permute.xlu1 %1788  ;;  %v1791_v39 = vpop.permute.xlu0 %1790 }
 0x185   : > { %1877 = vst.msk [vmem:[#allocation3 + $0x40] sm:$0xff] %vm1868_vm9, %v1789_v13  ;;  %1878 = vst.msk [vmem:[#allocation3 + $0x48] sm:$0xff] %vm1868_vm9, %v1791_v39 }
 0x186   : > { %1039 = vrot.lane.b32.xlu1 %v3582_v0, %s3231_s6  ;;  %v1919_v0 = vld [vmem:[#allocation2 + $0x10a] sm:$0xff] }
 0x187   : > { %1041 = vrot.lane.b32.xlu0 %v3596_v5, %s3231_s6 }
 0x188   : > { %v1213_v48 = vpop.permute.xlu1 %1212  ;;  %v1215_v56 = vpop.permute.xlu0 %1214 }
 0x189   : > { %1299 = vst.msk [vmem:[#allocation3 + $0x50] sm:$0xff] %vm1288_vm6, %v1213_v48  ;;  %1300 = vst.msk [vmem:[#allocation3 + $0x58] sm:$0xff] %vm1288_vm6, %v1215_v56  ;;  %v1925_v48 = vld [vmem:[#allocation2 + $0x152] sm:$0xff] }
 0x18a   : > { %1808 = vrot.lane.b32.xlu1 %v1726_v50, %s3235_s20 }
 0x18b   : > { %1810 = vrot.lane.b32.xlu0 %v1727_v33, %s3235_s20 }
 0x18c   : > { %v1982_v21 = vpop.permute.xlu1 %1981  ;;  %v1984_v23 = vpop.permute.xlu0 %1983 }
 0x18d   : > { %2070 = vst.msk [vmem:[#allocation3 + $0x40] sm:$0xff] %vm2061_vm10, %v1982_v21  ;;  %2071 = vst.msk [vmem:[#allocation3 + $0x48] sm:$0xff] %vm2061_vm10, %v1984_v23 }
 0x18e   : > { %1232 = vrot.lane.b32.xlu1 %v1726_v50, %s3232_s7 }
 0x18f   : > { %1234 = vrot.lane.b32.xlu0 %v1727_v33, %s3232_s7  ;;  %v1926_v33 = vld [vmem:[#allocation2 + $0x15a] sm:$0xff] }
 0x190   : > { %v1406_v5 = vpop.permute.xlu1 %1405  ;;  %v1600_v22 = vpop.permute.xlu0 %1599 }
 0x191   : > { %1492 = vst.msk [vmem:[#allocation3 + $0x50] sm:$0xff] %vm1481_vm7, %v1406_v5  ;;  %v1541_v5 = vld [vmem:[#allocation2 + $0x168] sm:$0xff] }
 0x192   : > { %1686 = vst.msk [vmem:[#allocation3 + $0x50] sm:$0xff] %vm1675_vm8, %v1600_v22  ;;  %2001 = vrot.lane.b32.xlu1 %v1919_v0, %s3236_s11 }
 0x193   : > { %2003 = vrot.lane.b32.xlu0 %v1920_v28, %s3236_s11 }
 0x194   : > { %v1408_v51 = vpop.permute.xlu1 %1407  ;;  %v1602_v24 = vpop.permute.xlu0 %1601  ;;  %v2102_v25 = vld [vmem:[#allocation3 + $0x40] sm:$0xff]  ;;  %v2103_v2 = vld [vmem:[#allocation3 + $0x48] sm:$0xff] }
 0x195   : > { %1493 = vst.msk [vmem:[#allocation3 + $0x58] sm:$0xff] %vm1481_vm7, %v1408_v51  ;;  %3139 = vmatprep.mubr.msk.f32.mxu0 %vm2135_vm11, %v2102_v25 }
 0x196   : > { %1687 = vst.msk [vmem:[#allocation3 + $0x58] sm:$0xff] %vm1675_vm8, %v1602_v24  ;;  %1425 = vrot.lane.b32.xlu1 %v1919_v0, %s3233_s8  ;;  %3140 = vmatmul.mubr.msk.f32.gmra.mrb[8].mxu0 %vm2135_vm11, %v2103_v2  ;;  %v1542_v24 = vld [vmem:[#allocation2 + $0x170] sm:$0xff] }
 0x197   : > { %1619 = vrot.lane.b32.xlu0 %v3588_v4, %s3234_s13  ;;  %v1728_v4 = vld [vmem:[#allocation2 + $0x121] sm:$0xff] }
 0x198   : > { %v1024_v47 = vpop.permute.xlu1 %1023  ;;  %v1026_v10 = vpop.permute.xlu0 %1025 }
 0x199   : > { %1108 = vst.msk [vmem:[#allocation3 + $0x60] sm:$0xff] %vm1095_vm5, %v1024_v47  ;;  %1109 = vst.msk [vmem:[#allocation3 + $0x68] sm:$0xff] %vm1095_vm5, %v1026_v10  ;;  %v1734_v10 = vld [vmem:[#allocation2 + $0x169] sm:$0xff] }
 0x19a   : > { %1427 = vrot.lane.b32.xlu1 %v1920_v28, %s3233_s8 }
 0x19b   : > { %1621 = vrot.lane.b32.xlu0 %v3603_v9, %s3234_s13 }
 0x19c   : > { %v1793_v62 = vpop.permute.xlu1 %1792  ;;  %v1795_v46 = vpop.permute.xlu0 %1794 }
 0x19d   : > { %1879 = vst.msk [vmem:[#allocation3 + $0x50] sm:$0xff] %vm1868_vm9, %v1793_v62  ;;  %1880 = vst.msk [vmem:[#allocation3 + $0x58] sm:$0xff] %vm1868_vm9, %v1795_v46  ;;  %v1735_v62 = vld [vmem:[#allocation2 + $0x171] sm:$0xff] }
 0x19e   : > { %1043 = vrot.lane.b32.xlu1 %v957_v15, %s3231_s6 }
 0x19f   : > { %1045 = vrot.lane.b32.xlu0 %v3603_v9, %s3231_s6  ;;  %v1921_v9 = vld [vmem:[#allocation2 + $0x122] sm:$0xff] }
 0x1a0   : > { %v1217_v36 = vpop.permute.xlu1 %1216  ;;  %v1219_v12 = vpop.permute.xlu0 %1218 }
 0x1a1   : > { %1301 = vst.msk [vmem:[#allocation3 + $0x60] sm:$0xff] %vm1288_vm6, %v1217_v36  ;;  %1302 = vst.msk [vmem:[#allocation3 + $0x68] sm:$0xff] %vm1288_vm6, %v1219_v12  ;;  %v1927_v12 = vld [vmem:[#allocation2 + $0x16a] sm:$0xff] }
 0x1a2   : > { %1812 = vrot.lane.b32.xlu1 %v1728_v4, %s3235_s20 }
 0x1a3   : > { %1814 = vrot.lane.b32.xlu0 %v1729_v55, %s3235_s20 }
 0x1a4   : > { %v1986_v61 = vpop.permute.xlu1 %1985  ;;  %v1988_v26 = vpop.permute.xlu0 %1987 }
 0x1a5   : > { %2072 = vst.msk [vmem:[#allocation3 + $0x50] sm:$0xff] %vm2061_vm10, %v1986_v61  ;;  %2073 = vst.msk [vmem:[#allocation3 + $0x58] sm:$0xff] %vm2061_vm10, %v1988_v26  ;;  %v1928_v61 = vld [vmem:[#allocation2 + $0x172] sm:$0xff] }
 0x1a6   : > { %1236 = vrot.lane.b32.xlu1 %v1728_v4, %s3232_s7 }
 0x1a7   : > { %1238 = vrot.lane.b32.xlu0 %v1729_v55, %s3232_s7 }
 0x1a8   : > { %v1410_v27 = vpop.permute.xlu1 %1409  ;;  %v1604_v30 = vpop.permute.xlu0 %1603 }
 0x1a9   : > { %1494 = vst.msk [vmem:[#allocation3 + $0x60] sm:$0xff] %vm1481_vm7, %v1410_v27 }
 0x1aa   : > { %1688 = vst.msk [vmem:[#allocation3 + $0x60] sm:$0xff] %vm1675_vm8, %v1604_v30  ;;  %2005 = vrot.lane.b32.xlu1 %v1921_v9, %s3236_s11  ;;  %v1543_v30 = vld [vmem:[#allocation2 + $0x180] sm:$0xff] }
 0x1ab   : > { %2007 = vrot.lane.b32.xlu0 %v1922_v52, %s3236_s11 }
 0x1ac   : > { %v1412_v54 = vpop.permute.xlu1 %1411  ;;  %v1606_v58 = vpop.permute.xlu0 %1605  ;;  %v2104_v31 = vld [vmem:[#allocation3 + $0x50] sm:$0xff]  ;;  %v2105_v6 = vld [vmem:[#allocation3 + $0x58] sm:$0xff] }
 0x1ad   : > { %1495 = vst.msk [vmem:[#allocation3 + $0x68] sm:$0xff] %vm1481_vm7, %v1412_v54  ;;  %3142 = vmatprep.mubr.msk.f32.mxu0 %vm2135_vm11, %v2104_v31  ;;  %v1544_v31 = vld [vmem:[#allocation2 + $0x188] sm:$0xff] }
 0x1ae   : > { %1689 = vst.msk [vmem:[#allocation3 + $0x68] sm:$0xff] %vm1675_vm8, %v1606_v58  ;;  %1429 = vrot.lane.b32.xlu1 %v1921_v9, %s3233_s8  ;;  %3143 = vmatmul.mubr.msk.f32.gmra.mrb[10].mxu0 %vm2135_vm11, %v2105_v6 }
 0x1af   : > { %1623 = vrot.lane.b32.xlu0 %v1537_v32, %s3234_s13 }
 0x1b0   : > { %v1028_v18 = vpop.permute.xlu1 %1027  ;;  %v1030_v34 = vpop.permute.xlu0 %1029 }
 0x1b1   : > { %1110 = vst.msk [vmem:[#allocation3 + $0x70] sm:$0xff] %vm1095_vm5, %v1028_v18  ;;  %1111 = vst.msk [vmem:[#allocation3 + $0x78] sm:$0xff] %vm1095_vm5, %v1030_v34  ;;  %v1736_v34 = vld [vmem:[#allocation2 + $0x181] sm:$0xff] }
 0x1b2   : > { %1431 = vrot.lane.b32.xlu1 %v1922_v52, %s3233_s8 }
 0x1b3   : > { %1625 = vrot.lane.b32.xlu0 %v1538_v40, %s3234_s13 }
 0x1b4   : > { %v1797_v38 = vpop.permute.xlu1 %1796  ;;  %v1799_v1 = vpop.permute.xlu0 %1798 }
 0x1b5   : > { %1881 = vst.msk [vmem:[#allocation3 + $0x60] sm:$0xff] %vm1868_vm9, %v1797_v38  ;;  %1882 = vst.msk [vmem:[#allocation3 + $0x68] sm:$0xff] %vm1868_vm9, %v1799_v1  ;;  %v1737_v38 = vld [vmem:[#allocation2 + $0x189] sm:$0xff] }
 0x1b6   : > { %1047 = vrot.lane.b32.xlu1 %v1537_v32, %s3231_s6 }
 0x1b7   : > { %1049 = vrot.lane.b32.xlu0 %v1538_v40, %s3231_s6 }
 0x1b8   : > { %v1221_v17 = vpop.permute.xlu1 %1220  ;;  %v1223_v42 = vpop.permute.xlu0 %1222 }
 0x1b9   : > { %1303 = vst.msk [vmem:[#allocation3 + $0x70] sm:$0xff] %vm1288_vm6, %v1221_v17  ;;  %1304 = vst.msk [vmem:[#allocation3 + $0x78] sm:$0xff] %vm1288_vm6, %v1223_v42  ;;  %v1929_v42 = vld [vmem:[#allocation2 + $0x182] sm:$0xff] }
 0x1ba   : > { %1816 = vrot.lane.b32.xlu1 %v1730_v35, %s3235_s20 }
 0x1bb   : > { %1818 = vrot.lane.b32.xlu0 %v1731_v53, %s3235_s20 }
 0x1bc   : > { %v1990_v63 = vpop.permute.xlu1 %1989  ;;  %v1992_v43 = vpop.permute.xlu0 %1991 }
 0x1bd   : > { %2074 = vst.msk [vmem:[#allocation3 + $0x60] sm:$0xff] %vm2061_vm10, %v1990_v63  ;;  %2075 = vst.msk [vmem:[#allocation3 + $0x68] sm:$0xff] %vm2061_vm10, %v1992_v43  ;;  %v1930_v63 = vld [vmem:[#allocation2 + $0x18a] sm:$0xff] }
 0x1be   : > { %1240 = vrot.lane.b32.xlu1 %v1730_v35, %s3232_s7 }
 0x1bf   : > { %1242 = vrot.lane.b32.xlu0 %v1731_v53, %s3232_s7 }
 0x1c0   : > { %v1414_v45 = vpop.permute.xlu1 %1413  ;;  %v1608_v14 = vpop.permute.xlu0 %1607 }
 0x1c1   : > { %1496 = vst.msk [vmem:[#allocation3 + $0x70] sm:$0xff] %vm1481_vm7, %v1414_v45 }
 0x1c2   : > { %1690 = vst.msk [vmem:[#allocation3 + $0x70] sm:$0xff] %vm1675_vm8, %v1608_v14  ;;  %2009 = vrot.lane.b32.xlu1 %v1923_v8, %s3236_s11  ;;  %v1545_v14 = vld [vmem:[#allocation2 + $0x198] sm:$0xff] }
 0x1c3   : > { %2011 = vrot.lane.b32.xlu0 %v1924_v60, %s3236_s11 }
 0x1c4   : > { %v1416_v37 = vpop.permute.xlu1 %1415  ;;  %v1610_v57 = vpop.permute.xlu0 %1609  ;;  %v2106_v3 = vld [vmem:[#allocation3 + $0x60] sm:$0xff]  ;;  %v2107_v49 = vld [vmem:[#allocation3 + $0x68] sm:$0xff] }
 0x1c5   : > { %1497 = vst.msk [vmem:[#allocation3 + $0x78] sm:$0xff] %vm1481_vm7, %v1416_v37  ;;  %3145 = vmatprep.mubr.msk.f32.mxu0 %vm2135_vm11, %v2106_v3  ;;  %v1738_v3 = vld [vmem:[#allocation2 + $0x199] sm:$0xff] }
 0x1c6   : > { %1691 = vst.msk [vmem:[#allocation3 + $0x78] sm:$0xff] %vm1675_vm8, %v1610_v57  ;;  %1433 = vrot.lane.b32.xlu1 %v1923_v8, %s3233_s8  ;;  %3146 = vmatmul.mubr.msk.f32.gmra.mrb[12].mxu0 %vm2135_vm11, %v2107_v49 }
 0x1c7   : > { %1627 = vrot.lane.b32.xlu0 %v1539_v16, %s3234_s13 }
 0x1c8   : > { %v1032_v29 = vpop.permute.xlu1 %1031 }
 0x1c9   : > { %1112 = vst.msk [vmem:[#allocation3 + $0x80] sm:$0xff] %vm1095_vm5, %v1032_v29  ;;  %v1034_v41 = vpop.permute.xlu0 %1033 }
 0x1ca   : > { %1113 = vst.msk [vmem:[#allocation3 + $0x88] sm:$0xff] %vm1095_vm5, %v1034_v41  ;;  %1435 = vrot.lane.b32.xlu1 %v1924_v60, %s3233_s8 }
 0x1cb   : > { %1629 = vrot.lane.b32.xlu0 %v1540_v11, %s3234_s13 }
 0x1cc   : > { %v1801_v19 = vpop.permute.xlu1 %1800 }
 0x1cd   : > { %1883 = vst.msk [vmem:[#allocation3 + $0x70] sm:$0xff] %vm1868_vm9, %v1801_v19  ;;  %v1803_v59 = vpop.permute.xlu0 %1802 }
 0x1ce   : > { %1884 = vst.msk [vmem:[#allocation3 + $0x78] sm:$0xff] %vm1868_vm9, %v1803_v59  ;;  %1051 = vrot.lane.b32.xlu1 %v1539_v16, %s3231_s6  ;;  %v1546_v16 = vld [vmem:[#allocation2 + $0x1a0] sm:$0xff] }
 0x1cf   : > { %1053 = vrot.lane.b32.xlu0 %v1540_v11, %s3231_s6  ;;  %v1931_v11 = vld [vmem:[#allocation2 + $0x19a] sm:$0xff] }
 0x1d0   : > { %v1225_v44 = vpop.permute.xlu1 %1224 }
 0x1d1   : > { %1305 = vst.msk [vmem:[#allocation3 + $0x80] sm:$0xff] %vm1288_vm6, %v1225_v44  ;;  %v1227_v13 = vpop.permute.xlu0 %1226 }
 0x1d2   : > { %1306 = vst.msk [vmem:[#allocation3 + $0x88] sm:$0xff] %vm1288_vm6, %v1227_v13  ;;  %1820 = vrot.lane.b32.xlu1 %v1732_v7, %s3235_s20 }
 0x1d3   : > { %1822 = vrot.lane.b32.xlu0 %v1733_v20, %s3235_s20 }
 0x1d4   : > { %v1994_v39 = vpop.permute.xlu1 %1993 }
 0x1d5   : > { %2076 = vst.msk [vmem:[#allocation3 + $0x70] sm:$0xff] %vm2061_vm10, %v1994_v39  ;;  %v1996_v50 = vpop.permute.xlu0 %1995 }
 0x1d6   : > { %2077 = vst.msk [vmem:[#allocation3 + $0x78] sm:$0xff] %vm2061_vm10, %v1996_v50  ;;  %1244 = vrot.lane.b32.xlu1 %v1732_v7, %s3232_s7 }
 0x1d7   : > { %1246 = vrot.lane.b32.xlu0 %v1733_v20, %s3232_s7  ;;  %v1739_v20 = vld [vmem:[#allocation2 + $0x1a1] sm:$0xff] }
 0x1d8   : > { %v1418_v56 = vpop.permute.xlu1 %1417 }
 0x1d9   : > { %1498 = vst.msk [vmem:[#allocation3 + $0x80] sm:$0xff] %vm1481_vm7, %v1418_v56  ;;  %v1612_v21 = vpop.permute.xlu0 %1611 }
 0x1da   : > { %1692 = vst.msk [vmem:[#allocation3 + $0x80] sm:$0xff] %vm1675_vm8, %v1612_v21  ;;  %2013 = vrot.lane.b32.xlu1 %v1925_v48, %s3236_s11 }
 0x1db   : > { %2015 = vrot.lane.b32.xlu0 %v1926_v33, %s3236_s11 }
 0x1dc   : > { %v1420_v23 = vpop.permute.xlu1 %1419  ;;  %v2108_v0 = vld [vmem:[#allocation3 + $0x70] sm:$0xff] }
 0x1dd   : > { %1499 = vst.msk [vmem:[#allocation3 + $0x88] sm:$0xff] %vm1481_vm7, %v1420_v23  ;;  %v1614_v22 = vpop.permute.xlu0 %1613  ;;  %3148 = vmatprep.mubr.msk.f32.mxu0 %vm2135_vm11, %v2108_v0  ;;  %v2109_v28 = vld [vmem:[#allocation3 + $0x78] sm:$0xff] }
 0x1de   : > { %1693 = vst.msk [vmem:[#allocation3 + $0x88] sm:$0xff] %vm1675_vm8, %v1614_v22  ;;  %1437 = vrot.lane.b32.xlu1 %v1925_v48, %s3233_s8  ;;  %3149 = vmatmul.mubr.msk.f32.gmra.mrb[14].mxu0 %vm2135_vm11, %v2109_v28  ;;  %v1932_v22 = vld [vmem:[#allocation2 + $0x1a2] sm:$0xff] }
 0x1df   : > { %1631 = vrot.lane.b32.xlu0 %v1541_v5, %s3234_s13 }
 0x1e0   : > { %v1036_v51 = vpop.permute.xlu1 %1035 }
 0x1e1   : > { %1114 = vst.msk [vmem:[#allocation3 + $0x90] sm:$0xff] %vm1095_vm5, %v1036_v51  ;;  %v1038_v25 = vpop.permute.xlu0 %1037 }
 0x1e2   : > { %1115 = vst.msk [vmem:[#allocation3 + $0x98] sm:$0xff] %vm1095_vm5, %v1038_v25  ;;  %1439 = vrot.lane.b32.xlu1 %v1926_v33, %s3233_s8 }
 0x1e3   : > { %1633 = vrot.lane.b32.xlu0 %v1542_v24, %s3234_s13 }
 0x1e4   : > { %v1805_v2 = vpop.permute.xlu1 %1804 }
 0x1e5   : > { %1885 = vst.msk [vmem:[#allocation3 + $0x80] sm:$0xff] %vm1868_vm9, %v1805_v2  ;;  %v1807_v47 = vpop.permute.xlu0 %1806 }
 0x1e6   : > { %1886 = vst.msk [vmem:[#allocation3 + $0x88] sm:$0xff] %vm1868_vm9, %v1807_v47  ;;  %1055 = vrot.lane.b32.xlu1 %v1541_v5, %s3231_s6 }
 0x1e7   : > { %1057 = vrot.lane.b32.xlu0 %v1542_v24, %s3231_s6 }
 0x1e8   : > { %v1229_v15 = vpop.permute.xlu1 %1228 }
 0x1e9   : > { %1307 = vst.msk [vmem:[#allocation3 + $0x90] sm:$0xff] %vm1288_vm6, %v1229_v15  ;;  %v1231_v46 = vpop.permute.xlu0 %1230 }
 0x1ea   : > { %1308 = vst.msk [vmem:[#allocation3 + $0x98] sm:$0xff] %vm1288_vm6, %v1231_v46  ;;  %1824 = vrot.lane.b32.xlu1 %v1734_v10, %s3235_s20 }
 0x1eb   : > { %1826 = vrot.lane.b32.xlu0 %v1735_v62, %s3235_s20 }
 0x1ec   : > { %v1998_v4 = vpop.permute.xlu1 %1997 }
 0x1ed   : > { %2078 = vst.msk [vmem:[#allocation3 + $0x80] sm:$0xff] %vm2061_vm10, %v1998_v4  ;;  %v2000_v36 = vpop.permute.xlu0 %1999 }
 0x1ee   : > { %2079 = vst.msk [vmem:[#allocation3 + $0x88] sm:$0xff] %vm2061_vm10, %v2000_v36  ;;  %1248 = vrot.lane.b32.xlu1 %v1734_v10, %s3232_s7 }
 0x1ef   : > { %1250 = vrot.lane.b32.xlu0 %v1735_v62, %s3232_s7 }
 0x1f0   : > { %v1422_v55 = vpop.permute.xlu1 %1421 }
 0x1f1   : > { %1500 = vst.msk [vmem:[#allocation3 + $0x90] sm:$0xff] %vm1481_vm7, %v1422_v55  ;;  %v1616_v26 = vpop.permute.xlu0 %1615 }
 0x1f2   : > { %1694 = vst.msk [vmem:[#allocation3 + $0x90] sm:$0xff] %vm1675_vm8, %v1616_v26  ;;  %2017 = vrot.lane.b32.xlu1 %v1927_v12, %s3236_s11 }
 0x1f3   : > { %2019 = vrot.lane.b32.xlu0 %v1928_v61, %s3236_s11 }
 0x1f4   : > { %v1424_v9 = vpop.permute.xlu1 %1423  ;;  %v2110_v27 = vld [vmem:[#allocation3 + $0x80] sm:$0xff] }
 0x1f5   : > { %1501 = vst.msk [vmem:[#allocation3 + $0x98] sm:$0xff] %vm1481_vm7, %v1424_v9  ;;  %v1618_v52 = vpop.permute.xlu0 %1617  ;;  %3151 = vmatprep.mubr.msk.f32.mxu1 %vm2135_vm11, %v2110_v27  ;;  %v2111_v54 = vld [vmem:[#allocation3 + $0x88] sm:$0xff] }
 0x1f6   : > { %1695 = vst.msk [vmem:[#allocation3 + $0x98] sm:$0xff] %vm1675_vm8, %v1618_v52  ;;  %1441 = vrot.lane.b32.xlu1 %v1927_v12, %s3233_s8  ;;  %3152 = vmatmul.mubr.msk.f32.vlgmr.msra.gmra.mrb[0].mxu1 %vm2135_vm11, %v2111_v54 }
 0x1f7   : > { %1635 = vrot.lane.b32.xlu0 %v1543_v30, %s3234_s13 }
 0x1f8   : > { %v1040_v58 = vpop.permute.xlu1 %1039 }
 0x1f9   : > { %1116 = vst.msk [vmem:[#allocation3 + $0xa0] sm:$0xff] %vm1095_vm5, %v1040_v58  ;;  %v1042_v6 = vpop.permute.xlu0 %1041 }
 0x1fa   : > { %1117 = vst.msk [vmem:[#allocation3 + $0xa8] sm:$0xff] %vm1095_vm5, %v1042_v6  ;;  %1443 = vrot.lane.b32.xlu1 %v1928_v61, %s3233_s8 }
 0x1fb   : > { %1637 = vrot.lane.b32.xlu0 %v1544_v31, %s3234_s13 }
 0x1fc   : > { %v1809_v32 = vpop.permute.xlu1 %1808 }
 0x1fd   : > { %1887 = vst.msk [vmem:[#allocation3 + $0x90] sm:$0xff] %vm1868_vm9, %v1809_v32  ;;  %v1811_v18 = vpop.permute.xlu0 %1810 }
 0x1fe   : > { %1888 = vst.msk [vmem:[#allocation3 + $0x98] sm:$0xff] %vm1868_vm9, %v1811_v18  ;;  %1059 = vrot.lane.b32.xlu1 %v1543_v30, %s3231_s6 }
 0x1ff   : > { %1061 = vrot.lane.b32.xlu0 %v1544_v31, %s3231_s6 }
 0x200   : > { %v1233_v40 = vpop.permute.xlu1 %1232 }
 0x201   : > { %1309 = vst.msk [vmem:[#allocation3 + $0xa0] sm:$0xff] %vm1288_vm6, %v1233_v40  ;;  %v1235_v1 = vpop.permute.xlu0 %1234 }
 0x202   : > { %1310 = vst.msk [vmem:[#allocation3 + $0xa8] sm:$0xff] %vm1288_vm6, %v1235_v1  ;;  %1828 = vrot.lane.b32.xlu1 %v1736_v34, %s3235_s20 }
 0x203   : > { %1830 = vrot.lane.b32.xlu0 %v1737_v38, %s3235_s20 }
 0x204   : > { %v2002_v35 = vpop.permute.xlu1 %2001 }
 0x205   : > { %2080 = vst.msk [vmem:[#allocation3 + $0x90] sm:$0xff] %vm2061_vm10, %v2002_v35  ;;  %v2004_v17 = vpop.permute.xlu0 %2003 }
 0x206   : > { %2081 = vst.msk [vmem:[#allocation3 + $0x98] sm:$0xff] %vm2061_vm10, %v2004_v17  ;;  %1252 = vrot.lane.b32.xlu1 %v1736_v34, %s3232_s7 }
 0x207   : > { %1254 = vrot.lane.b32.xlu0 %v1737_v38, %s3232_s7 }
 0x208   : > { %v1426_v53 = vpop.permute.xlu1 %1425 }
 0x209   : > { %1502 = vst.msk [vmem:[#allocation3 + $0xa0] sm:$0xff] %vm1481_vm7, %v1426_v53  ;;  %v1620_v43 = vpop.permute.xlu0 %1619 }
 0x20a   : > { %1696 = vst.msk [vmem:[#allocation3 + $0xa0] sm:$0xff] %vm1675_vm8, %v1620_v43  ;;  %2021 = vrot.lane.b32.xlu1 %v1929_v42, %s3236_s11 }
 0x20b   : > { %2023 = vrot.lane.b32.xlu0 %v1930_v63, %s3236_s11 }
 0x20c   : > { %v1428_v8 = vpop.permute.xlu1 %1427  ;;  %v2112_v45 = vld [vmem:[#allocation3 + $0x90] sm:$0xff] }
 0x20d   : > { %1503 = vst.msk [vmem:[#allocation3 + $0xa8] sm:$0xff] %vm1481_vm7, %v1428_v8  ;;  %v1622_v60 = vpop.permute.xlu0 %1621  ;;  %3154 = vmatprep.mubr.msk.f32.mxu1 %vm2135_vm11, %v2112_v45  ;;  %v2113_v37 = vld [vmem:[#allocation3 + $0x98] sm:$0xff] }
 0x20e   : > { %1697 = vst.msk [vmem:[#allocation3 + $0xa8] sm:$0xff] %vm1675_vm8, %v1622_v60  ;;  %1445 = vrot.lane.b32.xlu1 %v1929_v42, %s3233_s8  ;;  %3155 = vmatmul.mubr.msk.f32.gmra.mrb[2].mxu1 %vm2135_vm11, %v2113_v37 }
 0x20f   : > { %1639 = vrot.lane.b32.xlu0 %v1545_v14, %s3234_s13 }
 0x210   : > { %v1044_v57 = vpop.permute.xlu1 %1043 }
 0x211   : > { %1118 = vst.msk [vmem:[#allocation3 + $0xb0] sm:$0xff] %vm1095_vm5, %v1044_v57  ;;  %v1046_v49 = vpop.permute.xlu0 %1045 }
 0x212   : > { %1119 = vst.msk [vmem:[#allocation3 + $0xb8] sm:$0xff] %vm1095_vm5, %v1046_v49  ;;  %1447 = vrot.lane.b32.xlu1 %v1930_v63, %s3233_s8 }
 0x213   : > { %1832 = vrot.lane.b32.xlu0 %v1738_v3, %s3235_s20 }
 0x214   : > { %v1813_v29 = vpop.permute.xlu1 %1812 }
 0x215   : > { %1889 = vst.msk [vmem:[#allocation3 + $0xa0] sm:$0xff] %vm1868_vm9, %v1813_v29  ;;  %v1815_v41 = vpop.permute.xlu0 %1814 }
 0x216   : > { %1890 = vst.msk [vmem:[#allocation3 + $0xa8] sm:$0xff] %vm1868_vm9, %v1815_v41  ;;  %1641 = vrot.lane.b32.xlu1 %v1546_v16, %s3234_s13  ;;  %v3129_v19 = vpop.f32.mrb[0].mxu0 }
 0x217   : > { %v2458_v59 = vsel %vm410_vm0, %v3129_v19, 0.0  ;;  %v2527_v7 = vmul.f32 %v3129_v19, %v3129_v19  ;;  %v2958_v44 = vpack.c.bf16 %v3129_v19, %v3129_v19  ;;  %v2298_v13 = vpop.f32.mrb[1].mxu0  ;;  %2025 = vrot.lane.b32.xlu0 %v1931_v11, %s3236_s11 }
 0x218   : > { %v1237_v39 = vpop.permute.xlu1 %1236  ;;  %v2457_v50 = vsel %vm410_vm0, %v2298_v13, 0.0  ;;  %v2526_v48 = vmul.f32 %v2298_v13, %v2298_v13  ;;  %v2957_v56 = vpack.c.bf16 %v2298_v13, %v2298_v13 }
 0x219   : > { %1311 = vst.msk [vmem:[#allocation3 + $0xb0] sm:$0xff] %vm1288_vm6, %v1237_v39  ;;  %v1239_v33 = vpop.permute.xlu0 %1238  ;;  %v2559_v21 = vsel %vm410_vm0, %v2527_v7, 0.0  ;;  %v2459_v23 = vadd.f32 %v2458_v59, %v2457_v50 }
 0x21a   : > { %2760 = vst.msk [vmem:[%s4236_s16 + $0x4] sm:$0xf] %vm2758_vm12, %v2958_v44  ;;  %1834 = vrot.lane.b32.xlu1 %v1739_v20, %s3235_s20  ;;  %v2558_v0 = vsel %vm410_vm0, %v2526_v48, 0.0  ;;  %2759 = vst.msk [vmem:[%s4236_s16] sm:$0xf] %vm2758_vm12, %v2957_v56 }
 0x21b   : > { %1312 = vst.msk [vmem:[#allocation3 + $0xb8] sm:$0xff] %vm1288_vm6, %v1239_v33  ;;  %v2560_v5 = vadd.f32 %v2559_v21, %v2558_v0 }
 0x21c   : > { %v2006_v28 = vpop.permute.xlu1 %2005 }
 0x21d   : > { %2082 = vst.msk [vmem:[#allocation3 + $0xa0] sm:$0xff] %vm2061_vm10, %v2006_v28  ;;  %v2008_v51 = vpop.permute.xlu0 %2007 }
 0x21e   : > { %2083 = vst.msk [vmem:[#allocation3 + $0xa8] sm:$0xff] %vm2061_vm10, %v2008_v51  ;;  %2027 = vrot.lane.b32.xlu1 %v1932_v22, %s3236_s11 }
 0x220   : > { %v1430_v24 = vpop.permute.xlu1 %1429 }
 0x221   : > { %1504 = vst.msk [vmem:[#allocation3 + $0xb0] sm:$0xff] %vm1481_vm7, %v1430_v24  ;;  %v1624_v25 = vpop.permute.xlu0 %1623 }
 0x222   : > { %1698 = vst.msk [vmem:[#allocation3 + $0xb0] sm:$0xff] %vm1675_vm8, %v1624_v25 }
 0x224   : > { %v1432_v2 = vpop.permute.xlu1 %1431  ;;  %v2114_v47 = vld [vmem:[#allocation3 + $0xa0] sm:$0xff] }
 0x225   : > { %1505 = vst.msk [vmem:[#allocation3 + $0xb8] sm:$0xff] %vm1481_vm7, %v1432_v2  ;;  %v1626_v10 = vpop.permute.xlu0 %1625  ;;  %3157 = vmatprep.mubr.msk.f32.mxu1 %vm2135_vm11, %v2114_v47  ;;  %v2115_v15 = vld [vmem:[#allocation3 + $0xa8] sm:$0xff] }
 0x226   : > { %1699 = vst.msk [vmem:[#allocation3 + $0xb8] sm:$0xff] %vm1675_vm8, %v1626_v10  ;;  %3158 = vmatmul.mubr.msk.f32.gmra.mrb[4].mxu1 %vm2135_vm11, %v2115_v15 }
 0x228   : > { %v1048_v62 = vpop.permute.xlu1 %1047 }
 0x229   : > { %1120 = vst.msk [vmem:[#allocation3 + $0xc0] sm:$0xff] %vm1095_vm5, %v1048_v62  ;;  %v1050_v46 = vpop.permute.xlu0 %1049  ;;  %v3132_v4 = vpop.f32.mrb[2].mxu0 }
 0x22a   : > { %1121 = vst.msk [vmem:[#allocation3 + $0xc8] sm:$0xff] %vm1095_vm5, %v1050_v46  ;;  %v2529_v36 = vmul.f32 %v3132_v4, %v3132_v4  ;;  %v2960_v12 = vpack.c.bf16 %v3132_v4, %v3132_v4  ;;  %v2308_v55 = vpop.f32.mrb[3].mxu0  ;;  %v2462_v61 = vsel %vm410_vm0, %v3132_v4, 0.0 }
 0x22b   : > { %v2460_v26 = vsel %vm410_vm0, %v2308_v55, 0.0  ;;  %v2528_v9 = vmul.f32 %v2308_v55, %v2308_v55  ;;  %v2959_v27 = vpack.c.bf16 %v2308_v55, %v2308_v55 }
 0x22c   : > { %2762 = vst.msk [vmem:[%s4236_s16 + $0xc] sm:$0xf] %vm2758_vm12, %v2960_v12  ;;  %v2461_v30 = vadd.f32 %v2460_v26, %v2459_v23  ;;  %v1817_v52 = vpop.permute.xlu1 %1816  ;;  %v2563_v54 = vsel %vm410_vm0, %v2529_v36, 0.0 }
 0x22d   : > { %v2561_v58 = vsel %vm410_vm0, %v2528_v9, 0.0  ;;  %2761 = vst.msk [vmem:[%s4236_s16 + $0x8] sm:$0xf] %vm2758_vm12, %v2959_v27  ;;  %v1819_v31 = vpop.permute.xlu0 %1818 }
 0x22e   : > { %1891 = vst.msk [vmem:[#allocation3 + $0xb0] sm:$0xff] %vm1868_vm9, %v1817_v52  ;;  %v2562_v6 = vadd.f32 %v2561_v58, %v2560_v5  ;;  %1892 = vst.msk [vmem:[#allocation3 + $0xb8] sm:$0xff] %vm1868_vm9, %v1819_v31  ;;  %v2463_v32 = vadd.f32 %v2462_v61, %v2461_v30 }
 0x230   : > { %v1241_v18 = vpop.permute.xlu1 %1240  ;;  %v2564_v34 = vadd.f32 %v2563_v54, %v2562_v6 }
 0x231   : > { %1313 = vst.msk [vmem:[#allocation3 + $0xc0] sm:$0xff] %vm1288_vm6, %v1241_v18  ;;  %v1243_v40 = vpop.permute.xlu0 %1242 }
 0x232   : > { %1314 = vst.msk [vmem:[#allocation3 + $0xc8] sm:$0xff] %vm1288_vm6, %v1243_v40 }
 0x234   : > { %v2010_v38 = vpop.permute.xlu1 %2009 }
 0x235   : > { %2084 = vst.msk [vmem:[#allocation3 + $0xb0] sm:$0xff] %vm2061_vm10, %v2010_v38  ;;  %v2012_v1 = vpop.permute.xlu0 %2011 }
 0x236   : > { %2085 = vst.msk [vmem:[#allocation3 + $0xb8] sm:$0xff] %vm2061_vm10, %v2012_v1 }
 0x238   : > { %v1434_v35 = vpop.permute.xlu1 %1433 }
 0x239   : > { %1506 = vst.msk [vmem:[#allocation3 + $0xc0] sm:$0xff] %vm1481_vm7, %v1434_v35  ;;  %v1628_v17 = vpop.permute.xlu0 %1627 }
 0x23a   : > { %1700 = vst.msk [vmem:[#allocation3 + $0xc0] sm:$0xff] %vm1675_vm8, %v1628_v17 }
 0x23c   : > { %v1436_v42 = vpop.permute.xlu1 %1435  ;;  %v2116_v53 = vld [vmem:[#allocation3 + $0xb0] sm:$0xff] }
 0x23d   : > { %1507 = vst.msk [vmem:[#allocation3 + $0xc8] sm:$0xff] %vm1481_vm7, %v1436_v42  ;;  %v1630_v63 = vpop.permute.xlu0 %1629  ;;  %v3135_v43 = vpop.f32.mrb[4].mxu0  ;;  %3160 = vmatprep.mubr.msk.f32.mxu1 %vm2135_vm11, %v2116_v53  ;;  %v2117_v8 = vld [vmem:[#allocation3 + $0xb8] sm:$0xff] }
 0x23e   : > { %1701 = vst.msk [vmem:[#allocation3 + $0xc8] sm:$0xff] %vm1675_vm8, %v1630_v63  ;;  %v2531_v45 = vmul.f32 %v3135_v43, %v3135_v43  ;;  %v2962_v14 = vpack.c.bf16 %v3135_v43, %v3135_v43  ;;  %v2318_v60 = vpop.f32.mrb[5].mxu0  ;;  %3161 = vmatmul.mubr.msk.f32.gmra.mrb[6].mxu1 %vm2135_vm11, %v2117_v8  ;;  %v2466_v37 = vsel %vm410_vm0, %v3135_v43, 0.0 }
 0x23f   : > { %v2464_v57 = vsel %vm410_vm0, %v2318_v60, 0.0  ;;  %v2530_v3 = vmul.f32 %v2318_v60, %v2318_v60  ;;  %v2961_v49 = vpack.c.bf16 %v2318_v60, %v2318_v60 }
 0x240   : > { %2764 = vst.msk [vmem:[%s4236_s16 + $0x14] sm:$0xf] %vm2758_vm12, %v2962_v14  ;;  %v2465_v16 = vadd.f32 %v2464_v57, %v2463_v32  ;;  %v1052_v29 = vpop.permute.xlu1 %1051  ;;  %v2567_v11 = vsel %vm410_vm0, %v2531_v45, 0.0 }
 0x241   : > { %v2565_v41 = vsel %vm410_vm0, %v2530_v3, 0.0  ;;  %2763 = vst.msk [vmem:[%s4236_s16 + $0x10] sm:$0xf] %vm2758_vm12, %v2961_v49  ;;  %v1054_v19 = vpop.permute.xlu0 %1053 }
 0x242   : > { %1122 = vst.msk [vmem:[#allocation3 + $0xd0] sm:$0xff] %vm1095_vm5, %v1052_v29  ;;  %v2566_v59 = vadd.f32 %v2565_v41, %v2564_v34  ;;  %1123 = vst.msk [vmem:[#allocation3 + $0xd8] sm:$0xff] %vm1095_vm5, %v1054_v19  ;;  %v2467_v7 = vadd.f32 %v2466_v37, %v2465_v16 }
 0x244   : > { %v1821_v44 = vpop.permute.xlu1 %1820  ;;  %v2568_v20 = vadd.f32 %v2567_v11, %v2566_v59 }
 0x245   : > { %1893 = vst.msk [vmem:[#allocation3 + $0xc0] sm:$0xff] %vm1868_vm9, %v1821_v44  ;;  %v1823_v13 = vpop.permute.xlu0 %1822 }
 0x246   : > { %1894 = vst.msk [vmem:[#allocation3 + $0xc8] sm:$0xff] %vm1868_vm9, %v1823_v13 }
 0x248   : > { %v1245_v39 = vpop.permute.xlu1 %1244 }
 0x249   : > { %1315 = vst.msk [vmem:[#allocation3 + $0xd0] sm:$0xff] %vm1288_vm6, %v1245_v39  ;;  %v1247_v50 = vpop.permute.xlu0 %1246 }
 0x24a   : > { %1316 = vst.msk [vmem:[#allocation3 + $0xd8] sm:$0xff] %vm1288_vm6, %v1247_v50 }
 0x24c   : > { %v2014_v48 = vpop.permute.xlu1 %2013 }
 0x24d   : > { %2086 = vst.msk [vmem:[#allocation3 + $0xc0] sm:$0xff] %vm2061_vm10, %v2014_v48  ;;  %v2016_v56 = vpop.permute.xlu0 %2015 }
 0x24e   : > { %2087 = vst.msk [vmem:[#allocation3 + $0xc8] sm:$0xff] %vm2061_vm10, %v2016_v56 }
 0x250   : > { %v1438_v33 = vpop.permute.xlu1 %1437 }
 0x251   : > { %1508 = vst.msk [vmem:[#allocation3 + $0xd0] sm:$0xff] %vm1481_vm7, %v1438_v33  ;;  %v1632_v21 = vpop.permute.xlu0 %1631  ;;  %v3138_v23 = vpop.f32.mrb[6].mxu0 }
 0x252   : > { %1702 = vst.msk [vmem:[#allocation3 + $0xd0] sm:$0xff] %vm1675_vm8, %v1632_v21  ;;  %v2533_v0 = vmul.f32 %v3138_v23, %v3138_v23  ;;  %v2964_v5 = vpack.c.bf16 %v3138_v23, %v3138_v23  ;;  %v2328_v22 = vpop.f32.mrb[7].mxu0  ;;  %v2470_v28 = vsel %vm410_vm0, %v3138_v23, 0.0 }
 0x253   : > { %v2468_v51 = vsel %vm410_vm0, %v2328_v22, 0.0  ;;  %v2532_v24 = vmul.f32 %v2328_v22, %v2328_v22  ;;  %v2963_v25 = vpack.c.bf16 %v2328_v22, %v2328_v22 }
 0x254   : > { %2766 = vst.msk [vmem:[%s4236_s16 + $0x1c] sm:$0xf] %vm2758_vm12, %v2964_v5  ;;  %v2469_v2 = vadd.f32 %v2468_v51, %v2467_v7  ;;  %v1440_v47 = vpop.permute.xlu1 %1439  ;;  %v2118_v10 = vld [vmem:[#allocation3 + $0xc0] sm:$0xff]  ;;  %v2571_v15 = vsel %vm410_vm0, %v2533_v0, 0.0 }
 0x255   : > { %v2569_v62 = vsel %vm410_vm0, %v2532_v24, 0.0  ;;  %2765 = vst.msk [vmem:[%s4236_s16 + $0x18] sm:$0xf] %vm2758_vm12, %v2963_v25  ;;  %v1634_v46 = vpop.permute.xlu0 %1633  ;;  %3163 = vmatprep.mubr.msk.f32.mxu1 %vm2135_vm11, %v2118_v10  ;;  %v2119_v4 = vld [vmem:[#allocation3 + $0xc8] sm:$0xff] }
 0x256   : > { %1509 = vst.msk [vmem:[#allocation3 + $0xd8] sm:$0xff] %vm1481_vm7, %v1440_v47  ;;  %v2570_v36 = vadd.f32 %v2569_v62, %v2568_v20  ;;  %3164 = vmatmul.mubr.msk.f32.gmra.mrb[8].mxu1 %vm2135_vm11, %v2119_v4  ;;  %v2471_v12 = vadd.f32 %v2470_v28, %v2469_v2 }
 0x257   : > { %1703 = vst.msk [vmem:[#allocation3 + $0xd8] sm:$0xff] %vm1675_vm8, %v1634_v46 }
 0x258   : > { %v1056_v55 = vpop.permute.xlu1 %1055  ;;  %v2572_v61 = vadd.f32 %v2571_v15, %v2570_v36 }
 0x259   : > { %1124 = vst.msk [vmem:[#allocation3 + $0xe0] sm:$0xff] %vm1095_vm5, %v1056_v55  ;;  %v1058_v26 = vpop.permute.xlu0 %1057 }
 0x25a   : > { %1125 = vst.msk [vmem:[#allocation3 + $0xe8] sm:$0xff] %vm1095_vm5, %v1058_v26 }
 0x25c   : > { %v1825_v9 = vpop.permute.xlu1 %1824 }
 0x25d   : > { %1895 = vst.msk [vmem:[#allocation3 + $0xd0] sm:$0xff] %vm1868_vm9, %v1825_v9  ;;  %v1827_v27 = vpop.permute.xlu0 %1826 }
 0x25e   : > { %1896 = vst.msk [vmem:[#allocation3 + $0xd8] sm:$0xff] %vm1868_vm9, %v1827_v27 }
 0x260   : > { %v1249_v30 = vpop.permute.xlu1 %1248 }
 0x261   : > { %1317 = vst.msk [vmem:[#allocation3 + $0xe0] sm:$0xff] %vm1288_vm6, %v1249_v30  ;;  %v1251_v52 = vpop.permute.xlu0 %1250 }
 0x262   : > { %1318 = vst.msk [vmem:[#allocation3 + $0xe8] sm:$0xff] %vm1288_vm6, %v1251_v52 }
 0x264   : > { %v2018_v54 = vpop.permute.xlu1 %2017 }
 0x265   : > { %2088 = vst.msk [vmem:[#allocation3 + $0xd0] sm:$0xff] %vm2061_vm10, %v2018_v54  ;;  %v2020_v58 = vpop.permute.xlu0 %2019 }
 0x266   : > { %2089 = vst.msk [vmem:[#allocation3 + $0xd8] sm:$0xff] %vm2061_vm10, %v2020_v58 }
 0x268   : > { %v1442_v31 = vpop.permute.xlu1 %1441 }
 0x269   : > { %1510 = vst.msk [vmem:[#allocation3 + $0xe0] sm:$0xff] %vm1481_vm7, %v1442_v31  ;;  %v1636_v6 = vpop.permute.xlu0 %1635  ;;  %v3141_v32 = vpop.f32.mrb[8].mxu0 }
 0x26a   : > { %1704 = vst.msk [vmem:[#allocation3 + $0xe0] sm:$0xff] %vm1675_vm8, %v1636_v6  ;;  %v2535_v18 = vmul.f32 %v3141_v32, %v3141_v32  ;;  %v2966_v34 = vpack.c.bf16 %v3141_v32, %v3141_v32  ;;  %v2338_v40 = vpop.f32.mrb[9].mxu0  ;;  %v2474_v38 = vsel %vm410_vm0, %v3141_v32, 0.0 }
 0x26b   : > { %v2472_v1 = vsel %vm410_vm0, %v2338_v40, 0.0  ;;  %v2534_v35 = vmul.f32 %v2338_v40, %v2338_v40  ;;  %v2965_v17 = vpack.c.bf16 %v2338_v40, %v2338_v40 }
 0x26c   : > { %2768 = vst.msk [vmem:[%s4236_s16 + $0x24] sm:$0xf] %vm2758_vm12, %v2966_v34  ;;  %v2473_v42 = vadd.f32 %v2472_v1, %v2471_v12  ;;  %v1444_v53 = vpop.permute.xlu1 %1443  ;;  %v2120_v63 = vld [vmem:[#allocation3 + $0xd0] sm:$0xff]  ;;  %v2575_v43 = vsel %vm410_vm0, %v2535_v18, 0.0 }
 0x26d   : > { %v2573_v8 = vsel %vm410_vm0, %v2534_v35, 0.0  ;;  %2767 = vst.msk [vmem:[%s4236_s16 + $0x20] sm:$0xf] %vm2758_vm12, %v2965_v17  ;;  %v1638_v45 = vpop.permute.xlu0 %1637  ;;  %3166 = vmatprep.mubr.msk.f32.mxu1 %vm2135_vm11, %v2120_v63  ;;  %v2121_v14 = vld [vmem:[#allocation3 + $0xd8] sm:$0xff] }
 0x26e   : > { %1511 = vst.msk [vmem:[#allocation3 + $0xe8] sm:$0xff] %vm1481_vm7, %v1444_v53  ;;  %v2574_v60 = vadd.f32 %v2573_v8, %v2572_v61  ;;  %3167 = vmatmul.mubr.msk.f32.gmra.mrb[10].mxu1 %vm2135_vm11, %v2121_v14  ;;  %v2475_v37 = vadd.f32 %v2474_v38, %v2473_v42 }
 0x26f   : > { %1705 = vst.msk [vmem:[#allocation3 + $0xe8] sm:$0xff] %vm1675_vm8, %v1638_v45 }
 0x270   : > { %v1060_v57 = vpop.permute.xlu1 %1059  ;;  %v2576_v3 = vadd.f32 %v2575_v43, %v2574_v60 }
 0x271   : > { %1126 = vst.msk [vmem:[#allocation3 + $0xf0] sm:$0xff] %vm1095_vm5, %v1060_v57  ;;  %v1062_v49 = vpop.permute.xlu0 %1061 }
 0x272   : > { %1127 = vst.msk [vmem:[#allocation3 + $0xf8] sm:$0xff] %vm1095_vm5, %v1062_v49 }
 0x274   : > { %v1829_v16 = vpop.permute.xlu1 %1828 }
 0x275   : > { %1897 = vst.msk [vmem:[#allocation3 + $0xe0] sm:$0xff] %vm1868_vm9, %v1829_v16  ;;  %v1831_v29 = vpop.permute.xlu0 %1830 }
 0x276   : > { %1898 = vst.msk [vmem:[#allocation3 + $0xe8] sm:$0xff] %vm1868_vm9, %v1831_v29 }
 0x278   : > { %v1253_v11 = vpop.permute.xlu1 %1252 }
 0x279   : > { %1319 = vst.msk [vmem:[#allocation3 + $0xf0] sm:$0xff] %vm1288_vm6, %v1253_v11  ;;  %v1255_v41 = vpop.permute.xlu0 %1254 }
 0x27a   : > { %1320 = vst.msk [vmem:[#allocation3 + $0xf8] sm:$0xff] %vm1288_vm6, %v1255_v41 }
 0x27c   : > { %v2022_v19 = vpop.permute.xlu1 %2021 }
 0x27d   : > { %2090 = vst.msk [vmem:[#allocation3 + $0xe0] sm:$0xff] %vm2061_vm10, %v2022_v19  ;;  %v2024_v59 = vpop.permute.xlu0 %2023 }
 0x27e   : > { %2091 = vst.msk [vmem:[#allocation3 + $0xe8] sm:$0xff] %vm2061_vm10, %v2024_v59 }
 0x280   : > { %v1446_v7 = vpop.permute.xlu1 %1445 }
 0x281   : > { %1512 = vst.msk [vmem:[#allocation3 + $0xf0] sm:$0xff] %vm1481_vm7, %v1446_v7  ;;  %v3144_v44 = vpop.f32.mrb[10].mxu0  ;;  %v1640_v20 = vpop.permute.xlu0 %1639 }
 0x282   : > { %v2537_v13 = vmul.f32 %v3144_v44, %v3144_v44  ;;  %v2968_v39 = vpack.c.bf16 %v3144_v44, %v3144_v44  ;;  %v2348_v50 = vpop.f32.mrb[11].mxu0  ;;  %1706 = vst.msk [vmem:[#allocation3 + $0xf0] sm:$0xff] %vm1675_vm8, %v1640_v20  ;;  %v2478_v48 = vsel %vm410_vm0, %v3144_v44, 0.0 }
 0x283   : > { %v2476_v56 = vsel %vm410_vm0, %v2348_v50, 0.0  ;;  %v2536_v33 = vmul.f32 %v2348_v50, %v2348_v50  ;;  %v2967_v21 = vpack.c.bf16 %v2348_v50, %v2348_v50 }
 0x284   : > { %2770 = vst.msk [vmem:[%s4236_s16 + $0x2c] sm:$0xf] %vm2758_vm12, %v2968_v39  ;;  %v2477_v23 = vadd.f32 %v2476_v56, %v2475_v37  ;;  %v1448_v0 = vpop.permute.xlu1 %1447  ;;  %v2122_v5 = vld [vmem:[#allocation3 + $0xe0] sm:$0xff]  ;;  %v2579_v22 = vsel %vm410_vm0, %v2537_v13, 0.0 }
 0x285   : > { %v2577_v28 = vsel %vm410_vm0, %v2536_v33, 0.0  ;;  %2769 = vst.msk [vmem:[%s4236_s16 + $0x28] sm:$0xf] %vm2758_vm12, %v2967_v21  ;;  %3169 = vmatprep.mubr.msk.f32.mxu1 %vm2135_vm11, %v2122_v5  ;;  %v2123_v51 = vld [vmem:[#allocation3 + $0xe8] sm:$0xff]  ;;  %v1833_v24 = vpop.permute.xlu0 %1832 }
 0x286   : > { %1513 = vst.msk [vmem:[#allocation3 + $0xf8] sm:$0xff] %vm1481_vm7, %v1448_v0  ;;  %v2578_v25 = vadd.f32 %v2577_v28, %v2576_v3  ;;  %3170 = vmatmul.mubr.msk.f32.gmra.mrb[12].mxu1 %vm2135_vm11, %v2123_v51  ;;  %v2479_v2 = vadd.f32 %v2478_v48, %v2477_v23 }
 0x287   : > { %1899 = vst.msk [vmem:[#allocation3 + $0xf0] sm:$0xff] %vm1868_vm9, %v1833_v24 }
 0x288   : > { %v1642_v47 = vpop.permute.xlu1 %1641  ;;  %v2580_v10 = vadd.f32 %v2579_v22, %v2578_v25 }
 0x289   : > { %1707 = vst.msk [vmem:[#allocation3 + $0xf8] sm:$0xff] %vm1675_vm8, %v1642_v47  ;;  %v2026_v15 = vpop.permute.xlu0 %2025 }
 0x28a   : > { %2092 = vst.msk [vmem:[#allocation3 + $0xf0] sm:$0xff] %vm2061_vm10, %v2026_v15 }
 0x28c   : > { %v1835_v62 = vpop.permute.xlu1 %1834 }
 0x28d   : > { %1900 = vst.msk [vmem:[#allocation3 + $0xf8] sm:$0xff] %vm1868_vm9, %v1835_v62 }
 0x290   : > { %v2028_v46 = vpop.permute.xlu1 %2027 }
 0x291   : > { %2093 = vst.msk [vmem:[#allocation3 + $0xf8] sm:$0xff] %vm2061_vm10, %v2028_v46  ;;  %v2124_v4 = vld [vmem:[#allocation3 + $0xf0] sm:$0xff] }
 0x292   : > { %3172 = vmatprep.mubr.msk.f32.mxu1 %vm2135_vm11, %v2124_v4 }
 0x298   : > { %v2125_v36 = vld [vmem:[#allocation3 + $0xf8] sm:$0xff] }
 0x299   : > { %v3147_v12 = vpop.f32.mrb[12].mxu0  ;;  %3173 = vmatmul.mubr.msk.f32.gmra.mrb[14].mxu1 %vm2135_vm11, %v2125_v36 }
 0x29a   : > { %v2539_v55 = vmul.f32 %v3147_v12, %v3147_v12  ;;  %v2970_v61 = vpack.c.bf16 %v3147_v12, %v3147_v12  ;;  %v2358_v26 = vpop.f32.mrb[13].mxu0  ;;  %v2482_v9 = vsel %vm410_vm0, %v3147_v12, 0.0 }
 0x29b   : > { %v2480_v27 = vsel %vm410_vm0, %v2358_v26, 0.0  ;;  %v2538_v30 = vmul.f32 %v2358_v26, %v2358_v26  ;;  %v2969_v52 = vpack.c.bf16 %v2358_v26, %v2358_v26 }
 0x29c   : > { %2772 = vst.msk [vmem:[%s4236_s16 + $0x34] sm:$0xf] %vm2758_vm12, %v2970_v61  ;;  %v2481_v54 = vadd.f32 %v2480_v27, %v2479_v2  ;;  %v2583_v58 = vsel %vm410_vm0, %v2539_v55, 0.0 }
 0x29d   : > { %v2581_v31 = vsel %vm410_vm0, %v2538_v30, 0.0  ;;  %2771 = vst.msk [vmem:[%s4236_s16 + $0x30] sm:$0xf] %vm2758_vm12, %v2969_v52 }
 0x29e   : > { %v2582_v6 = vadd.f32 %v2581_v31, %v2580_v10  ;;  %v2483_v32 = vadd.f32 %v2482_v9, %v2481_v54 }
 0x2a0   : > { %v2584_v18 = vadd.f32 %v2583_v58, %v2582_v6 }
 0x2b1   : > { %v3150_v34 = vpop.f32.mrb[14].mxu0 }
 0x2b2   : > { %v2541_v40 = vmul.f32 %v3150_v34, %v3150_v34  ;;  %v2972_v38 = vpack.c.bf16 %v3150_v34, %v3150_v34  ;;  %v2368_v1 = vpop.f32.mrb[15].mxu0  ;;  %v2486_v35 = vsel %vm410_vm0, %v3150_v34, 0.0 }
 0x2b3   : > { %v2484_v17 = vsel %vm410_vm0, %v2368_v1, 0.0  ;;  %v2540_v42 = vmul.f32 %v2368_v1, %v2368_v1  ;;  %v2971_v53 = vpack.c.bf16 %v2368_v1, %v2368_v1 }
 0x2b4   : > { %2774 = vst.msk [vmem:[%s4236_s16 + $0x3c] sm:$0xf] %vm2758_vm12, %v2972_v38  ;;  %v2485_v63 = vadd.f32 %v2484_v17, %v2483_v32  ;;  %v2587_v43 = vsel %vm410_vm0, %v2541_v40, 0.0 }
 0x2b5   : > { %v2585_v8 = vsel %vm410_vm0, %v2540_v42, 0.0  ;;  %2773 = vst.msk [vmem:[%s4236_s16 + $0x38] sm:$0xf] %vm2758_vm12, %v2971_v53 }
 0x2b6   : > { %v2487_v45 = vadd.f32 %v2486_v35, %v2485_v63  ;;  %v2586_v14 = vadd.f32 %v2585_v8, %v2584_v18 }
 0x2b8   : > { %v2588_v60 = vadd.f32 %v2587_v43, %v2586_v14 }
 0x2c9   : > { %v3153_v37 = vpop.f32.mrb[0].mxu1 }
 0x2ca   : > { %v2543_v57 = vmul.f32 %v3153_v37, %v3153_v37  ;;  %v2974_v3 = vpack.c.bf16 %v3153_v37, %v3153_v37  ;;  %v2378_v49 = vpop.f32.mrb[1].mxu1  ;;  %v2490_v16 = vsel %vm410_vm0, %v3153_v37, 0.0 }
 0x2cb   : > { %v2488_v29 = vsel %vm410_vm0, %v2378_v49, 0.0  ;;  %v2542_v11 = vmul.f32 %v2378_v49, %v2378_v49  ;;  %v2973_v41 = vpack.c.bf16 %v2378_v49, %v2378_v49 }
 0x2cc   : > { %2776 = vst.msk [vmem:[%s4236_s16 + $0x44] sm:$0xf] %vm2758_vm12, %v2974_v3  ;;  %v2489_v19 = vadd.f32 %v2488_v29, %v2487_v45  ;;  %v2591_v59 = vsel %vm410_vm0, %v2543_v57, 0.0 }
 0x2cd   : > { %v2589_v7 = vsel %vm410_vm0, %v2542_v11, 0.0  ;;  %2775 = vst.msk [vmem:[%s4236_s16 + $0x40] sm:$0xf] %vm2758_vm12, %v2973_v41 }
 0x2ce   : > { %v2590_v44 = vadd.f32 %v2589_v7, %v2588_v60  ;;  %v2491_v20 = vadd.f32 %v2490_v16, %v2489_v19 }
 0x2d0   : > { %v2592_v13 = vadd.f32 %v2591_v59, %v2590_v44 }
 0x2e1   : > { %v3156_v39 = vpop.f32.mrb[2].mxu1 }
 0x2e2   : > { %v2545_v50 = vmul.f32 %v3156_v39, %v3156_v39  ;;  %v2976_v48 = vpack.c.bf16 %v3156_v39, %v3156_v39  ;;  %v2388_v56 = vpop.f32.mrb[3].mxu1  ;;  %v2494_v33 = vsel %vm410_vm0, %v3156_v39, 0.0 }
 0x2e3   : > { %v2492_v21 = vsel %vm410_vm0, %v2388_v56, 0.0  ;;  %v2544_v23 = vmul.f32 %v2388_v56, %v2388_v56  ;;  %v2975_v0 = vpack.c.bf16 %v2388_v56, %v2388_v56 }
 0x2e4   : > { %2778 = vst.msk [vmem:[%s4236_s16 + $0x4c] sm:$0xf] %vm2758_vm12, %v2976_v48  ;;  %v2493_v5 = vadd.f32 %v2492_v21, %v2491_v20  ;;  %v2595_v22 = vsel %vm410_vm0, %v2545_v50, 0.0 }
 0x2e5   : > { %v2593_v28 = vsel %vm410_vm0, %v2544_v23, 0.0  ;;  %2777 = vst.msk [vmem:[%s4236_s16 + $0x48] sm:$0xf] %vm2758_vm12, %v2975_v0 }
 0x2e6   : > { %v2594_v51 = vadd.f32 %v2593_v28, %v2592_v13  ;;  %v2495_v24 = vadd.f32 %v2494_v33, %v2493_v5 }
 0x2e8   : > { %v2596_v25 = vadd.f32 %v2595_v22, %v2594_v51 }
 0x2f9   : > { %v3159_v2 = vpop.f32.mrb[4].mxu1 }
 0x2fa   : > { %v2547_v47 = vmul.f32 %v3159_v2, %v3159_v2  ;;  %v2978_v10 = vpack.c.bf16 %v3159_v2, %v3159_v2  ;;  %v2398_v15 = vpop.f32.mrb[5].mxu1  ;;  %v2498_v62 = vsel %vm410_vm0, %v3159_v2, 0.0 }
 0x2fb   : > { %v2496_v46 = vsel %vm410_vm0, %v2398_v15, 0.0  ;;  %v2546_v4 = vmul.f32 %v2398_v15, %v2398_v15  ;;  %v2977_v36 = vpack.c.bf16 %v2398_v15, %v2398_v15 }
 0x2fc   : > { %2780 = vst.msk [vmem:[%s4236_s16 + $0x54] sm:$0xf] %vm2758_vm12, %v2978_v10  ;;  %v2497_v12 = vadd.f32 %v2496_v46, %v2495_v24  ;;  %v2599_v55 = vsel %vm410_vm0, %v2547_v47, 0.0 }
 0x2fd   : > { %v2597_v61 = vsel %vm410_vm0, %v2546_v4, 0.0  ;;  %2779 = vst.msk [vmem:[%s4236_s16 + $0x50] sm:$0xf] %vm2758_vm12, %v2977_v36 }
 0x2fe   : > { %v2598_v26 = vadd.f32 %v2597_v61, %v2596_v25  ;;  %v2499_v9 = vadd.f32 %v2498_v62, %v2497_v12 }
 0x300   : > { %v2600_v27 = vadd.f32 %v2599_v55, %v2598_v26 }
 0x311   : > { %v3162_v30 = vpop.f32.mrb[6].mxu1 }
 0x312   : > { %v2549_v52 = vmul.f32 %v3162_v30, %v3162_v30  ;;  %v2980_v54 = vpack.c.bf16 %v3162_v30, %v3162_v30  ;;  %v2408_v58 = vpop.f32.mrb[7].mxu1  ;;  %v2502_v31 = vsel %vm410_vm0, %v3162_v30, 0.0 }
 0x313   : > { %v2500_v6 = vsel %vm410_vm0, %v2408_v58, 0.0  ;;  %v2548_v32 = vmul.f32 %v2408_v58, %v2408_v58  ;;  %v2979_v18 = vpack.c.bf16 %v2408_v58, %v2408_v58 }
 0x314   : > { %2782 = vst.msk [vmem:[%s4236_s16 + $0x5c] sm:$0xf] %vm2758_vm12, %v2980_v54  ;;  %v2501_v34 = vadd.f32 %v2500_v6, %v2499_v9  ;;  %v2603_v40 = vsel %vm410_vm0, %v2549_v52, 0.0 }
 0x315   : > { %v2601_v38 = vsel %vm410_vm0, %v2548_v32, 0.0  ;;  %2781 = vst.msk [vmem:[%s4236_s16 + $0x58] sm:$0xf] %vm2758_vm12, %v2979_v18 }
 0x316   : > { %v2602_v1 = vadd.f32 %v2601_v38, %v2600_v27  ;;  %v2503_v35 = vadd.f32 %v2502_v31, %v2501_v34 }
 0x318   : > { %v2604_v17 = vadd.f32 %v2603_v40, %v2602_v1 }
 0x329   : > { %v3165_v42 = vpop.f32.mrb[8].mxu1 }
 0x32a   : > { %v2551_v53 = vmul.f32 %v3165_v42, %v3165_v42  ;;  %v2982_v63 = vpack.c.bf16 %v3165_v42, %v3165_v42  ;;  %v2418_v43 = vpop.f32.mrb[9].mxu1  ;;  %v2506_v8 = vsel %vm410_vm0, %v3165_v42, 0.0 }
 0x32b   : > { %v2504_v45 = vsel %vm410_vm0, %v2418_v43, 0.0  ;;  %v2550_v14 = vmul.f32 %v2418_v43, %v2418_v43  ;;  %v2981_v60 = vpack.c.bf16 %v2418_v43, %v2418_v43 }
 0x32c   : > { %2784 = vst.msk [vmem:[%s4236_s16 + $0x64] sm:$0xf] %vm2758_vm12, %v2982_v63  ;;  %v2505_v37 = vadd.f32 %v2504_v45, %v2503_v35  ;;  %v2607_v57 = vsel %vm410_vm0, %v2551_v53, 0.0 }
 0x32d   : > { %v2605_v3 = vsel %vm410_vm0, %v2550_v14, 0.0  ;;  %2783 = vst.msk [vmem:[%s4236_s16 + $0x60] sm:$0xf] %vm2758_vm12, %v2981_v60 }
 0x32e   : > { %v2606_v49 = vadd.f32 %v2605_v3, %v2604_v17  ;;  %v2507_v16 = vadd.f32 %v2506_v8, %v2505_v37 }
 0x330   : > { %v2608_v29 = vadd.f32 %v2607_v57, %v2606_v49 }
 0x341   : > { %v3168_v11 = vpop.f32.mrb[10].mxu1 }
 0x342   : > { %v2553_v41 = vmul.f32 %v3168_v11, %v3168_v11  ;;  %v2984_v19 = vpack.c.bf16 %v3168_v11, %v3168_v11  ;;  %v2428_v59 = vpop.f32.mrb[11].mxu1  ;;  %v2510_v7 = vsel %vm410_vm0, %v3168_v11, 0.0 }
 0x343   : > { %v2508_v44 = vsel %vm410_vm0, %v2428_v59, 0.0  ;;  %v2552_v20 = vmul.f32 %v2428_v59, %v2428_v59  ;;  %v2983_v13 = vpack.c.bf16 %v2428_v59, %v2428_v59 }
 0x344   : > { %2786 = vst.msk [vmem:[%s4236_s16 + $0x6c] sm:$0xf] %vm2758_vm12, %v2984_v19  ;;  %v2509_v39 = vadd.f32 %v2508_v44, %v2507_v16  ;;  %v2611_v50 = vsel %vm410_vm0, %v2553_v41, 0.0 }
 0x345   : > { %v2609_v48 = vsel %vm410_vm0, %v2552_v20, 0.0  ;;  %2785 = vst.msk [vmem:[%s4236_s16 + $0x68] sm:$0xf] %vm2758_vm12, %v2983_v13 }
 0x346   : > { %v2610_v56 = vadd.f32 %v2609_v48, %v2608_v29  ;;  %v2511_v33 = vadd.f32 %v2510_v7, %v2509_v39 }
 0x348   : > { %v2612_v21 = vadd.f32 %v2611_v50, %v2610_v56 }
 0x359   : > { %v3171_v23 = vpop.f32.mrb[12].mxu1 }
 0x35a   : > { %v2555_v0 = vmul.f32 %v3171_v23, %v3171_v23  ;;  %v2986_v5 = vpack.c.bf16 %v3171_v23, %v3171_v23  ;;  %v2438_v22 = vpop.f32.mrb[13].mxu1  ;;  %v2514_v28 = vsel %vm410_vm0, %v3171_v23, 0.0 }
 0x35b   : > { %v2512_v51 = vsel %vm410_vm0, %v2438_v22, 0.0  ;;  %v2554_v24 = vmul.f32 %v2438_v22, %v2438_v22  ;;  %v2985_v25 = vpack.c.bf16 %v2438_v22, %v2438_v22 }
 0x35c   : > { %2788 = vst.msk [vmem:[%s4236_s16 + $0x74] sm:$0xf] %vm2758_vm12, %v2986_v5  ;;  %v2513_v2 = vadd.f32 %v2512_v51, %v2511_v33  ;;  %v2615_v47 = vsel %vm410_vm0, %v2555_v0, 0.0 }
 0x35d   : > { %v2613_v10 = vsel %vm410_vm0, %v2554_v24, 0.0  ;;  %2787 = vst.msk [vmem:[%s4236_s16 + $0x70] sm:$0xf] %vm2758_vm12, %v2985_v25 }
 0x35e   : > { %v2614_v15 = vadd.f32 %v2613_v10, %v2612_v21  ;;  %v2515_v62 = vadd.f32 %v2514_v28, %v2513_v2 }
 0x360   : > { %v2616_v46 = vadd.f32 %v2615_v47, %v2614_v15 }
 0x36c   : > { %v3174_v4 = vpop.f32.mrb[14].mxu1 }
 0x36d   : > { %v2988_v36 = vpack.c.bf16 %v3174_v4, %v3174_v4  ;;  %v2448_v12 = vpop.f32.mrb[15].mxu1  ;;  %v2557_v55 = vmul.f32 %v3174_v4, %v3174_v4  ;;  %v2518_v30 = vsel %vm410_vm0, %v3174_v4, 0.0 }
 0x36e   : > { %v2516_v61 = vsel %vm410_vm0, %v2448_v12, 0.0  ;;  %v2556_v26 = vmul.f32 %v2448_v12, %v2448_v12  ;;  %v2987_v9 = vpack.c.bf16 %v2448_v12, %v2448_v12 }
 0x36f   : > { %2790 = vst.msk [vmem:[%s4236_s16 + $0x7c] sm:$0xf] %vm2758_vm12, %v2988_v36  ;;  %v2517_v27 = vadd.f32 %v2516_v61, %v2515_v62  ;;  %v2619_v31 = vsel %vm410_vm0, %v2557_v55, 0.0 }
 0x370   : > { %v2617_v52 = vsel %vm410_vm0, %v2556_v26, 0.0  ;;  %2789 = vst.msk [vmem:[%s4236_s16 + $0x78] sm:$0xf] %vm2758_vm12, %v2987_v9 }
 0x371   : > { %v2519_v54 = vadd.f32 %v2518_v30, %v2517_v27  ;;  %v2618_v58 = vadd.f32 %v2617_v52, %v2616_v46 }
 0x373   : > { %v2520_v6 = vrot.slane %v2519_v54, 4  ;;  %v2620_v32 = vadd.f32 %v2619_v31, %v2618_v58 }
 0x375   : > { %v2521_v18 = vadd.f32 %v2520_v6, %v2519_v54  ;;  %v2621_v34 = vrot.slane %v2620_v32, 4 }
 0x377   : > { %v2522_v40 = vrot.slane %v2521_v18, 2  ;;  %v2622_v38 = vadd.f32 %v2621_v34, %v2620_v32 }
 0x379   : > { %v2523_v1 = vadd.f32 %v2522_v40, %v2521_v18  ;;  %v2623_v35 = vrot.slane %v2622_v38, 2 }
 0x37b   : > { %v2524_v17 = vrot.slane %v2523_v1, 1  ;;  %v2624_v42 = vadd.f32 %v2623_v35, %v2622_v38 }
 0x37d   : > { %v2625_v53 = vrot.slane %v2624_v42, 1  ;;  %v2525_v63 = vadd.f32 %v2524_v17, %v2523_v1 }
 0x37f   : > { %v2626_v43 = vadd.f32 %v2625_v53, %v2624_v42 }
 0x381   : > { %v2628_v8 = vsel %vm2627_vm13, %v2525_v63, %v2626_v43 }
 0x382   : > { %2629 = vst.msk [vmem:[%s235_s17] sm:$0x3] %vm413_vm1, %v2628_v8 }
 0x383 PF: > { %s16_s18 = sadd.s32 1, %s3226_s18  }
 0x384   : > { %p13_p4 = scmp.ge.s32.totalorder %s16_s18, 4  }
 0x386   :  { %15 = sbr.rel (!%p13_p4) target bundleno = 1 (0x1), region = 81 }

</bundles_post_ra>
